<compile_context>
chip_gen: v7x
topology: tpu7x:2x2x1
jax: 0.10.0
libtpu: 0.0.40
codegen_flags: <defaults>
</compile_context>

<pallas_src>
import functools

import jax
import jax.numpy as jnp
from jax.experimental import pallas as pl
from jax.experimental.pallas import tpu as pltpu

INPUT_DIM = 2
OUTPUT_DIM = 1
HIDDEN_DIM = 128
NUM_LAYERS = 3        # number of hidden layers (PyTorch module defaults)

LANES = 128
MIN_TM = 1024
DEFAULT_TM = 4096     # rows (collocation points) per grid step


def _pinn_kernel(x_ref,               # (2, tm)        f32, lane-dense points
                 w1_ref, b1_ref,      # (128, 2) f32,  (128, 1) f32
                 w2_ref, b2_ref,      # (128,128) bf16,(128, 1) f32
                 w3_ref, b3_ref,      # (128,128) bf16,(128, 1) f32
                 w4_ref, b4_ref,      # (8, 128) bf16 (row 0 real), (1,1) SMEM
                 o_ref):              # (1, tm)        f32, lane-dense output
    xt = x_ref[...]                                   # (2, tm)
    w1 = w1_ref[...]                                  # (128, 2)

    # ---- Layer 1 on the VPU (K=2 would waste the MXU): two outer-product FMAs.
    h = jnp.tanh(w1[:, 0:1] * xt[0:1, :]
                 + w1[:, 1:2] * xt[1:2, :]
                 + b1_ref[...])                       # (128, tm) f32
    h = h.astype(jnp.bfloat16)

    # ---- Layers 2 & 3: bf16 operands on the MXU, f32 accumulation.
    # (tanh kept in f32 for v5e compatibility; bf16 tanh is a further v6e/v7x win.)
    h = jnp.tanh(jnp.dot(w2_ref[...], h, preferred_element_type=jnp.float32)
                 + b2_ref[...]).astype(jnp.bfloat16)
    h = jnp.tanh(jnp.dot(w3_ref[...], h, preferred_element_type=jnp.float32)
                 + b3_ref[...]).astype(jnp.bfloat16)

    # ---- Layer 4: (8,128) @ (128,tm) -> (8,tm); row 0 holds the real output.
    # w4 is zero-padded to 8 rows in the wrapper so the MXU sees a full
    # sublane tile; rows 1..7 are discarded.  Result is lane-dense -> one
    # unmasked store + dense DMA writeback.
    out = jnp.dot(w4_ref[...], h, preferred_element_type=jnp.float32)  # (8, tm)
    o_ref[...] = (out[0:1, :] + b4_ref[0, 0]).astype(o_ref.dtype)


@functools.partial(jax.jit, static_argnames=("tm",))
def _pinn_forward_impl(x, params, *, tm):
    n, in_dim = x.shape
    assert in_dim == INPUT_DIM
    assert tm % LANES == 0

    n_pad = pl.cdiv(n, tm) * tm
    xt = x.T                                   # (2, n) lane-dense points
    if n_pad != n:
        xt = jnp.pad(xt, ((0, 0), (0, n_pad - n)))

    w1, b1 = params["w1"], params["b1"]                     # (128,2),  (128,1)
    w2, b2 = params["w2"].astype(jnp.bfloat16), params["b2"]
    w3, b3 = params["w3"].astype(jnp.bfloat16), params["b3"]
    # Pad the output weights to 8 rows (sublane tile) so the last matmul has
    # a full-tile LHS; only row 0 is used.
    w4p = jnp.pad(params["w4"], ((0, 8 - OUTPUT_DIM), (0, 0))).astype(jnp.bfloat16)
    b4 = params["b4"]                                       # (1, 1) f32 -> SMEM

    const = lambda a: pl.BlockSpec(a.shape, lambda i: (0, 0))

    cost = pl.CostEstimate(
        flops=2 * n_pad * (INPUT_DIM * HIDDEN_DIM
                           + (NUM_LAYERS - 1) * HIDDEN_DIM * HIDDEN_DIM
                           + HIDDEN_DIM * OUTPUT_DIM),
        transcendentals=NUM_LAYERS * n_pad * HIDDEN_DIM,
        bytes_accessed=(4 * n_pad * (INPUT_DIM + OUTPUT_DIM)
                        + 2 * (2 * HIDDEN_DIM * HIDDEN_DIM + 8 * HIDDEN_DIM)
                        + 4 * (HIDDEN_DIM * INPUT_DIM + 3 * HIDDEN_DIM + 1)),
    )

    out = pl.pallas_call(
        _pinn_kernel,
        out_shape=jax.ShapeDtypeStruct((OUTPUT_DIM, n_pad), jnp.float32),
        grid_spec=pltpu.PrefetchScalarGridSpec(
            num_scalar_prefetch=0,
            grid=(n_pad // tm,),
            in_specs=[
                pl.BlockSpec((INPUT_DIM, tm), lambda i: (0, i)),   # points
                const(w1), const(b1),
                const(w2), const(b2),
                const(w3), const(b3),
                const(w4p),
                pl.BlockSpec(memory_space=pltpu.MemorySpace.SMEM),  # b4 scalar
            ],
            out_specs=pl.BlockSpec((OUTPUT_DIM, tm), lambda i: (0, i)),
        ),
        compiler_params=pltpu.CompilerParams(
            dimension_semantics=("parallel",)),
        cost_estimate=cost,
    )(xt, w1, b1, w2, b2, w3, b3, w4p, b4)

    # (1, n_pad) lane-dense slab -> PyTorch (N, 1) layout.
    return out[:, :n].T


def pinn_forward(x, params, *, tm=None):
    """x: (N, 2) f32 collocation points -> (N, 1) f32 network output."""
    n = x.shape[0]
    if tm is None:
        tm = DEFAULT_TM
        # v7x has 2 TensorCores: keep >= 2 "parallel" grid steps when N allows.
        while tm > MIN_TM and pl.cdiv(n, tm) < 2:
            tm -= MIN_TM
    return _pinn_forward_impl(x, params, tm=tm)


def init_params(key):
    """torch.nn.Linear-style init, U(-1/sqrt(fan_in), +1/sqrt(fan_in)).

    Weights kept in torch layout (out_features, in_features); biases as
    column vectors (out_features, 1)."""
    dims = [INPUT_DIM] + [HIDDEN_DIM] * NUM_LAYERS + [OUTPUT_DIM]
    params = {}
    for li, (fan_in, fan_out) in enumerate(zip(dims[:-1], dims[1:]), start=1):
        key, kw, kb = jax.random.split(key, 3)
        bound = 1.0 / (fan_in ** 0.5)
        params[f"w{li}"] = jax.random.uniform(
            kw, (fan_out, fan_in), jnp.float32, minval=-bound, maxval=bound)
        params[f"b{li}"] = jax.random.uniform(
            kb, (fan_out, 1), jnp.float32, minval=-bound, maxval=bound)
    return params


def pinn_reference(x, params, *, matmul_dtype=jnp.float32):
    """Pure-JAX reference of the same forward pass.

    With matmul_dtype=bf16 it mirrors the kernel numerics exactly (bf16 MXU
    operands, f32 accumulation, f32 tanh); with f32 it is the 'true' f32
    forward used only as a loose sanity check."""
    w1, b1 = params["w1"], params["b1"]
    xt = x.T
    h = jnp.tanh(w1[:, 0:1] * xt[0:1, :] + w1[:, 1:2] * xt[1:2, :] + b1)
    for li in (2, 3):
        w = params[f"w{li}"].astype(matmul_dtype)
        z = jnp.dot(w, h.astype(matmul_dtype),
                    preferred_element_type=jnp.float32) + params[f"b{li}"]
        h = jnp.tanh(z)
    w4 = params["w4"].astype(matmul_dtype)
    out = jnp.dot(w4, h.astype(matmul_dtype),
                  preferred_element_type=jnp.float32) + params["b4"]
    return out.T


if __name__ == "__main__":
    key = jax.random.PRNGKey(0)
    kp, kx = jax.random.split(key)
    params = init_params(kp)

    # Two batch sizes: one below a single tile (padding path, grid=1) and one
    # that exercises the multi-step "parallel" grid / tm-selection path.
    for N in (200, 2500):
        kx, kn = jax.random.split(kx)
        x = jax.random.uniform(kn, (N, INPUT_DIM), jnp.float32)

        out = jax.block_until_ready(pinn_forward(x, params))
        assert out.shape == (N, OUTPUT_DIM)

        # Strict check vs a reference that mirrors the kernel's bf16-MXU numerics.
        ref_bf16 = pinn_reference(x, params, matmul_dtype=jnp.bfloat16)
        assert jnp.allclose(out, ref_bf16, atol=1e-3, rtol=1e-3), \
            f"mismatch vs bf16-matched reference (N={N})"

        # Loose check vs the full-f32 reference (bf16 operands cost ~1e-2 abs).
        ref_f32 = pinn_reference(x, params, matmul_dtype=jnp.float32)
        assert jnp.allclose(out, ref_f32, atol=5e-2, rtol=5e-2), \
            f"mismatch vs f32 reference (N={N})"

    print("KERNEL_OK")
</pallas_src>

<mosaic_0001>
module attributes {stable_mosaic.version = 11 : i64} {
  func.func @_pinn_kernel(%arg0: i32, %arg1: memref<2x1024xf32, #tpu.memory_space<vmem>>, %arg2: memref<128x2xf32, #tpu.memory_space<vmem>>, %arg3: memref<128x1xf32, #tpu.memory_space<vmem>>, %arg4: memref<128x128xbf16, #tpu.memory_space<vmem>>, %arg5: memref<128x1xf32, #tpu.memory_space<vmem>>, %arg6: memref<128x128xbf16, #tpu.memory_space<vmem>>, %arg7: memref<128x1xf32, #tpu.memory_space<vmem>>, %arg8: memref<8x128xbf16, #tpu.memory_space<vmem>>, %arg9: memref<1x1xf32, #tpu.memory_space<smem>>, %arg10: memref<1x1024xf32, #tpu.memory_space<vmem>>) attributes {dimension_semantics = [#tpu.dimension_semantics<parallel>], iteration_bounds = array<i64: 1>, scalar_prefetch = 0 : i64, scratch_operands = 0 : i64, tpu.core_type = #tpu.core_type<tc>, window_params = [{transform_indices = @transform_0, window_bounds = array<i64: 2, 1024>}, {pipeline_mode = #tpu.pipeline_mode<synchronous>, transform_indices = @transform_1, window_bounds = array<i64: 128, 2>}, {pipeline_mode = #tpu.pipeline_mode<synchronous>, transform_indices = @transform_2, window_bounds = array<i64: 128, 1>}, {pipeline_mode = #tpu.pipeline_mode<synchronous>, transform_indices = @transform_3, window_bounds = array<i64: 128, 128>}, {pipeline_mode = #tpu.pipeline_mode<synchronous>, transform_indices = @transform_4, window_bounds = array<i64: 128, 1>}, {pipeline_mode = #tpu.pipeline_mode<synchronous>, transform_indices = @transform_5, window_bounds = array<i64: 128, 128>}, {pipeline_mode = #tpu.pipeline_mode<synchronous>, transform_indices = @transform_6, window_bounds = array<i64: 128, 1>}, {pipeline_mode = #tpu.pipeline_mode<synchronous>, transform_indices = @transform_7, window_bounds = array<i64: 8, 128>}, {transform_indices = @transform_8, window_bounds = array<i64: 1, 1>}, {transform_indices = @transform_9, window_bounds = array<i64: 1, 1024>}]} {
    %c0 = arith.constant 0 : index
    %c0_0 = arith.constant 0 : index
    %0 = vector.load %arg1[%c0, %c0_0] : memref<2x1024xf32, #tpu.memory_space<vmem>>, vector<2x1024xf32>
    %c0_1 = arith.constant 0 : index
    %c0_2 = arith.constant 0 : index
    %1 = vector.load %arg2[%c0_1, %c0_2] : memref<128x2xf32, #tpu.memory_space<vmem>>, vector<128x2xf32>
    %2 = vector.extract_strided_slice %1 {offsets = [0, 0], sizes = [128, 1], strides = [1, 1]} : vector<128x2xf32> to vector<128x1xf32>
    %3 = vector.extract_strided_slice %0 {offsets = [0, 0], sizes = [1, 1024], strides = [1, 1]} : vector<2x1024xf32> to vector<1x1024xf32>
    %4 = vector.broadcast %2 : vector<128x1xf32> to vector<128x1024xf32>
    %5 = vector.broadcast %3 : vector<1x1024xf32> to vector<128x1024xf32>
    %6 = arith.mulf %4, %5 : vector<128x1024xf32>
    %7 = vector.extract_strided_slice %1 {offsets = [0, 1], sizes = [128, 1], strides = [1, 1]} : vector<128x2xf32> to vector<128x1xf32>
    %8 = vector.extract_strided_slice %0 {offsets = [1, 0], sizes = [1, 1024], strides = [1, 1]} : vector<2x1024xf32> to vector<1x1024xf32>
    %9 = vector.broadcast %7 : vector<128x1xf32> to vector<128x1024xf32>
    %10 = vector.broadcast %8 : vector<1x1024xf32> to vector<128x1024xf32>
    %11 = arith.mulf %9, %10 : vector<128x1024xf32>
    %12 = arith.addf %6, %11 : vector<128x1024xf32>
    %c0_3 = arith.constant 0 : index
    %c0_4 = arith.constant 0 : index
    %13 = vector.load %arg3[%c0_3, %c0_4] : memref<128x1xf32, #tpu.memory_space<vmem>>, vector<128x1xf32>
    %14 = vector.broadcast %13 : vector<128x1xf32> to vector<128x1024xf32>
    %15 = arith.addf %12, %14 : vector<128x1024xf32>
    %16 = math.tanh %15 : vector<128x1024xf32>
    %17 = arith.truncf %16 : vector<128x1024xf32> to vector<128x1024xbf16>
    %c0_5 = arith.constant 0 : index
    %c0_6 = arith.constant 0 : index
    %18 = vector.load %arg4[%c0_5, %c0_6] : memref<128x128xbf16, #tpu.memory_space<vmem>>, vector<128x128xbf16>
    %cst = arith.constant dense<0.000000e+00> : vector<128x1024xf32>
    %19 = tpu.matmul %18, %17, %cst {dimension_numbers = #tpu.dot_dimension_numbers<[1], [0], [0], [1], [0, 0, 1, 1], [], []>} : vector<128x128xbf16>, vector<128x1024xbf16>, vector<128x1024xf32> -> vector<128x1024xf32>
    %c0_7 = arith.constant 0 : index
    %c0_8 = arith.constant 0 : index
    %20 = vector.load %arg5[%c0_7, %c0_8] : memref<128x1xf32, #tpu.memory_space<vmem>>, vector<128x1xf32>
    %21 = vector.broadcast %20 : vector<128x1xf32> to vector<128x1024xf32>
    %22 = arith.addf %19, %21 : vector<128x1024xf32>
    %23 = math.tanh %22 : vector<128x1024xf32>
    %24 = arith.truncf %23 : vector<128x1024xf32> to vector<128x1024xbf16>
    %c0_9 = arith.constant 0 : index
    %c0_10 = arith.constant 0 : index
    %25 = vector.load %arg6[%c0_9, %c0_10] : memref<128x128xbf16, #tpu.memory_space<vmem>>, vector<128x128xbf16>
    %cst_11 = arith.constant dense<0.000000e+00> : vector<128x1024xf32>
    %26 = tpu.matmul %25, %24, %cst_11 {dimension_numbers = #tpu.dot_dimension_numbers<[1], [0], [0], [1], [0, 0, 1, 1], [], []>} : vector<128x128xbf16>, vector<128x1024xbf16>, vector<128x1024xf32> -> vector<128x1024xf32>
    %c0_12 = arith.constant 0 : index
    %c0_13 = arith.constant 0 : index
    %27 = vector.load %arg7[%c0_12, %c0_13] : memref<128x1xf32, #tpu.memory_space<vmem>>, vector<128x1xf32>
    %28 = vector.broadcast %27 : vector<128x1xf32> to vector<128x1024xf32>
    %29 = arith.addf %26, %28 : vector<128x1024xf32>
    %30 = math.tanh %29 : vector<128x1024xf32>
    %31 = arith.truncf %30 : vector<128x1024xf32> to vector<128x1024xbf16>
    %c0_14 = arith.constant 0 : index
    %c0_15 = arith.constant 0 : index
    %32 = vector.load %arg8[%c0_14, %c0_15] : memref<8x128xbf16, #tpu.memory_space<vmem>>, vector<8x128xbf16>
    %cst_16 = arith.constant dense<0.000000e+00> : vector<8x1024xf32>
    %33 = tpu.matmul %32, %31, %cst_16 {dimension_numbers = #tpu.dot_dimension_numbers<[1], [0], [0], [1], [0, 0, 1, 1], [], []>} : vector<8x128xbf16>, vector<128x1024xbf16>, vector<8x1024xf32> -> vector<8x1024xf32>
    %34 = vector.extract_strided_slice %33 {offsets = [0, 0], sizes = [1, 1024], strides = [1, 1]} : vector<8x1024xf32> to vector<1x1024xf32>
    %c0_17 = arith.constant 0 : index
    %c0_18 = arith.constant 0 : index
    %35 = memref.load %arg9[%c0_17, %c0_18] : memref<1x1xf32, #tpu.memory_space<smem>>
    %36 = vector.broadcast %35 : f32 to vector<1x1024xf32>
    %37 = arith.addf %34, %36 : vector<1x1024xf32>
    %c0_19 = arith.constant 0 : index
    %c0_20 = arith.constant 0 : index
    %38 = vector.load %arg10[%c0_19, %c0_20] : memref<1x1024xf32, #tpu.memory_space<vmem>>, vector<1x1024xf32>
    tpu.vector_store %arg10[%c0_19, %c0_20], %37 {strides = array<i32>} : memref<1x1024xf32, #tpu.memory_space<vmem>>, vector<1x1024xf32>,
    return
  }
  func.func @transform_0(%arg0: i32) -> (i32, i32) {
    %c0_i32 = arith.constant 0 : i32
    %c0_i32_0 = arith.constant 0 : i32
    return %c0_i32, %arg0 : i32, i32
  }
  func.func @transform_1(%arg0: i32) -> (i32, i32) {
    %c0_i32 = arith.constant 0 : i32
    %c0_i32_0 = arith.constant 0 : i32
    %c0_i32_1 = arith.constant 0 : i32
    return %c0_i32, %c0_i32_0 : i32, i32
  }
  func.func @transform_2(%arg0: i32) -> (i32, i32) {
    %c0_i32 = arith.constant 0 : i32
    %c0_i32_0 = arith.constant 0 : i32
    %c0_i32_1 = arith.constant 0 : i32
    return %c0_i32, %c0_i32_0 : i32, i32
  }
  func.func @transform_3(%arg0: i32) -> (i32, i32) {
    %c0_i32 = arith.constant 0 : i32
    %c0_i32_0 = arith.constant 0 : i32
    %c0_i32_1 = arith.constant 0 : i32
    return %c0_i32, %c0_i32_0 : i32, i32
  }
  func.func @transform_4(%arg0: i32) -> (i32, i32) {
    %c0_i32 = arith.constant 0 : i32
    %c0_i32_0 = arith.constant 0 : i32
    %c0_i32_1 = arith.constant 0 : i32
    return %c0_i32, %c0_i32_0 : i32, i32
  }
  func.func @transform_5(%arg0: i32) -> (i32, i32) {
    %c0_i32 = arith.constant 0 : i32
    %c0_i32_0 = arith.constant 0 : i32
    %c0_i32_1 = arith.constant 0 : i32
    return %c0_i32, %c0_i32_0 : i32, i32
  }
  func.func @transform_6(%arg0: i32) -> (i32, i32) {
    %c0_i32 = arith.constant 0 : i32
    %c0_i32_0 = arith.constant 0 : i32
    %c0_i32_1 = arith.constant 0 : i32
    return %c0_i32, %c0_i32_0 : i32, i32
  }
  func.func @transform_7(%arg0: i32) -> (i32, i32) {
    %c0_i32 = arith.constant 0 : i32
    %c0_i32_0 = arith.constant 0 : i32
    %c0_i32_1 = arith.constant 0 : i32
    return %c0_i32, %c0_i32_0 : i32, i32
  }
  func.func @transform_8(%arg0: i32) -> (i32, i32) {
    %c0_i32 = arith.constant 0 : i32
    %c0_i32_0 = arith.constant 0 : i32
    %c0_i32_1 = arith.constant 0 : i32
    return %c0_i32, %c0_i32_0 : i32, i32
  }
  func.func @transform_9(%arg0: i32) -> (i32, i32) {
    %c0_i32 = arith.constant 0 : i32
    %c0_i32_0 = arith.constant 0 : i32
    return %c0_i32, %arg0 : i32, i32
  }
}

</mosaic_0001>

<bundles_post_ra>
// kernel: _pinn_forward_impl.1
= control target key start
LH: loop header
LB: loop body
LE: loop exit
PB: predicated region body
PF: predicated region fallthrough
CT: control target
= control target key end

     0   :  { %v3809_v0 = vmov 1   ;;  %v6116_v5 = vmov 0   ;;  %v134_v6 = vlaneseq  ;;  %s6106_s1 = inlined_call_operand.vmem [shape: f32[128,2], index: 1, kind: input, shape index: {}]   ;;  %s6107_s0 = inlined_call_operand.vmem [shape: f32[2,1024], index: 0, kind: input, shape index: {}]   ;;  %s6108_s2 = inlined_call_operand.vmem [shape: f32[128,1], index: 2, kind: input, shape index: {}]   ;;  %s6109_s4 = inlined_call_operand.vmem [shape: f32[128,1], index: 4, kind: input, shape index: {}]   ;;  %s6110_s6 = inlined_call_operand.vmem [shape: f32[128,1], index: 6, kind: input, shape index: {}]   ;;  %s6111_s3 = inlined_call_operand.vmem [shape: bf16[128,128], index: 3, kind: input, shape index: {}]   ;;  %s6112_s5 = inlined_call_operand.vmem [shape: bf16[128,128], index: 5, kind: input, shape index: {}]   ;;  %s6113_s7 = inlined_call_operand.vmem [shape: bf16[8,128], index: 7, kind: input, shape index: {}]   ;;  %s6114_s8 = inlined_call_operand.<no memory space> [shape: f32[1,1], index: 8, kind: input, shape index: {}]   ;;  %s6115_s9 = inlined_call_operand.vmem [shape: f32[1,1024], index: 9, kind: output, shape index: {}]  }
   0x1   :  { %3009 = vset.pattern.permute.xlu0 %v3809_v0  ;;  %3007 = vset.pattern.permute.xlu1 %v3809_v0  ;;  %v3867_v1 = vld [vmem:[%s6106_s1 + $0x10] sm:$0xff]  ;;  %v36_v2 = vld [vmem:[%s6106_s1] sm:$0xff]  ;;  %v37_v4 = vld [vmem:[%s6106_s1 + $0x8] sm:$0xff] }
   0x2   :  { %343 = vperm.xlu0 %3009, %v3867_v1   ;;  %335 = vperm.xlu1 %3007, %v36_v2   ;;  %v40_v3 = vld [vmem:[%s6106_s1 + $0x20] sm:$0xff]  ;;  %v42_v7 = vld [vmem:[%s6106_s1 + $0x30] sm:$0xff]  ;;  %v39_v8 = vld [vmem:[%s6106_s1 + $0x18] sm:$0xff]  ;;  %v3887_v9 = vshrl.u32 %v134_v6, 7 }
   0x3   :  { %1334 = vmatprep.mubr.bf16.mxu0 %v6116_v5  ;;  %1447 = vmatprep.mubr.bf16.mxu1 %v6116_v5  ;;  %v3893_v10 = vld [vmem:[%s6106_s1 + $0x40] sm:$0xff]  ;;  %v3908_v15 = vld [vmem:[%s6106_s1 + $0x50] sm:$0xff]  ;;  %v35_v16 = vld [vmem:[%s6107_s0 + $0x8] sm:$0xff] }
   0x4   :  { %6182 = vst [vmem:[#allocation3_spill] sm:$0xff] %v3887_v9  ;;  %v3896_v11 = vsub.s32 1, %v3887_v9  ;;  %v408_v12 = vsub.s32 5, %v3887_v9  ;;  %v3900_v13 = vsub.s32 0, %v3887_v9  ;;  %v144_v14 = vsub.s32 4, %v3887_v9  ;;  %v726_v21 = vld [vmem:[%s6108_s2] sm:$0xff] }
   0x5   :  { %v3926_v22 = vld [vmem:[%s6106_s1 + $0x60] sm:$0xff]  ;;  %v140_v27 = vsub.s32 2, %v3887_v9  ;;  %v3946_v28 = vld [vmem:[%s6106_s1 + $0x70] sm:$0xff]  ;;  %v41_v30 = vld [vmem:[%s6106_s1 + $0x28] sm:$0xff]  ;;  %v404_v32 = vsub.s32 3, %v3887_v9  ;;  %v412_v34 = vsub.s32 7, %v3887_v9 }
   0x6   :  { %351 = vperm.xlu0 %3009, %v40_v3   ;;  %339 = vperm.xlu1 %3007, %v37_v4   ;;  %v417_v17 = vrot.slane %v35_v16, %v3896_v11  ;;  %v425_v18 = vrot.slane %v35_v16, %v408_v12  ;;  %v153_v19 = vrot.slane %v35_v16, %v3900_v13  ;;  %v728_v36 = vld [vmem:[%s6108_s2 + $0x10] sm:$0xff]  ;;  %v727_v39 = vld [vmem:[%s6108_s2 + $0x8] sm:$0xff]  ;;  %v148_v40 = vsub.s32 6, %v3887_v9  ;;  %v729_v41 = vld [vmem:[%s6108_s2 + $0x18] sm:$0xff] }
   0x7   :  { %v161_v20 = vrot.slane %v35_v16, %v144_v14  ;;  %v157_v29 = vrot.slane %v35_v16, %v140_v27  ;;  %v421_v33 = vrot.slane %v35_v16, %v404_v32  ;;  %v429_v37 = vrot.slane %v35_v16, %v412_v34  ;;  %v43_v42 = vld [vmem:[%s6106_s1 + $0x38] sm:$0xff]  ;;  %v731_v44 = vld [vmem:[%s6108_s2 + $0x28] sm:$0xff]  ;;  %v730_v47 = vld [vmem:[%s6108_s2 + $0x20] sm:$0xff] }
   0x8   :  { %v3929_v23 = vrot.slane %v417_v17, %v3896_v11  ;;  %v3932_v24 = vrot.slane %v425_v18, %v3896_v11  ;;  %v3935_v25 = vrot.slane %v153_v19, %v3900_v13  ;;  %v165_v43 = vrot.slane %v35_v16, %v148_v40  ;;  %v733_v46 = vld [vmem:[%s6108_s2 + $0x38] sm:$0xff]  ;;  %v735_v48 = vld [vmem:[%s6108_s2 + $0x48] sm:$0xff]  ;;  %v1158_v52 = vld [vmem:[%s6109_s4] sm:$0xff] }
   0x9   :  { %v3938_v26 = vrot.slane %v161_v20, %v3900_v13  ;;  %v3955_v31 = vrot.slane %v157_v29, %v3900_v13  ;;  %v3964_v35 = vrot.slane %v421_v33, %v3896_v11  ;;  %v3974_v38 = vrot.slane %v429_v37, %v3896_v11  ;;  %v737_v49 = vld [vmem:[%s6108_s2 + $0x58] sm:$0xff]  ;;  %v45_v50 = vld [vmem:[%s6106_s1 + $0x48] sm:$0xff]  ;;  %v1160_v53 = vld [vmem:[%s6109_s4 + $0x10] sm:$0xff] }
   0xa   :  { %359 = vperm.xlu0 %3009, %v42_v7   ;;  %3008 = vset.pattern.permute.xlu1 %v6116_v5  ;;  %6183 = vst [vmem:[#allocation4_spill] sm:$0xff] %v3929_v23  ;;  %6184 = vst [vmem:[#allocation5_spill] sm:$0xff] %v3932_v24  ;;  %v3992_v45 = vrot.slane %v165_v43, %v3900_v13  ;;  %v739_v51 = vld [vmem:[%s6108_s2 + $0x68] sm:$0xff]  ;;  %v732_v54 = vld [vmem:[%s6108_s2 + $0x30] sm:$0xff] }
   0xb   :  { %69 = vperm.xlu1 %3008, %v39_v8   ;;  %6185 = vst [vmem:[#allocation6_spill] sm:$0xff] %v3938_v26  ;;  %6186 = vst [vmem:[#allocation7_spill] sm:$0xff] %v3964_v35  ;;  %v1162_v55 = vld [vmem:[%s6109_s4 + $0x20] sm:$0xff]  ;;  %v1164_v56 = vld [vmem:[%s6109_s4 + $0x30] sm:$0xff] }
   0xc   :  { %6187 = vst [vmem:[#allocation8_spill] sm:$0xff] %v3974_v38  ;;  %v47_v57 = vld [vmem:[%s6106_s1 + $0x58] sm:$0xff]  ;;  %v1166_v58 = vld [vmem:[%s6109_s4 + $0x40] sm:$0xff]  ;;  %v1168_v59 = vld [vmem:[%s6109_s4 + $0x50] sm:$0xff] }
   0xd   :  { %v734_v60 = vld [vmem:[%s6108_s2 + $0x40] sm:$0xff]  ;;  %v1172_v62 = vld [vmem:[%s6109_s4 + $0x70] sm:$0xff]  ;;  %v49_v63 = vld [vmem:[%s6106_s1 + $0x68] sm:$0xff] }
   0xe   :  { %367 = vperm.xlu0 %3009, %v3893_v10   ;;  %v1170_v61 = vld [vmem:[%s6109_s4 + $0x60] sm:$0xff]  ;;  %v1968_v6 = vld [vmem:[%s6110_s6 + $0x30] sm:$0xff] }
   0xf   :  { %3010 = vset.pattern.permute.xlu1 %v3809_v0  ;;  %v738_v16 = vld [vmem:[%s6108_s2 + $0x60] sm:$0xff]  ;;  %v1976_v17 = vld [vmem:[%s6110_s6 + $0x70] sm:$0xff] }
  0x10   :  { %347 = vperm.xlu1 %3010, %v39_v8   ;;  %v51_v8 = vld [vmem:[%s6106_s1 + $0x78] sm:$0xff]  ;;  %v740_v29 = vld [vmem:[%s6108_s2 + $0x70] sm:$0xff] }
  0x12   :  { %375 = vperm.xlu0 %3009, %v3908_v15  }
  0x14   :  { %3011 = vset.pattern.permute.xlu1 %v6116_v5 }
  0x15   :  { %744 = vperm.xlu1 %3011, %v726_v21  }
  0x16   :  { %383 = vperm.xlu0 %3009, %v3926_v22  }
  0x19   :  { %74 = vperm.xlu1 %3011, %v40_v3   ;;  %v1966_v3 = vld [vmem:[%s6110_s6 + $0x20] sm:$0xff] }
  0x1a   :  { %391 = vperm.xlu0 %3009, %v3946_v28  }
  0x1d   :  { %79 = vperm.xlu1 %3011, %v41_v30  }
  0x1e   :  { %3022 = vset.pattern.permute.xlu0 %v6116_v5 }
  0x1f   :  { %54 = vperm.xlu0 %3022, %v36_v2   ;;  %v1964_v2 = vld [vmem:[%s6110_s6 + $0x10] sm:$0xff] }
  0x21   :  { %3012 = vset.pattern.permute.xlu1 %v3809_v0 }
  0x22   :  { %355 = vperm.xlu1 %3012, %v41_v30  }
  0x23   :  { %59 = vperm.xlu0 %3022, %v37_v4   ;;  %v736_v4 = vld [vmem:[%s6108_s2 + $0x50] sm:$0xff] }
  0x26   :  { %3013 = vset.pattern.permute.xlu1 %v6116_v5 }
  0x27   :  { %64 = vperm.xlu0 %3022, %v3867_v1   ;;  %754 = vperm.xlu1 %3013, %v728_v36   ;;  %v1962_v1 = vld [vmem:[%s6110_s6] sm:$0xff] }
  0x2b   :  { %749 = vperm.xlu0 %3022, %v727_v39   ;;  %84 = vperm.xlu1 %3013, %v42_v7   ;;  %v1970_v7 = vld [vmem:[%s6110_s6 + $0x40] sm:$0xff] }
  0x2f   :  { %759 = vperm.xlu0 %3022, %v729_v41   ;;  %89 = vperm.xlu1 %3013, %v43_v42  }
  0x33   :  { %769 = vperm.xlu0 %3022, %v731_v44   ;;  %3014 = vset.pattern.permute.xlu1 %v3809_v0 }
  0x34   :  { %363 = vperm.xlu1 %3014, %v43_v42  }
  0x37   :  { %779 = vperm.xlu0 %3022, %v733_v46  }
  0x38   :  { %3015 = vset.pattern.permute.xlu1 %v6116_v5 }
  0x39   :  { %764 = vperm.xlu1 %3015, %v730_v47  }
  0x3b   :  { %789 = vperm.xlu0 %3022, %v735_v48  }
  0x3d   :  { %94 = vperm.xlu1 %3015, %v3893_v10   ;;  %v1972_v10 = vld [vmem:[%s6110_s6 + $0x50] sm:$0xff] }
  0x3f   :  { %799 = vperm.xlu0 %3022, %v737_v49   ;;  %v741_v49 = vld [vmem:[%s6108_s2 + $0x78] sm:$0xff] }
  0x41   :  { %99 = vperm.xlu1 %3015, %v45_v50  }
  0x43   :  { %809 = vperm.xlu0 %3022, %v739_v51  }
  0x45   :  { %3016 = vset.pattern.permute.xlu1 %v3809_v0 }
  0x46   :  { %371 = vperm.xlu1 %3016, %v45_v50  }
  0x47   :  { %1176 = vperm.xlu0 %3022, %v1158_v52  }
  0x4a   :  { %3017 = vset.pattern.permute.xlu1 %v6116_v5 }
  0x4b   :  { %1186 = vperm.xlu0 %3022, %v1160_v53   ;;  %774 = vperm.xlu1 %3017, %v732_v54  }
  0x4f   :  { %1196 = vperm.xlu0 %3022, %v1162_v55   ;;  %104 = vperm.xlu1 %3017, %v3908_v15   ;;  %v1974_v15 = vld [vmem:[%s6110_s6 + $0x60] sm:$0xff] }
  0x53   :  { %1206 = vperm.xlu0 %3022, %v1164_v56   ;;  %109 = vperm.xlu1 %3017, %v47_v57  }
  0x57   :  { %1216 = vperm.xlu0 %3022, %v1166_v58   ;;  %3018 = vset.pattern.permute.xlu1 %v3809_v0 }
  0x58   :  { %379 = vperm.xlu1 %3018, %v47_v57  }
  0x5b   :  { %1226 = vperm.xlu0 %3022, %v1168_v59  }
  0x5c   :  { %3019 = vset.pattern.permute.xlu1 %v6116_v5 }
  0x5d   :  { %784 = vperm.xlu1 %3019, %v734_v60  }
  0x5f   :  { %1236 = vperm.xlu0 %3022, %v1170_v61  }
  0x61   :  { %114 = vperm.xlu1 %3019, %v3926_v22  }
  0x63   :  { %1246 = vperm.xlu0 %3022, %v1172_v62   ;;  %v1159_v62 = vld [vmem:[%s6109_s4 + $0x8] sm:$0xff] }
  0x65   :  { %119 = vperm.xlu1 %3019, %v49_v63  }
  0x67   :  { %1980 = vperm.xlu0 %3022, %v1962_v1  }
  0x69   :  { %3020 = vset.pattern.permute.xlu1 %v3809_v0 }
  0x6a   :  { %387 = vperm.xlu1 %3020, %v49_v63  }
  0x6b   :  { %1990 = vperm.xlu0 %3022, %v1964_v2  }
  0x6e   :  { %3021 = vset.pattern.permute.xlu1 %v6116_v5 }
  0x6f   :  { %2000 = vperm.xlu0 %3022, %v1966_v3   ;;  %794 = vperm.xlu1 %3021, %v736_v4  }
  0x73   :  { %2010 = vperm.xlu0 %3022, %v1968_v6   ;;  %124 = vperm.xlu1 %3021, %v3946_v28  }
  0x77   :  { %2020 = vperm.xlu0 %3022, %v1970_v7   ;;  %129 = vperm.xlu1 %3021, %v51_v8  }
  0x7b   :  { %2030 = vperm.xlu0 %3022, %v1972_v10   ;;  %3023 = vset.pattern.permute.xlu1 %v3809_v0  ;;  %v34_v0 = vld [vmem:[%s6107_s0] sm:$0xff] }
  0x7c   :  { %395 = vperm.xlu1 %3023, %v51_v8   ;;  %v141_v30 = vrot.slane %v34_v0, %v140_v27  ;;  %v405_v33 = vrot.slane %v34_v0, %v404_v32  ;;  %v149_v36 = vrot.slane %v34_v0, %v148_v40  ;;  %v413_v37 = vrot.slane %v34_v0, %v412_v34 }
  0x7d   :  { %v137_v39 = vrot.slane %v34_v0, %v3900_v13  ;;  %v401_v41 = vrot.slane %v34_v0, %v3896_v11  ;;  %v409_v42 = vrot.slane %v34_v0, %v408_v12  ;;  %v145_v51 = vrot.slane %v34_v0, %v144_v14 }
  0x7e   :  { %v4153_v50 = vrot.slane %v405_v33, %v3896_v11  ;;  %v4158_v52 = vrot.slane %v141_v30, %v3900_v13  ;;  %v4161_v53 = vrot.slane %v413_v37, %v3896_v11  ;;  %v4191_v63 = vrot.slane %v149_v36, %v3900_v13 }
  0x7f   :  { %2040 = vperm.xlu0 %3022, %v1974_v15   ;;  %v4164_v54 = vrot.slane %v401_v41, %v3896_v11  ;;  %v4167_v55 = vrot.slane %v409_v42, %v3896_v11  ;;  %v4194_v1 = vrot.slane %v137_v39, %v3900_v13  ;;  %v4202_v6 = vrot.slane %v145_v51, %v3900_v13 }
  0x80   :  { %3024 = vset.pattern.permute.xlu1 %v6116_v5 }
  0x81   :  { %804 = vperm.xlu1 %3024, %v738_v16   ;;  %v336_v18 = vpop.permute.xlu1 %335  ;;  %v344_v19 = vpop.permute.xlu0 %343 }
  0x82   :  { %v4099_v20 = vmul.f32 %v3929_v23, %v336_v18  ;;  %v4102_v21 = vmul.f32 %v3932_v24, %v336_v18  ;;  %v4105_v22 = vmul.f32 %v3929_v23, %v344_v19  ;;  %v4108_v28 = vmul.f32 %v3932_v24, %v344_v19 }
  0x83   :  { %2050 = vperm.xlu0 %3022, %v1976_v17   ;;  %v4126_v27 = vmul.f32 %v3964_v35, %v336_v18  ;;  %v4129_v32 = vmul.f32 %v3974_v38, %v336_v18  ;;  %v4132_v40 = vmul.f32 %v3964_v35, %v344_v19  ;;  %v4135_v34 = vmul.f32 %v3974_v38, %v344_v19 }
  0x84   :  { %6188 = vst [vmem:[#allocation9_spill] sm:$0xff] %v4105_v22  ;;  %6189 = vst [vmem:[#allocation10_spill] sm:$0xff] %v4108_v28  ;;  %v4199_v4 = vmul.f32 %v4153_v50, %v336_v18  ;;  %v4205_v7 = vmul.f32 %v4161_v53, %v336_v18  ;;  %v4208_v8 = vmul.f32 %v4164_v54, %v336_v18 }
  0x85   :  { %814 = vperm.xlu1 %3024, %v740_v29   ;;  %v340_v43 = vpop.permute.xlu1 %339  ;;  %v352_v44 = vpop.permute.xlu0 %351  ;;  %6190 = vst [vmem:[#allocation11_spill] sm:$0xff] %v4126_v27  ;;  %6191 = vst [vmem:[#allocation12_spill] sm:$0xff] %v4129_v32  ;;  %v4211_v10 = vmul.f32 %v4167_v55, %v336_v18  ;;  %v4214_v15 = vmul.f32 %v4153_v50, %v344_v19  ;;  %v1161_v18 = vld [vmem:[%s6109_s4 + $0x18] sm:$0xff]  ;;  %v4233_v33 = vmul.f32 %v4161_v53, %v344_v19 }
  0x86   :  { %6192 = vst [vmem:[#allocation13_spill] sm:$0xff] %v4132_v40  ;;  %6193 = vst [vmem:[#allocation14_spill] sm:$0xff] %v4135_v34  ;;  %v4138_v46 = vmul.f32 %v3929_v23, %v340_v43  ;;  %v4141_v12 = vmul.f32 %v3932_v24, %v340_v43  ;;  %v4144_v47 = vmul.f32 %v3929_v23, %v352_v44 }
  0x87   :  { %v4147_v48 = vmul.f32 %v3932_v24, %v352_v44  ;;  %v4170_v57 = vmul.f32 %v3964_v35, %v340_v43  ;;  %v4173_v58 = vmul.f32 %v3974_v38, %v340_v43  ;;  %v4176_v14 = vmul.f32 %v3964_v35, %v352_v44 }
  0x88   :  { %6194 = vst [vmem:[#allocation15_spill] sm:$0xff] %v4138_v46  ;;  %6195 = vst [vmem:[#allocation16_spill] sm:$0xff] %v4141_v12  ;;  %v4179_v59 = vmul.f32 %v3974_v38, %v352_v44  ;;  %v4230_v30 = vmul.f32 %v4153_v50, %v340_v43  ;;  %v4236_v36 = vmul.f32 %v4164_v54, %v344_v19 }
  0x89   :  { %6196 = vst [vmem:[#allocation17_spill] sm:$0xff] %v4144_v47  ;;  %6197 = vst [vmem:[#allocation18_spill] sm:$0xff] %v4147_v48  ;;  %819 = vperm.xlu1 %3024, %v741_v49   ;;  %v360_v56 = vpop.permute.xlu0 %359  ;;  %v4239_v37 = vmul.f32 %v4167_v55, %v344_v19  ;;  %v4242_v41 = vmul.f32 %v4161_v53, %v340_v43  ;;  %v4245_v42 = vmul.f32 %v4164_v54, %v340_v43  ;;  %v1163_v48 = vld [vmem:[%s6109_s4 + $0x28] sm:$0xff] }
  0x8a   :  { %6198 = vst [vmem:[#allocation19_spill] sm:$0xff] %v4170_v57  ;;  %6199 = vst [vmem:[#allocation20_spill] sm:$0xff] %v4173_v58  ;;  %v4182_v60 = vmul.f32 %v3929_v23, %v360_v56  ;;  %v4185_v11 = vmul.f32 %v3932_v24, %v360_v56  ;;  %v70_v61 = vpop.permute.xlu1 %69  ;;  %v4221_v0 = vmul.f32 %v3964_v35, %v360_v56 }
  0x8b   :  { %6200 = vst [vmem:[#allocation21_spill] sm:$0xff] %v4176_v14  ;;  %6201 = vst [vmem:[#allocation22_spill] sm:$0xff] %v4179_v59  ;;  %v234_v2 = vmul.f32 %v3935_v25, %v70_v61  ;;  %v236_v3 = vmul.f32 %v3938_v26, %v70_v61  ;;  %v235_v17 = vmul.f32 %v3955_v31, %v70_v61 }
  0x8c   :  { %6202 = vst [vmem:[#allocation23_spill] sm:$0xff] %v4182_v60  ;;  %6203 = vst [vmem:[#allocation24_spill] sm:$0xff] %v4185_v11  ;;  %v237_v13 = vmul.f32 %v3992_v45, %v70_v61  ;;  %v4224_v29 = vmul.f32 %v3974_v38, %v360_v56  ;;  %v4248_v49 = vmul.f32 %v4167_v55, %v340_v43 }
  0x8d   :  { %1181 = vperm.xlu1 %3024, %v1159_v62   ;;  %v4216_v16 = vpop.permute.xlu0 %367  ;;  %6205 = vst [vmem:[#allocation26_spill] sm:$0xff] %v4221_v0  ;;  %v4251_v51 = vmul.f32 %v4153_v50, %v352_v44  ;;  %v4256_v19 = vmul.f32 %v4161_v53, %v352_v44  ;;  %v4259_v9 = vmul.f32 %v4164_v54, %v352_v44 }
  0x8e   :  { %6204 = vst [vmem:[#allocation25_spill] sm:$0xff] %v4216_v16  ;;  %6206 = vst [vmem:[#allocation27_spill] sm:$0xff] %v4224_v29  ;;  %v4264_v29 = vmul.f32 %v4167_v55, %v352_v44  ;;  %v4267_v43 = vmul.f32 %v4153_v50, %v360_v56  ;;  %v231_v47 = vmul.f32 %v4158_v52, %v70_v61 }
  0x8f   :  { %v348_v39 = vpop.permute.xlu1 %347  ;;  %v230_v59 = vmul.f32 %v4194_v1, %v70_v61  ;;  %v4278_v44 = vmul.f32 %v4161_v53, %v360_v56  ;;  %v4296_v57 = vmul.f32 %v3929_v23, %v4216_v16 }
  0x90   :  { %v498_v62 = vmul.f32 %v3929_v23, %v348_v39  ;;  %v500_v5 = vmul.f32 %v3932_v24, %v348_v39  ;;  %v499_v60 = vmul.f32 %v3964_v35, %v348_v39  ;;  %v501_v0 = vmul.f32 %v3974_v38, %v348_v39 }
  0x91   :  { %1191 = vperm.xlu1 %3024, %v1161_v18   ;;  %v4261_v11 = vpop.permute.xlu0 %375  ;;  %v233_v18 = vmul.f32 %v4191_v63, %v70_v61  ;;  %v495_v14 = vmul.f32 %v4153_v50, %v348_v39  ;;  %v497_v28 = vmul.f32 %v4161_v53, %v348_v39  ;;  %v232_v35 = vmul.f32 %v4202_v6, %v70_v61 }
  0x92   :  { %6207 = vst [vmem:[#allocation28_spill] sm:$0xff] %v4261_v11  ;;  %v4284_v38 = vmul.f32 %v4164_v54, %v360_v56  ;;  %v494_v40 = vmul.f32 %v4164_v54, %v348_v39  ;;  %v496_v22 = vmul.f32 %v4167_v55, %v348_v39  ;;  %v4290_v12 = vadd.f32 %v499_v60, %v235_v17  ;;  %v1165_v17 = vld [vmem:[%s6109_s4 + $0x38] sm:$0xff] }
  0x93   :  { %v4292_v58 = vadd.f32 %v501_v0, %v237_v13  ;;  %6210 = vst [vmem:[#allocation31_spill] sm:$0xff] %v4296_v57  ;;  %v4301_v61 = vmul.f32 %v4167_v55, %v360_v56  ;;  %v4303_v32 = vadd.f32 %v498_v62, %v234_v2  ;;  %v4305_v27 = vadd.f32 %v500_v5, %v236_v3 }
  0x94   :  { %v4286_v34 = vpop.permute.xlu1 %744  ;;  %6208 = vst [vmem:[#allocation29_spill] sm:$0xff] %v4290_v12  ;;  %v4309_v60 = vmul.f32 %v3932_v24, %v4216_v16  ;;  %v4320_v56 = vmul.f32 %v4161_v53, %v4216_v16  ;;  %v4324_v5 = vmul.f32 %v4164_v54, %v4216_v16  ;;  %v4328_v2 = vmul.f32 %v3929_v23, %v4261_v11 }
  0x95   :  { %6209 = vst [vmem:[#allocation30_spill] sm:$0xff] %v4292_v58  ;;  %1201 = vperm.xlu1 %3024, %v1163_v48   ;;  %v4298_v46 = vpop.permute.xlu0 %383  ;;  %6212 = vst [vmem:[#allocation33_spill] sm:$0xff] %v4303_v32  ;;  %v4316_v48 = vmul.f32 %v4153_v50, %v4216_v16  ;;  %v4332_v3 = vmul.f32 %v3932_v24, %v4261_v11  ;;  %v4334_v13 = vadd.f32 %v495_v14, %v231_v47 }
  0x96   :  { %6211 = vst [vmem:[#allocation32_spill] sm:$0xff] %v4298_v46  ;;  %6213 = vst [vmem:[#allocation34_spill] sm:$0xff] %v4305_v27  ;;  %v4338_v0 = vmul.f32 %v4167_v55, %v4216_v16  ;;  %v4342_v62 = vadd.f32 %v497_v28, %v233_v18  ;;  %v4346_v57 = vadd.f32 %v496_v22, %v232_v35 }
  0x97   :  { %6214 = vst [vmem:[#allocation35_spill] sm:$0xff] %v4309_v60  ;;  %6215 = vst [vmem:[#allocation36_spill] sm:$0xff] %v4320_v56  ;;  %v4344_v60 = vadd.f32 %v494_v40, %v230_v59  ;;  %v4360_v28 = vmul.f32 %v4161_v53, %v4261_v11  ;;  %v4364_v35 = vmul.f32 %v4164_v54, %v4261_v11  ;;  %v1167_v40 = vld [vmem:[%s6109_s4 + $0x48] sm:$0xff] }
  0x98   :  { %6216 = vst [vmem:[#allocation37_spill] sm:$0xff] %v4324_v5  ;;  %6217 = vst [vmem:[#allocation38_spill] sm:$0xff] %v4328_v2  ;;  %v4340_v39 = vpop.permute.xlu1 %74  ;;  %v4350_v2 = vmul.f32 %v4153_v50, %v4261_v11  ;;  %v4368_v22 = vmul.f32 %v3929_v23, %v4298_v46  ;;  %v4383_v16 = vmul.f32 %v3932_v24, %v4298_v46 }
  0x99   :  { %6218 = vst [vmem:[#allocation39_spill] sm:$0xff] %v4332_v3  ;;  %6219 = vst [vmem:[#allocation40_spill] sm:$0xff] %v4338_v0  ;;  %1211 = vperm.xlu1 %3024, %v1165_v17   ;;  %v4352_v3 = vpop.permute.xlu0 %391  ;;  %v239_v47 = vmul.f32 %v4158_v52, %v4340_v39  ;;  %v241_v14 = vmul.f32 %v4191_v63, %v4340_v39  ;;  %v238_v59 = vmul.f32 %v4194_v1, %v4340_v39 }
  0x9a   :  { %6220 = vst [vmem:[#allocation41_spill] sm:$0xff] %v4340_v39  ;;  %6221 = vst [vmem:[#allocation42_spill] sm:$0xff] %v4350_v2  ;;  %v240_v18 = vmul.f32 %v4202_v6, %v4340_v39  ;;  %v4379_v17 = vmul.f32 %v4167_v55, %v4261_v11  ;;  %v4399_v11 = vmul.f32 %v3935_v25, %v4340_v39 }
  0x9b   :  { %6222 = vst [vmem:[#allocation43_spill] sm:$0xff] %v4352_v3  ;;  %6223 = vst [vmem:[#allocation44_spill] sm:$0xff] %v4360_v28  ;;  %v4395_v28 = vmul.f32 %v4164_v54, %v4298_v46  ;;  %v4430_v2 = vmul.f32 %v4153_v50, %v4352_v3  ;;  %v4529_v0 = vmul.f32 %v3955_v31, %v4340_v39 }
  0x9c   :  { %6224 = vst [vmem:[#allocation45_spill] sm:$0xff] %v4364_v35  ;;  %6225 = vst [vmem:[#allocation46_spill] sm:$0xff] %v4368_v22  ;;  %v4387_v22 = vmul.f32 %v4153_v50, %v4298_v46  ;;  %v4391_v35 = vmul.f32 %v4161_v53, %v4298_v46 }
  0x9d   :  { %6226 = vst [vmem:[#allocation47_spill] sm:$0xff] %v4379_v17  ;;  %6227 = vst [vmem:[#allocation48_spill] sm:$0xff] %v4383_v16  ;;  %v4403_v17 = vmul.f32 %v3938_v26, %v4340_v39  ;;  %v4407_v16 = vmul.f32 %v3929_v23, %v4352_v3  ;;  %1221 = vperm.xlu1 %3024, %v1167_v40   ;;  %v4436_v40 = vadd.f32 %v4264_v29, %v240_v18 }
  0x9e   :  { %6228 = vst [vmem:[#allocation49_spill] sm:$0xff] %v4387_v22  ;;  %6229 = vst [vmem:[#allocation50_spill] sm:$0xff] %v4391_v35  ;;  %v4409_v22 = vpop.permute.xlu1 %79  ;;  %v4413_v35 = vmul.f32 %v4167_v55, %v4298_v46  ;;  %v55_v46 = vpop.permute.xlu0 %54 }
  0x9f   :  { %6230 = vst [vmem:[#allocation51_spill] sm:$0xff] %v4395_v28  ;;  %6231 = vst [vmem:[#allocation52_spill] sm:$0xff] %v4399_v11  ;;  %v4417_v28 = vmul.f32 %v3932_v24, %v4352_v3  ;;  %v1169_v11 = vld [vmem:[%s6109_s4 + $0x58] sm:$0xff]  ;;  %v208_v29 = vmul.f32 %v4202_v6, %v55_v46  ;;  %v4453_v18 = vmul.f32 %v3955_v31, %v55_v46 }
  0xa0   :  { %6232 = vst [vmem:[#allocation53_spill] sm:$0xff] %v4403_v17  ;;  %6233 = vst [vmem:[#allocation54_spill] sm:$0xff] %v4407_v16  ;;  %v4423_v17 = vadd.f32 %v4251_v51, %v239_v47  ;;  %v4426_v16 = vadd.f32 %v4256_v19, %v241_v14  ;;  %v4444_v51 = vmul.f32 %v4164_v54, %v4352_v3 }
  0xa1   :  { %6234 = vst [vmem:[#allocation55_spill] sm:$0xff] %v4409_v22  ;;  %6235 = vst [vmem:[#allocation56_spill] sm:$0xff] %v4413_v35  ;;  %v4433_v35 = vadd.f32 %v4259_v9, %v238_v59  ;;  %v210_v19 = vmul.f32 %v3935_v25, %v55_v46  ;;  %v212_v47 = vmul.f32 %v3938_v26, %v55_v46  ;;  %1231 = vperm.xlu1 %3024, %v1169_v11  }
  0xa2   :  { %6236 = vst [vmem:[#allocation57_spill] sm:$0xff] %v4417_v28  ;;  %6237 = vst [vmem:[#allocation58_spill] sm:$0xff] %v4430_v2  ;;  %v4440_v28 = vmul.f32 %v4161_v53, %v4352_v3  ;;  %v207_v14 = vmul.f32 %v4158_v52, %v55_v46  ;;  %v209_v9 = vmul.f32 %v4191_v63, %v55_v46  ;;  %v4476_v11 = vpop.permute.xlu0 %59 }
  0xa3   :  { %6239 = vst [vmem:[#allocation60_spill] sm:$0xff] %v4444_v51  ;;  %v206_v59 = vmul.f32 %v4194_v1, %v55_v46  ;;  %v4458_v51 = vpop.permute.xlu1 %355  ;;  %v4463_v32 = vadd.f32 %v4099_v20, %v210_v19  ;;  %v4466_v58 = vadd.f32 %v4102_v21, %v212_v47  ;;  %v4470_v12 = vmul.f32 %v3935_v25, %v4409_v22 }
  0xa4   :  { %6238 = vst [vmem:[#allocation59_spill] sm:$0xff] %v4440_v28  ;;  %v4456_v28 = vmul.f32 %v3992_v45, %v55_v46  ;;  %v599_v2 = vadd.f32 %v4199_v4, %v207_v14  ;;  %v601_v27 = vadd.f32 %v4205_v7, %v209_v9  ;;  %v4474_v46 = vmul.f32 %v3938_v26, %v4409_v22  ;;  %v1171_v4 = vld [vmem:[%s6109_s4 + $0x68] sm:$0xff] }
  0xa5   :  { %6240 = vst [vmem:[#allocation61_spill] sm:$0xff] %v4463_v32  ;;  %6241 = vst [vmem:[#allocation62_spill] sm:$0xff] %v4466_v58  ;;  %v598_v20 = vadd.f32 %v4208_v8, %v206_v59  ;;  %v4484_v21 = vmul.f32 %v4167_v55, %v4352_v3  ;;  %v4488_v7 = vmul.f32 %v3935_v25, %v4476_v11  ;;  %1241 = vperm.xlu1 %3024, %v1171_v4   ;;  %v1173_v4 = vld [vmem:[%s6109_s4 + $0x78] sm:$0xff] }
  0xa6   :  { %6242 = vst [vmem:[#allocation63_spill] sm:$0xff] %v4470_v12  ;;  %6243 = vst [vmem:[#allocation64_spill] sm:$0xff] %v4474_v46  ;;  %v4492_v19 = vmul.f32 %v3938_v26, %v4476_v11  ;;  %v215_v47 = vmul.f32 %v4158_v52, %v4476_v11  ;;  %v247_v14 = vmul.f32 %v4158_v52, %v4409_v22 }
  0xa7   :  { %6244 = vst [vmem:[#allocation65_spill] sm:$0xff] %v4484_v21  ;;  %v823_v8 = vadd.f32 %v4286_v34, %v599_v2  ;;  %v600_v9 = vadd.f32 %v4211_v10, %v208_v29  ;;  %v4502_v59 = vmul.f32 %v4191_v63, %v4409_v22  ;;  %v4506_v3 = vmul.f32 %v4194_v1, %v4409_v22  ;;  %v4517_v2 = vpop.permute.xlu0 %64  ;;  %v4519_v29 = vpop.permute.xlu1 %754 }
  0xa8   :  { %6245 = vst [vmem:[#allocation66_spill] sm:$0xff] %v4492_v19  ;;  %v217_v21 = vmul.f32 %v4191_v63, %v4476_v11  ;;  %v825_v46 = vadd.f32 %v4286_v34, %v601_v27  ;;  %v214_v12 = vmul.f32 %v4194_v1, %v4476_v11  ;;  %v4515_v10 = vmul.f32 %v4202_v6, %v4409_v22 }
  0xa9   :  { %v822_v58 = vadd.f32 %v4286_v34, %v598_v20  ;;  %v216_v27 = vmul.f32 %v4202_v6, %v4476_v11  ;;  %6246 = vst [vmem:[#allocation67_spill] sm:$0xff] %v4529_v0  ;;  %v4533_v5 = vmul.f32 %v3955_v31, %v4409_v22  ;;  %v4537_v56 = vmul.f32 %v3929_v23, %v4458_v51 }
  0xaa   :  { %v4541_v19 = vmul.f32 %v3935_v25, %v4517_v2  ;;  %v4545_v20 = vmul.f32 %v3938_v26, %v4517_v2  ;;  %v607_v32 = vadd.f32 %v4230_v30, %v215_v47  ;;  %3041 = vtanh.f32 %v823_v8  ;;  %1251 = vperm.xlu1 %3024, %v1173_v4   ;;  %v1963_v47 = vld [vmem:[%s6110_s6 + $0x8] sm:$0xff] }
  0xab   :  { %6247 = vst [vmem:[#allocation68_spill] sm:$0xff] %v4533_v5  ;;  %6248 = vst [vmem:[#allocation69_spill] sm:$0xff] %v4537_v56  ;;  %v824_v39 = vadd.f32 %v4286_v34, %v600_v9  ;;  %v223_v22 = vmul.f32 %v4158_v52, %v4517_v2  ;;  %v225_v5 = vmul.f32 %v4191_v63, %v4517_v2  ;;  %3043 = vtanh.f32 %v825_v46  ;;  %v4559_v30 = vpop.permute.xlu1 %84 }
  0xac   :  { %6249 = vst [vmem:[#allocation70_spill] sm:$0xff] %v4541_v19  ;;  %6250 = vst [vmem:[#allocation71_spill] sm:$0xff] %v4545_v20  ;;  %v609_v56 = vadd.f32 %v4242_v41, %v217_v21  ;;  %v606_v0 = vadd.f32 %v4245_v42, %v214_v12  ;;  %v222_v20 = vmul.f32 %v4194_v1, %v4517_v2  ;;  %v4557_v19 = vpop.permute.xlu0 %749  ;;  %3045 = vtanh.f32 %v822_v58 }
  0xad   :  { %6251 = vst [vmem:[#allocation72_spill] sm:$0xff] %v4559_v30  ;;  %v608_v8 = vadd.f32 %v4248_v49, %v216_v27  ;;  %v615_v9 = vadd.f32 %v4214_v15, %v223_v22  ;;  %v511_v41 = vmul.f32 %v4153_v50, %v4458_v51  ;;  %v831_v12 = vadd.f32 %v4557_v19, %v607_v32 }
  0xae   :  { %v833_v42 = vadd.f32 %v4557_v19, %v609_v56  ;;  %v617_v46 = vadd.f32 %v4233_v33, %v225_v5  ;;  %v224_v21 = vmul.f32 %v4202_v6, %v4517_v2  ;;  %v4575_v4 = vmul.f32 %v3932_v24, %v4458_v51  ;;  %1985 = vperm.xlu1 %3024, %v1963_v47  }
  0xaf   :  { %v830_v58 = vadd.f32 %v4557_v19, %v606_v0  ;;  %v832_v15 = vadd.f32 %v4557_v19, %v608_v8  ;;  %3047 = vtanh.f32 %v824_v39  ;;  %v839_v32 = vadd.f32 %v4519_v29, %v615_v9  ;;  %v4585_v5 = vpop.permute.xlu1 %89  ;;  %v1965_v0 = vld [vmem:[%s6110_s6 + $0x18] sm:$0xff] }
  0xb0   :  { %6252 = vst [vmem:[#allocation73_spill] sm:$0xff] %v4575_v4  ;;  %3049 = vtanh.f32 %v831_v12  ;;  %v614_v49 = vadd.f32 %v4236_v36, %v222_v20  ;;  %v513_v33 = vmul.f32 %v4161_v53, %v4458_v51  ;;  %v4583_v56 = vpop.permute.xlu0 %759  ;;  %6253 = vst [vmem:[#allocation74_spill] sm:$0xff] %v4585_v5  ;;  %v639_v22 = vadd.f32 %v511_v41, %v247_v14 }
  0xb1   :  { %3051 = vtanh.f32 %v833_v42  ;;  %v510_v39 = vmul.f32 %v4164_v54, %v4458_v51  ;;  %v512_v27 = vmul.f32 %v4167_v55, %v4458_v51  ;;  %v847_v36 = vadd.f32 %v4583_v56, %v4334_v13 }
  0xb2   :  { %3053 = vtanh.f32 %v830_v58  ;;  %v841_v20 = vadd.f32 %v4519_v29, %v617_v46  ;;  %v616_v47 = vadd.f32 %v4239_v37, %v224_v21  ;;  %v4600_v8 = vmul.f32 %v3935_v25, %v4559_v30  ;;  %1995 = vperm.xlu1 %3024, %v1965_v0  }
  0xb3   :  { %3055 = vtanh.f32 %v832_v15  ;;  %v849_v14 = vadd.f32 %v4583_v56, %v4342_v62  ;;  %v255_v9 = vmul.f32 %v4158_v52, %v4559_v30  ;;  %v4608_v41 = vmul.f32 %v3938_v26, %v4559_v30  ;;  %v1967_v62 = vld [vmem:[%s6110_s6 + $0x28] sm:$0xff] }
  0xb4   :  { %6254 = vst [vmem:[#allocation75_spill] sm:$0xff] %v4600_v8  ;;  %3057 = vtanh.f32 %v839_v32  ;;  %v838_v13 = vadd.f32 %v4519_v29, %v614_v49  ;;  %v641_v37 = vadd.f32 %v513_v33, %v4502_v59  ;;  %v3042_v12 = vpop.eup %3041  ;;  %v4612_v42 = vpop.permute.xlu0 %769  ;;  %v846_v46 = vadd.f32 %v4583_v56, %v4344_v60 }
  0xb5   :  { %6255 = vst [vmem:[#allocation76_spill] sm:$0xff] %v4608_v41  ;;  %6256 = vst [vmem:[#allocation77_spill] sm:$0xff] %v4612_v42  ;;  %3059 = vtanh.f32 %v847_v36  ;;  %v638_v21 = vadd.f32 %v510_v39, %v4506_v3  ;;  %v640_v58 = vadd.f32 %v512_v27, %v4515_v10  ;;  %v3044_v15 = vpop.eup %3043  ;;  %v4623_v32 = vmul.f32 %v3935_v25, %v4585_v5  ;;  %v4629_v49 = vpop.permute.xlu1 %363 }
  0xb6   :  { %v4627_v59 = vmul.f32 %v3938_v26, %v4585_v5  ;;  %6259 = vst [vmem:[#allocation80_spill] sm:$0xff] %v4629_v49  ;;  %3061 = vtanh.f32 %v841_v20  ;;  %v840_v33 = vadd.f32 %v4519_v29, %v616_v47  ;;  %v3046_v0 = vpop.eup %3045  ;;  %v848_v60 = vadd.f32 %v4583_v56, %v4346_v57  ;;  %2005 = vperm.xlu1 %3024, %v1967_v62   ;;  %v1969_v57 = vld [vmem:[%s6110_s6 + $0x38] sm:$0xff] }
  0xb7   :  { %6257 = vst [vmem:[#allocation78_spill] sm:$0xff] %v4623_v32  ;;  %3063 = vtanh.f32 %v849_v14  ;;  %v263_v3 = vmul.f32 %v4158_v52, %v4585_v5  ;;  %v4637_v10 = vadd.f32 %v4267_v43, %v255_v9  ;;  %v863_v39 = vadd.f32 %v4612_v42, %v639_v22 }
  0xb8   :  { %6258 = vst [vmem:[#allocation79_spill] sm:$0xff] %v4627_v59  ;;  %3065 = vtanh.f32 %v838_v13  ;;  %v257_v27 = vmul.f32 %v4191_v63, %v4559_v30  ;;  %v265_v36 = vmul.f32 %v4191_v63, %v4585_v5  ;;  %v865_v47 = vadd.f32 %v4612_v42, %v641_v37 }
  0xb9   :  { %v3048_v20 = vpop.eup %3047  ;;  %3067 = vtanh.f32 %v846_v46  ;;  %v527_v43 = vmul.f32 %v4153_v50, %v4629_v49  ;;  %v254_v22 = vmul.f32 %v4194_v1, %v4559_v30  ;;  %v862_v9 = vadd.f32 %v4612_v42, %v638_v21  ;;  %v4656_v41 = vpop.permute.xlu1 %764 }
  0xba   :  { %v3050_v14 = vpop.eup %3049  ;;  %3069 = vtanh.f32 %v840_v33  ;;  %v864_v13 = vadd.f32 %v4612_v42, %v640_v58  ;;  %v529_v62 = vmul.f32 %v4161_v53, %v4629_v49  ;;  %v262_v37 = vmul.f32 %v4194_v1, %v4585_v5  ;;  %2015 = vperm.xlu1 %3024, %v1969_v57  }
  0xbb   :  { %v3052_v59 = vpop.eup %3051  ;;  %v1079_v46 = vpack.c.bf16 %v3050_v14, %v3042_v12  ;;  %3071 = vtanh.f32 %v848_v60  ;;  %v526_v32 = vmul.f32 %v4164_v54, %v4629_v49  ;;  %v855_v21 = vadd.f32 %v4656_v41, %v4423_v17  ;;  %v1971_v60 = vld [vmem:[%s6110_s6 + $0x48] sm:$0xff] }
  0xbc   :  { %v3054_v8 = vpop.eup %3053  ;;  %v1081_v33 = vpack.c.bf16 %v3052_v59, %v3044_v15  ;;  %3073 = vtanh.f32 %v863_v39  ;;  %v857_v58 = vadd.f32 %v4656_v41, %v4426_v16  ;;  %v854_v14 = vadd.f32 %v4656_v41, %v4433_v35 }
  0xbd   :  { %v3056_v4 = vpop.eup %3055  ;;  %1302 = vmatprep.subr.bf16.mxu0 %v1079_v46  ;;  %v1078_v12 = vpack.c.bf16 %v3054_v8, %v3046_v0  ;;  %3075 = vtanh.f32 %v865_v47  ;;  %v655_v57 = vadd.f32 %v527_v43, %v263_v3  ;;  %v856_v17 = vadd.f32 %v4656_v41, %v4436_v40  ;;  %v4673_v46 = vpop.permute.xlu0 %779  ;;  %v1973_v43 = vld [vmem:[%s6110_s6 + $0x58] sm:$0xff] }
  0xbe   :  { %v3058_v15 = vpop.eup %3057  ;;  %1415 = vmatprep.subr.bf16.mxu1 %v1081_v33  ;;  %v1080_v59 = vpack.c.bf16 %v3056_v4, %v3048_v20  ;;  %3077 = vtanh.f32 %v855_v21  ;;  %v657_v16 = vadd.f32 %v529_v62, %v265_v36  ;;  %6260 = vst [vmem:[#allocation81_spill] sm:$0xff] %v4673_v46  ;;  %v4675_v8 = vpop.permute.xlu1 %94  ;;  %v654_v0 = vadd.f32 %v526_v32, %v262_v37 }
  0xbf   :  { %v3060_v39 = vpop.eup %3059  ;;  %1303 = vmatpush1.bf16.msra.mxu0 %v1078_v12  ;;  %6261 = vst [vmem:[#allocation82_spill] sm:$0xff] %v4675_v8  ;;  %3079 = vtanh.f32 %v857_v58  ;;  %v256_v35 = vmul.f32 %v4202_v6, %v4559_v30  ;;  %v528_v3 = vmul.f32 %v4167_v55, %v4629_v49  ;;  %v4683_v20 = vmul.f32 %v3929_v23, %v4629_v49 }
  0xc0   :  { %v3062_v4 = vpop.eup %3061  ;;  %1416 = vmatpush1.bf16.msra.mxu1 %v1080_v59  ;;  %2025 = vperm.xlu1 %3024, %v1971_v60   ;;  %v1087_v40 = vpack.c.bf16 %v3060_v39, %v3058_v15  ;;  %3081 = vtanh.f32 %v854_v14  ;;  %v264_v36 = vmul.f32 %v4202_v6, %v4585_v5  ;;  %v4689_v32 = vmul.f32 %v3932_v24, %v4629_v49  ;;  %v1975_v59 = vld [vmem:[%s6110_s6 + $0x68] sm:$0xff] }
  0xc1   :  { %6262 = vst [vmem:[#allocation83_spill] sm:$0xff] %v4683_v20  ;;  %v3064_v47 = vpop.eup %3063  ;;  %3083 = vtanh.f32 %v862_v9  ;;  %v4695_v62 = vadd.f32 %v4278_v44, %v257_v27  ;;  %v4698_v37 = vadd.f32 %v4284_v38, %v254_v22  ;;  %v879_v58 = vadd.f32 %v4673_v46, %v655_v57 }
  0xc2   :  { %6263 = vst [vmem:[#allocation84_spill] sm:$0xff] %v4689_v32  ;;  %v3066_v33 = vpop.eup %3065  ;;  %1304 = vmatprep.subr.bf16.mxu0 %v1087_v40  ;;  %v1089_v21 = vpack.c.bf16 %v3064_v47, %v3062_v4  ;;  %3085 = vtanh.f32 %v856_v17  ;;  %v656_v12 = vadd.f32 %v528_v3, %v264_v36  ;;  %v4701_v14 = vpop.permute.xlu1 %99  ;;  %v881_v15 = vadd.f32 %v4673_v46, %v657_v16 }
  0xc3   :  { %v3068_v60 = vpop.eup %3067  ;;  %6264 = vst [vmem:[#allocation85_spill] sm:$0xff] %v4701_v14  ;;  %3087 = vtanh.f32 %v864_v13  ;;  %v878_v9 = vadd.f32 %v4673_v46, %v654_v0  ;;  %v4706_v44 = vadd.f32 %v4301_v61, %v256_v35  ;;  %v4710_v27 = vmul.f32 %v3935_v25, %v4675_v8 }
  0xc4   :  { %v3070_v38 = vpop.eup %3069  ;;  %v4714_v22 = vmul.f32 %v3938_v26, %v4675_v8  ;;  %1417 = vmatprep.subr.bf16.mxu1 %v1089_v21  ;;  %v1086_v57 = vpack.c.bf16 %v3068_v60, %v3066_v33  ;;  %2035 = vperm.xlu1 %3024, %v1973_v43   ;;  %v271_v61 = vmul.f32 %v4158_v52, %v4675_v8  ;;  %3089 = vtanh.f32 %v879_v58  ;;  %v6267_v33 = vld [vmem:[#allocation11_spill] sm:$0xff] }
  0xc5   :  { %6265 = vst [vmem:[#allocation86_spill] sm:$0xff] %v4710_v27  ;;  %v3072_v13 = vpop.eup %3071  ;;  %v4723_v17 = vmul.f32 %v4191_v63, %v4675_v8  ;;  %v4727_v16 = vmul.f32 %v4194_v1, %v4675_v8  ;;  %v4731_v39 = vmul.f32 %v4202_v6, %v4675_v8  ;;  %v880_v3 = vadd.f32 %v4673_v46, %v656_v12  ;;  %v6272_v8 = vld [vmem:[#allocation20_spill] sm:$0xff] }
  0xc6   :  { %6266 = vst [vmem:[#allocation87_spill] sm:$0xff] %v4714_v22  ;;  %v3074_v0 = vpop.eup %3073  ;;  %1305 = vmatpush1.bf16.msra.mxu0 %v1086_v57  ;;  %v1088_v35 = vpack.c.bf16 %v3072_v13, %v3070_v38  ;;  %v279_v4 = vmul.f32 %v4158_v52, %v4701_v14  ;;  %v281_v36 = vmul.f32 %v4191_v63, %v4701_v14  ;;  %v4744_v58 = vpop.permute.xlu1 %371  ;;  %3091 = vtanh.f32 %v881_v15  ;;  %v6269_v38 = vld [vmem:[#allocation12_spill] sm:$0xff]  ;;  %v6270_v13 = vld [vmem:[#allocation15_spill] sm:$0xff] }
  0xc7   :  { %v3076_v40 = vpop.eup %3075  ;;  %v278_v47 = vmul.f32 %v4194_v1, %v4701_v14  ;;  %v219_v43 = vmul.f32 %v3955_v31, %v4476_v11  ;;  %v603_v21 = vadd.f32 %v6267_v33, %v4453_v18  ;;  %6268 = vst [vmem:[#allocation11_spill] sm:$0xff] %v4744_v58  ;;  %v221_v12 = vmul.f32 %v3992_v45, %v4476_v11  ;;  %v1977_v18 = vld [vmem:[%s6110_s6 + $0x78] sm:$0xff] }
  0xc8   :  { %v3078_v60 = vpop.eup %3077  ;;  %1418 = vmatpush1.bf16.msra.mxu1 %v1088_v35  ;;  %2045 = vperm.xlu1 %3024, %v1975_v59   ;;  %v605_v57 = vadd.f32 %v6269_v38, %v4456_v28  ;;  %v610_v46 = vadd.f32 %v6270_v13, %v4488_v7  ;;  %3093 = vtanh.f32 %v878_v9  ;;  %v543_v59 = vmul.f32 %v4153_v50, %v4744_v58 }
  0xc9   :  { %v3080_v22 = vpop.eup %3079  ;;  %v1095_v27 = vpack.c.bf16 %v3074_v0, %v3078_v60  ;;  %v280_v15 = vmul.f32 %v4202_v6, %v4701_v14  ;;  %v545_v28 = vmul.f32 %v4161_v53, %v4744_v58  ;;  %v542_v7 = vmul.f32 %v4164_v54, %v4744_v58  ;;  %v6271_v60 = vld [vmem:[#allocation19_spill] sm:$0xff] }
  0xca   :  { %v3082_v11 = vpop.eup %3081  ;;  %v1097_v35 = vpack.c.bf16 %v3076_v40, %v3080_v22  ;;  %v544_v0 = vmul.f32 %v4167_v55, %v4744_v58  ;;  %v671_v9 = vadd.f32 %v543_v59, %v279_v4  ;;  %v611_v38 = vadd.f32 %v6271_v60, %v219_v43  ;;  %v4768_v22 = vpop.permute.xlu0 %789  ;;  %v6283_v60 = vld [vmem:[#allocation62_spill] sm:$0xff] }
  0xcb   :  { %v3084_v33 = vpop.eup %3083  ;;  %1306 = vmatprep.subr.bf16.mxu0 %v1095_v27  ;;  %v827_v13 = vadd.f32 %v4286_v34, %v603_v21  ;;  %v613_v32 = vadd.f32 %v6272_v8, %v221_v12  ;;  %6273 = vst [vmem:[#allocation12_spill] sm:$0xff] %v4768_v22  ;;  %3095 = vtanh.f32 %v880_v3  ;;  %v673_v49 = vadd.f32 %v545_v28, %v281_v36  ;;  %v4770_v42 = vpop.permute.xlu1 %774 }
  0xcc   :  { %v3086_v20 = vpop.eup %3085  ;;  %1419 = vmatprep.subr.bf16.mxu1 %v1097_v35  ;;  %2055 = vperm.xlu1 %3024, %v1977_v18   ;;  %v1094_v40 = vpack.c.bf16 %v3084_v33, %v3082_v11  ;;  %v670_v5 = vadd.f32 %v542_v7, %v278_v47  ;;  %v895_v27 = vadd.f32 %v4768_v22, %v671_v9  ;;  %v6280_v7 = vld [vmem:[#allocation37_spill] sm:$0xff]  ;;  %v6281_v33 = vld [vmem:[#allocation40_spill] sm:$0xff] }
  0xcd   :  { %v3088_v30 = vpop.eup %3087  ;;  %v672_v4 = vadd.f32 %v544_v0, %v280_v15  ;;  %v835_v43 = vadd.f32 %v4557_v19, %v611_v38  ;;  %3097 = vtanh.f32 %v827_v13  ;;  %v871_v21 = vadd.f32 %v4770_v42, %v4637_v10 }
  0xce   :  { %1307 = vmatpush1.bf16.msra.mxu0 %v1094_v40  ;;  %v1096_v8 = vpack.c.bf16 %v3088_v30, %v3086_v20  ;;  %v873_v12 = vadd.f32 %v4770_v42, %v4695_v62  ;;  %v870_v3 = vadd.f32 %v4770_v42, %v4698_v37  ;;  %v872_v36 = vadd.f32 %v4770_v42, %v4706_v44  ;;  %v4786_v59 = vpop.eup %3089  ;;  %v6274_v37 = vld [vmem:[#allocation61_spill] sm:$0xff] }
  0xcf   :  { %v4783_v47 = vadd.f32 %v4316_v48, %v271_v61  ;;  %3099 = vtanh.f32 %v895_v27  ;;  %v897_v18 = vadd.f32 %v4768_v22, %v673_v49  ;;  %v894_v30 = vadd.f32 %v4768_v22, %v670_v5  ;;  %v4791_v62 = vpop.permute.xlu1 %104  ;;  %v6275_v49 = vld [vmem:[#allocation66_spill] sm:$0xff]  ;;  %v6276_v61 = vld [vmem:[#allocation16_spill] sm:$0xff] }
  0xd0   :  { %1420 = vmatpush1.bf16.msra.mxu1 %v1096_v8  ;;  %3101 = vtanh.f32 %v871_v21  ;;  %v829_v10 = vadd.f32 %v4286_v34, %v605_v57  ;;  %v837_v20 = vadd.f32 %v4557_v19, %v613_v32  ;;  %v4795_v48 = vadd.f32 %v4286_v34, %v6274_v37  ;;  %v3092_v11 = vpop.eup %3091  ;;  %v6278_v32 = vld [vmem:[#allocation36_spill] sm:$0xff]  ;;  %v6289_v37 = vld [vmem:[#allocation29_spill] sm:$0xff] }
  0xd1   :  { %3103 = vtanh.f32 %v873_v12  ;;  %v834_v44 = vadd.f32 %v4557_v19, %v610_v46  ;;  %v612_v15 = vadd.f32 %v6276_v61, %v6275_v49  ;;  %v4802_v5 = vmul.f32 %v3935_v25, %v4701_v14 }
  0xd2   :  { %3105 = vtanh.f32 %v870_v3  ;;  %v4806_v57 = vadd.f32 %v6278_v32, %v4723_v17  ;;  %v896_v35 = vadd.f32 %v4768_v22, %v672_v4  ;;  %v4809_v28 = vpop.eup %3093  ;;  %v4813_v46 = vmul.f32 %v3938_v26, %v4701_v14  ;;  %v6290_v32 = vld [vmem:[#allocation30_spill] sm:$0xff] }
  0xd3   :  { %6277 = vst [vmem:[#allocation15_spill] sm:$0xff] %v4802_v5  ;;  %3107 = vtanh.f32 %v872_v36  ;;  %v4817_v0 = vadd.f32 %v6280_v7, %v4727_v16  ;;  %v4821_v9 = vadd.f32 %v6281_v33, %v4731_v39  ;;  %v4825_v17 = vmul.f32 %v3929_v23, %v4744_v58  ;;  %v4838_v40 = vpop.permute.xlu1 %109  ;;  %v6292_v7 = vld [vmem:[#allocation9_spill] sm:$0xff] }
  0xd4   :  { %6279 = vst [vmem:[#allocation19_spill] sm:$0xff] %v4813_v46  ;;  %3109 = vtanh.f32 %v897_v18  ;;  %v4829_v38 = vadd.f32 %v4286_v34, %v6283_v60  ;;  %v4832_v13 = vadd.f32 %v4557_v19, %v612_v15  ;;  %v4836_v16 = vmul.f32 %v3932_v24, %v4744_v58  ;;  %6285 = vst [vmem:[#allocation66_spill] sm:$0xff] %v4838_v40  ;;  %v6293_v60 = vld [vmem:[#allocation33_spill] sm:$0xff]  ;;  %v6298_v46 = vld [vmem:[#allocation10_spill] sm:$0xff] }
  0xd5   :  { %6282 = vst [vmem:[#allocation20_spill] sm:$0xff] %v4825_v17  ;;  %3111 = vtanh.f32 %v894_v30  ;;  %v4842_v39 = vmul.f32 %v4158_v52, %v4791_v62  ;;  %v4846_v27 = vmul.f32 %v4191_v63, %v4791_v62  ;;  %v3096_v34 = vpop.eup %3095  ;;  %v4850_v19 = vmul.f32 %v3935_v25, %v4838_v40 }
  0xd6   :  { %6284 = vst [vmem:[#allocation61_spill] sm:$0xff] %v4836_v16  ;;  %v4854_v4 = vmul.f32 %v3938_v26, %v4838_v40  ;;  %3113 = vtanh.f32 %v896_v35  ;;  %v4858_v8 = vmul.f32 %v4194_v1, %v4791_v62  ;;  %v295_v12 = vmul.f32 %v4158_v52, %v4838_v40 }
  0xd7   :  { %6286 = vst [vmem:[#allocation16_spill] sm:$0xff] %v4850_v19  ;;  %v4860_v21 = vpop.eup %3097  ;;  %v297_v3 = vmul.f32 %v4191_v63, %v4838_v40  ;;  %v294_v36 = vmul.f32 %v4194_v1, %v4838_v40  ;;  %3115 = vtanh.f32 %v835_v43  ;;  %v296_v18 = vmul.f32 %v4202_v6, %v4838_v40  ;;  %v6291_v43 = vld [vmem:[#allocation70_spill] sm:$0xff]  ;;  %v6295_v19 = vld [vmem:[#allocation13_spill] sm:$0xff] }
  0xd8   :  { %6287 = vst [vmem:[#allocation36_spill] sm:$0xff] %v4854_v4  ;;  %6288 = vst [vmem:[#allocation37_spill] sm:$0xff] %v4860_v21  ;;  %v227_v30 = vmul.f32 %v3955_v31, %v4517_v2  ;;  %v4874_v49 = vadd.f32 %v4583_v56, %v6289_v37  ;;  %v229_v61 = vmul.f32 %v3992_v45, %v4517_v2  ;;  %3117 = vtanh.f32 %v837_v20  ;;  %v4890_v37 = vpop.permute.xlu1 %379  ;;  %v6296_v40 = vld [vmem:[#allocation14_spill] sm:$0xff]  ;;  %v6297_v20 = vld [vmem:[#allocation71_spill] sm:$0xff] }
  0xd9   :  { %v4878_v15 = vpop.eup %3099  ;;  %v4882_v35 = vadd.f32 %v4583_v56, %v6290_v32  ;;  %v618_v33 = vadd.f32 %v6292_v7, %v6291_v43  ;;  %v4888_v4 = vadd.f32 %v4583_v56, %v6293_v60  ;;  %6294 = vst [vmem:[#allocation40_spill] sm:$0xff] %v4890_v37  ;;  %3119 = vtanh.f32 %v829_v10 }
  0xda   :  { %v3102_v22 = vpop.eup %3101  ;;  %v619_v2 = vadd.f32 %v6295_v19, %v227_v30  ;;  %v621_v16 = vadd.f32 %v6296_v40, %v229_v61  ;;  %v620_v17 = vadd.f32 %v6298_v46, %v6297_v20  ;;  %v4898_v5 = vmul.f32 %v3929_v23, %v4890_v37 }
  0xdb   :  { %v3104_v32 = vpop.eup %3103  ;;  %v4902_v43 = vmul.f32 %v3932_v24, %v4890_v37  ;;  %v1103_v7 = vpack.c.bf16 %v4786_v59, %v3102_v22  ;;  %v559_v10 = vmul.f32 %v4153_v50, %v4890_v37  ;;  %v561_v40 = vmul.f32 %v4161_v53, %v4890_v37 }
  0xdc   :  { %6299 = vst [vmem:[#allocation62_spill] sm:$0xff] %v4898_v5  ;;  %v3106_v19 = vpop.eup %3105  ;;  %v1105_v30 = vpack.c.bf16 %v3092_v11, %v3104_v32  ;;  %v558_v46 = vmul.f32 %v4164_v54, %v4890_v37  ;;  %v560_v61 = vmul.f32 %v4167_v55, %v4890_v37  ;;  %3121 = vtanh.f32 %v834_v44  ;;  %v4919_v11 = vpop.permute.xlu0 %799 }
  0xdd   :  { %6300 = vst [vmem:[#allocation29_spill] sm:$0xff] %v4902_v43  ;;  %v3108_v60 = vpop.eup %3107  ;;  %1308 = vmatprep.subr.bf16.mxu0 %v1103_v7  ;;  %v1102_v20 = vpack.c.bf16 %v4809_v28, %v3106_v19  ;;  %v687_v43 = vadd.f32 %v559_v10, %v295_v12  ;;  %v4915_v22 = vadd.f32 %v4519_v29, %v619_v2  ;;  %6301 = vst [vmem:[#allocation30_spill] sm:$0xff] %v4919_v11  ;;  %v4924_v7 = vpop.permute.xlu1 %784  ;;  %v6306_v19 = vld [vmem:[#allocation7_spill] sm:$0xff] }
  0xde   :  { %v4917_v59 = vpop.eup %3109  ;;  %1421 = vmatprep.subr.bf16.mxu1 %v1105_v30  ;;  %v1104_v32 = vpack.c.bf16 %v3096_v34, %v3108_v60  ;;  %v689_v5 = vadd.f32 %v561_v40, %v297_v3  ;;  %v686_v58 = vadd.f32 %v558_v46, %v294_v36  ;;  %3123 = vtanh.f32 %v4795_v48  ;;  %6302 = vst [vmem:[#allocation70_spill] sm:$0xff] %v4924_v7  ;;  %v6307_v40 = vld [vmem:[#allocation67_spill] sm:$0xff]  ;;  %v6308_v46 = vld [vmem:[#allocation21_spill] sm:$0xff] }
  0xdf   :  { %v4922_v37 = vpop.eup %3111  ;;  %1309 = vmatpush1.bf16.msra.mxu0 %v1102_v20  ;;  %v911_v44 = vadd.f32 %v4919_v11, %v687_v43  ;;  %v688_v28 = vadd.f32 %v560_v61, %v296_v18  ;;  %v4928_v12 = vadd.f32 %v4519_v29, %v621_v16  ;;  %v4931_v2 = vadd.f32 %v4519_v29, %v618_v33  ;;  %v6313_v20 = vld [vmem:[#allocation42_spill] sm:$0xff] }
  0xe0   :  { %v4933_v10 = vpop.eup %3113  ;;  %1422 = vmatpush1.bf16.msra.mxu1 %v1104_v32  ;;  %v887_v48 = vadd.f32 %v4924_v7, %v4783_v47  ;;  %v889_v34 = vadd.f32 %v4924_v7, %v4806_v57  ;;  %v886_v3 = vadd.f32 %v4924_v7, %v4817_v0  ;;  %3125 = vtanh.f32 %v4829_v38  ;;  %v6304_v0 = vld [vmem:[#allocation34_spill] sm:$0xff]  ;;  %v6324_v47 = vld [vmem:[#allocation77_spill] sm:$0xff] }
  0xe1   :  { %v4942_v36 = vpop.eup %3115  ;;  %v888_v16 = vadd.f32 %v4924_v7, %v4821_v9  ;;  %3127 = vtanh.f32 %v911_v44  ;;  %v913_v18 = vadd.f32 %v4919_v11, %v689_v5  ;;  %v288_v33 = vmul.f32 %v4202_v6, %v4791_v62  ;;  %v4960_v9 = vpop.permute.xlu1 %114  ;;  %v6314_v44 = vld [vmem:[#allocation44_spill] sm:$0xff]  ;;  %v6335_v7 = vld [vmem:[#allocation18_spill] sm:$0xff] }
  0xe2   :  { %6303 = vst [vmem:[#allocation9_spill] sm:$0xff] %v4942_v36  ;;  %3129 = vtanh.f32 %v887_v48  ;;  %v4952_v57 = vadd.f32 %v4519_v29, %v620_v17  ;;  %v4956_v38 = vadd.f32 %v4583_v56, %v6304_v0  ;;  %v4958_v43 = vpop.eup %3117  ;;  %v910_v5 = vadd.f32 %v4919_v11, %v686_v58  ;;  %v6333_v36 = vld [vmem:[#allocation69_spill] sm:$0xff] }
  0xe3   :  { %6305 = vst [vmem:[#allocation33_spill] sm:$0xff] %v4958_v43  ;;  %3131 = vtanh.f32 %v889_v34  ;;  %v515_v30 = vmul.f32 %v6306_v19, %v4458_v51  ;;  %v635_v61 = vadd.f32 %v6308_v46, %v6307_v40  ;;  %v4967_v60 = vpop.eup %3119  ;;  %v4971_v29 = vmul.f32 %v3935_v25, %v4960_v9  ;;  %v6315_v34 = vld [vmem:[#allocation45_spill] sm:$0xff] }
  0xe4   :  { %6309 = vst [vmem:[#allocation13_spill] sm:$0xff] %v4967_v60  ;;  %v4975_v56 = vmul.f32 %v3938_v26, %v4960_v9  ;;  %3133 = vtanh.f32 %v886_v3  ;;  %v912_v17 = vadd.f32 %v4919_v11, %v688_v28  ;;  %v4980_v58 = vmul.f32 %v3935_v25, %v4791_v62  ;;  %v6316_v3 = vld [vmem:[#allocation68_spill] sm:$0xff] }
  0xe5   :  { %6310 = vst [vmem:[#allocation14_spill] sm:$0xff] %v4971_v29  ;;  %3135 = vtanh.f32 %v888_v16  ;;  %v4984_v32 = vadd.f32 %v6313_v20, %v4842_v39  ;;  %v4988_v48 = vadd.f32 %v6314_v44, %v4846_v27  ;;  %v4992_v0 = vadd.f32 %v6315_v34, %v4858_v8  ;;  %v4999_v16 = vpop.permute.xlu1 %119  ;;  %v6318_v39 = vld [vmem:[#allocation47_spill] sm:$0xff]  ;;  %v6327_v11 = vld [vmem:[#allocation8_spill] sm:$0xff] }
  0xe6   :  { %6311 = vst [vmem:[#allocation71_spill] sm:$0xff] %v4975_v56  ;;  %6312 = vst [vmem:[#allocation10_spill] sm:$0xff] %v4980_v58  ;;  %3137 = vtanh.f32 %v913_v18  ;;  %v643_v40 = vadd.f32 %v515_v30, %v6316_v3  ;;  %v4997_v46 = vpop.eup %3121  ;;  %v5002_v20 = vadd.f32 %v6318_v39, %v288_v33  ;;  %v5006_v27 = vmul.f32 %v4158_v52, %v4960_v9  ;;  %v6319_v18 = vld [vmem:[#allocation41_spill] sm:$0xff]  ;;  %v6326_v56 = vld [vmem:[#allocation55_spill] sm:$0xff] }
  0xe7   :  { %6317 = vst [vmem:[#allocation34_spill] sm:$0xff] %v4997_v46  ;;  %3139 = vtanh.f32 %v910_v5  ;;  %v245_v8 = vmul.f32 %v3992_v45, %v6319_v18  ;;  %v5014_v30 = vmul.f32 %v3935_v25, %v4999_v16  ;;  %v5018_v34 = vmul.f32 %v3938_v26, %v4999_v16  ;;  %v6329_v60 = vld [vmem:[#allocation52_spill] sm:$0xff]  ;;  %v6334_v58 = vld [vmem:[#allocation53_spill] sm:$0xff] }
  0xe8   :  { %v5010_v44 = vpop.eup %3123  ;;  %3141 = vtanh.f32 %v912_v17  ;;  %v5022_v33 = vmul.f32 %v4191_v63, %v4960_v9  ;;  %v311_v5 = vmul.f32 %v4158_v52, %v4999_v16  ;;  %v313_v3 = vmul.f32 %v4191_v63, %v4999_v16 }
  0xe9   :  { %6320 = vst [vmem:[#allocation7_spill] sm:$0xff] %v5010_v44  ;;  %6321 = vst [vmem:[#allocation67_spill] sm:$0xff] %v5014_v30  ;;  %v310_v39 = vmul.f32 %v4194_v1, %v4999_v16  ;;  %3143 = vtanh.f32 %v4832_v13  ;;  %v5036_v17 = vadd.f32 %v4656_v41, %v635_v61  ;;  %v253_v30 = vmul.f32 %v3992_v45, %v6326_v56  ;;  %v6328_v44 = vld [vmem:[#allocation22_spill] sm:$0xff]  ;;  %v6330_v13 = vld [vmem:[#allocation17_spill] sm:$0xff]  ;;  %v5051_v21 = vpop.permute.xlu1 %387 }
  0xea   :  { %6322 = vst [vmem:[#allocation21_spill] sm:$0xff] %v5018_v34  ;;  %v5032_v28 = vpop.eup %3125  ;;  %v5039_v34 = vadd.f32 %v6324_v47, %v643_v40  ;;  %3145 = vtanh.f32 %v4915_v22  ;;  %v517_v18 = vmul.f32 %v6327_v11, %v4458_v51  ;;  %v637_v46 = vadd.f32 %v6328_v44, %v245_v8  ;;  %6331 = vst [vmem:[#allocation45_spill] sm:$0xff] %v5051_v21  ;;  %v6332_v40 = vld [vmem:[#allocation63_spill] sm:$0xff]  ;;  %v6336_v22 = vld [vmem:[#allocation64_spill] sm:$0xff] }
  0xeb   :  { %6323 = vst [vmem:[#allocation42_spill] sm:$0xff] %v5036_v17  ;;  %v5043_v29 = vpop.eup %3127  ;;  %v634_v43 = vadd.f32 %v6330_v13, %v6329_v60  ;;  %3147 = vtanh.f32 %v4874_v49  ;;  %v642_v56 = vadd.f32 %v6333_v36, %v6332_v40  ;;  %v636_v14 = vadd.f32 %v6335_v7, %v6334_v58 }
  0xec   :  { %6325 = vst [vmem:[#allocation44_spill] sm:$0xff] %v5039_v34  ;;  %v3130_v61 = vpop.eup %3129  ;;  %v6337_v34 = vld [vmem:[#allocation73_spill] sm:$0xff]  ;;  %v5062_v8 = vmul.f32 %v3929_v23, %v5051_v21  ;;  %v5066_v60 = vmul.f32 %v3932_v24, %v5051_v21  ;;  %v575_v36 = vmul.f32 %v4153_v50, %v5051_v21  ;;  %v577_v58 = vmul.f32 %v4161_v53, %v5051_v21 }
  0xed   :  { %v644_v17 = vadd.f32 %v6337_v34, %v6336_v22  ;;  %v3132_v51 = vpop.eup %3131  ;;  %v1111_v49 = vpack.c.bf16 %v4878_v15, %v3130_v61  ;;  %v574_v34 = vmul.f32 %v4164_v54, %v5051_v21  ;;  %v576_v13 = vmul.f32 %v4167_v55, %v5051_v21 }
  0xee   :  { %6338 = vst [vmem:[#allocation68_spill] sm:$0xff] %v5062_v8  ;;  %6339 = vst [vmem:[#allocation47_spill] sm:$0xff] %v5066_v60  ;;  %v3134_v44 = vpop.eup %3133  ;;  %v1113_v7 = vpack.c.bf16 %v4917_v59, %v3132_v51  ;;  %v703_v15 = vadd.f32 %v575_v36, %v311_v5  ;;  %v312_v61 = vmul.f32 %v4202_v6, %v4999_v16  ;;  %v5083_v59 = vpop.permute.xlu0 %809  ;;  %3149 = vtanh.f32 %v4928_v12 }
  0xef   :  { %v3136_v40 = vpop.eup %3135  ;;  %1310 = vmatprep.subr.bf16.mxu0 %v1111_v49  ;;  %v1110_v22 = vpack.c.bf16 %v4922_v37, %v3134_v44  ;;  %v645_v60 = vadd.f32 %v517_v18, %v253_v30  ;;  %6340 = vst [vmem:[#allocation41_spill] sm:$0xff] %v5083_v59  ;;  %v705_v24 = vadd.f32 %v577_v58, %v313_v3  ;;  %v5089_v37 = vpop.permute.xlu1 %794  ;;  %3151 = vtanh.f32 %v4882_v35 }
  0xf0   :  { %v5081_v8 = vpop.eup %3137  ;;  %1423 = vmatprep.subr.bf16.mxu1 %v1113_v7  ;;  %v1112_v51 = vpack.c.bf16 %v4933_v10, %v3136_v40  ;;  %v702_v23 = vadd.f32 %v574_v34, %v310_v39  ;;  %v927_v5 = vadd.f32 %v5083_v59, %v703_v15  ;;  %v5094_v30 = vadd.f32 %v4656_v41, %v637_v46  ;;  %v6343_v34 = vld [vmem:[#allocation49_spill] sm:$0xff] }
  0xf1   :  { %v5087_v21 = vpop.eup %3139  ;;  %1311 = vmatpush1.bf16.msra.mxu0 %v1110_v22  ;;  %v5097_v18 = vadd.f32 %v6324_v47, %v645_v60  ;;  %v903_v12 = vadd.f32 %v5089_v37, %v4984_v32  ;;  %v905_v3 = vadd.f32 %v5089_v37, %v4988_v48  ;;  %v902_v39 = vadd.f32 %v5089_v37, %v4992_v0  ;;  %v6344_v22 = vld [vmem:[#allocation72_spill] sm:$0xff] }
  0xf2   :  { %v5099_v10 = vpop.eup %3141  ;;  %1424 = vmatpush1.bf16.msra.mxu1 %v1112_v51  ;;  %v704_v49 = vadd.f32 %v576_v13, %v312_v61  ;;  %v904_v35 = vadd.f32 %v5089_v37, %v5002_v20  ;;  %3153 = vtanh.f32 %v927_v5  ;;  %v929_v46 = vadd.f32 %v5083_v59, %v705_v24  ;;  %v6346_v51 = vld [vmem:[#allocation50_spill] sm:$0xff] }
  0xf3   :  { %v302_v60 = vmul.f32 %v4194_v1, %v4960_v9  ;;  %v5112_v36 = vpop.eup %3143  ;;  %3155 = vtanh.f32 %v903_v12  ;;  %v5115_v32 = vadd.f32 %v4656_v41, %v634_v43  ;;  %v5118_v48 = vadd.f32 %v6324_v47, %v642_v56  ;;  %v5125_v20 = vpop.permute.xlu1 %124 }
  0xf4   :  { %v5121_v0 = vadd.f32 %v4656_v41, %v636_v14  ;;  %v5123_v44 = vpop.eup %3145  ;;  %6341 = vst [vmem:[#allocation77_spill] sm:$0xff] %v5125_v20  ;;  %3157 = vtanh.f32 %v905_v3  ;;  %v926_v24 = vadd.f32 %v5083_v59, %v702_v23  ;;  %v5131_v58 = vadd.f32 %v6324_v47, %v644_v17 }
  0xf5   :  { %v5133_v43 = vpop.eup %3147  ;;  %v5137_v56 = vmul.f32 %v3938_v26, %v5125_v20  ;;  %3159 = vtanh.f32 %v902_v39  ;;  %v304_v41 = vmul.f32 %v4202_v6, %v4960_v9  ;;  %v928_v14 = vadd.f32 %v5083_v59, %v704_v49  ;;  %v6348_v49 = vld [vmem:[#allocation51_spill] sm:$0xff] }
  0xf6   :  { %v5144_v23 = vmul.f32 %v3938_v26, %v4791_v62  ;;  %3161 = vtanh.f32 %v904_v35  ;;  %v319_v47 = vmul.f32 %v4158_v52, %v5125_v20  ;;  %v321_v17 = vmul.f32 %v4191_v63, %v5125_v20 }
  0xf7   :  { %6342 = vst [vmem:[#allocation55_spill] sm:$0xff] %v5137_v56  ;;  %v5152_v13 = vadd.f32 %v6343_v34, %v5006_v27  ;;  %3163 = vtanh.f32 %v929_v46  ;;  %v259_v15 = vmul.f32 %v3955_v31, %v6344_v22  ;;  %v5158_v61 = vpop.permute.xlu1 %129  ;;  %v697_v5 = vadd.f32 %v6346_v51, %v5022_v33  ;;  %v6349_v46 = vld [vmem:[#allocation56_spill] sm:$0xff]  ;;  %v6350_v33 = vld [vmem:[#allocation58_spill] sm:$0xff]  ;;  %v6351_v51 = vld [vmem:[#allocation59_spill] sm:$0xff] }
  0xf8   :  { %6345 = vst [vmem:[#allocation8_spill] sm:$0xff] %v5158_v61  ;;  %3165 = vtanh.f32 %v926_v24  ;;  %v318_v12 = vmul.f32 %v4194_v1, %v5125_v20  ;;  %v320_v27 = vmul.f32 %v4202_v6, %v5125_v20  ;;  %v5166_v3 = vpop.eup %3149  ;;  %v5170_v39 = vmul.f32 %v3935_v25, %v5125_v20  ;;  %v6352_v56 = vld [vmem:[#allocation74_spill] sm:$0xff] }
  0xf9   :  { %v694_v35 = vadd.f32 %v6348_v49, %v302_v60  ;;  %v696_v34 = vadd.f32 %v6349_v46, %v304_v41  ;;  %3167 = vtanh.f32 %v928_v14  ;;  %v5174_v40 = vpop.eup %3151  ;;  %v5177_v24 = vadd.f32 %v6350_v33, %v319_v47  ;;  %v6353_v60 = vld [vmem:[#allocation80_spill] sm:$0xff]  ;;  %v6354_v14 = vld [vmem:[#allocation26_spill] sm:$0xff]  ;;  %v6356_v33 = vld [vmem:[#allocation65_spill] sm:$0xff] }
  0xfa   :  { %6347 = vst [vmem:[#allocation22_spill] sm:$0xff] %v5170_v39  ;;  %v5180_v7 = vadd.f32 %v6351_v51, %v321_v17  ;;  %3169 = vtanh.f32 %v4931_v2  ;;  %v267_v26 = vmul.f32 %v3955_v31, %v6352_v56  ;;  %v531_v41 = vmul.f32 %v6306_v19, %v6353_v60  ;;  %v6355_v46 = vld [vmem:[#allocation60_spill] sm:$0xff] }
  0xfb   :  { %3171 = vtanh.f32 %v4888_v4  ;;  %v651_v49 = vadd.f32 %v6354_v14, %v259_v15  ;;  %v327_v17 = vmul.f32 %v4158_v52, %v5158_v61  ;;  %v5196_v2 = vadd.f32 %v6355_v46, %v318_v12  ;;  %v5202_v4 = vpop.permute.xlu1 %395  ;;  %v6357_v14 = vld [vmem:[#allocation75_spill] sm:$0xff] }
  0xfc   :  { %v5191_v47 = vpop.eup %3153  ;;  %v5199_v51 = vadd.f32 %v6356_v33, %v320_v27  ;;  %3173 = vtanh.f32 %v4952_v57  ;;  %v5205_v59 = vadd.f32 %v531_v41, %v267_v26  ;;  %v6358_v52 = vld [vmem:[#allocation23_spill] sm:$0xff]  ;;  %v591_v27 = vmul.f32 %v4153_v50, %v5202_v4 }
  0xfd   :  { %v3156_v39 = vpop.eup %3155  ;;  %3175 = vtanh.f32 %v4956_v38  ;;  %v5208_v15 = vadd.f32 %v4770_v42, %v651_v49  ;;  %v650_v20 = vadd.f32 %v6358_v52, %v6357_v14  ;;  %v261_v57 = vmul.f32 %v3992_v45, %v6344_v22 }
  0xfe   :  { %v3158_v12 = vpop.eup %3157  ;;  %v1119_v46 = vpack.c.bf16 %v5043_v29, %v3156_v39  ;;  %v533_v38 = vmul.f32 %v6327_v11, %v6353_v60  ;;  %v329_v49 = vmul.f32 %v4191_v63, %v5158_v61  ;;  %v593_v33 = vmul.f32 %v4161_v53, %v5202_v4  ;;  %v6359_v60 = vld [vmem:[#allocation42_spill] sm:$0xff] }
  0xff   :  { %v3160_v26 = vpop.eup %3159  ;;  %v1121_v41 = vpack.c.bf16 %v5081_v8, %v3158_v12  ;;  %v326_v29 = vmul.f32 %v4194_v1, %v5158_v61  ;;  %v328_v22 = vmul.f32 %v4202_v6, %v5158_v61  ;;  %3177 = vtanh.f32 %v6359_v60  ;;  %v6361_v12 = vld [vmem:[#allocation44_spill] sm:$0xff] }
 0x100   :  { %v3162_v39 = vpop.eup %3161  ;;  %1312 = vmatprep.subr.bf16.mxu0 %v1119_v46  ;;  %v1118_v50 = vpack.c.bf16 %v5087_v21, %v3160_v26  ;;  %v269_v8 = vmul.f32 %v3992_v45, %v6352_v56  ;;  %v719_v63 = vadd.f32 %v591_v27, %v327_v17  ;;  %v590_v1 = vmul.f32 %v4164_v54, %v5202_v4  ;;  %v5241_v6 = vpop.permute.xlu1 %804  ;;  %v6362_v56 = vld [vmem:[#allocation27_spill] sm:$0xff] }
 0x101   :  { %v5232_v14 = vpop.eup %3163  ;;  %1425 = vmatprep.subr.bf16.mxu1 %v1121_v41  ;;  %v1120_v53 = vpack.c.bf16 %v5099_v10, %v3162_v39  ;;  %v592_v21 = vmul.f32 %v4167_v55, %v5202_v4  ;;  %6360 = vst [vmem:[#allocation52_spill] sm:$0xff] %v5241_v6  ;;  %3179 = vtanh.f32 %v6361_v12  ;;  %v653_v46 = vadd.f32 %v6362_v56, %v261_v57  ;;  %v6363_v41 = vld [vmem:[#allocation78_spill] sm:$0xff]  ;;  %v6364_v10 = vld [vmem:[#allocation83_spill] sm:$0xff]  ;;  %v6366_v12 = vld [vmem:[#allocation24_spill] sm:$0xff] }
 0x102   :  { %v5239_v52 = vpop.eup %3165  ;;  %1313 = vmatpush1.bf16.msra.mxu0 %v1118_v50  ;;  %v5245_v26 = vadd.f32 %v533_v38, %v269_v8  ;;  %v5249_v17 = vadd.f32 %v6364_v10, %v6363_v41  ;;  %v919_v54 = vadd.f32 %v5241_v6, %v5152_v13  ;;  %v921_v55 = vadd.f32 %v5241_v6, %v697_v5  ;;  %v6365_v5 = vld [vmem:[#allocation76_spill] sm:$0xff]  ;;  %v6370_v41 = vld [vmem:[#allocation82_spill] sm:$0xff] }
 0x103   :  { %v5251_v27 = vpop.eup %3167  ;;  %1426 = vmatpush1.bf16.msra.mxu1 %v1120_v53  ;;  %v918_v39 = vadd.f32 %v5241_v6, %v694_v35  ;;  %v721_v50 = vadd.f32 %v593_v33, %v329_v49  ;;  %v920_v57 = vadd.f32 %v5241_v6, %v696_v34  ;;  %3181 = vtanh.f32 %v5094_v30  ;;  %v6367_v49 = vld [vmem:[#allocation79_spill] sm:$0xff]  ;;  %v6368_v33 = vld [vmem:[#allocation84_spill] sm:$0xff] }
 0x104   :  { %v5257_v60 = vpop.eup %3169  ;;  %v5262_v38 = vadd.f32 %v4770_v42, %v653_v46  ;;  %v5265_v8 = vadd.f32 %v4770_v42, %v650_v20  ;;  %3183 = vtanh.f32 %v919_v54  ;;  %v718_v13 = vadd.f32 %v590_v1, %v326_v29  ;;  %v5277_v30 = vpop.permute.xlu1 %814 }
 0x105   :  { %v5267_v53 = vpop.eup %3171  ;;  %v652_v35 = vadd.f32 %v6366_v12, %v6365_v5  ;;  %v5273_v56 = vadd.f32 %v6368_v33, %v6367_v49  ;;  %6369 = vst [vmem:[#allocation17_spill] sm:$0xff] %v5277_v30  ;;  %3185 = vtanh.f32 %v921_v55  ;;  %v720_v46 = vadd.f32 %v592_v21, %v328_v22  ;;  %v6372_v12 = vld [vmem:[#allocation25_spill] sm:$0xff]  ;;  %v6373_v49 = vld [vmem:[#allocation11_spill] sm:$0xff] }
 0x106   :  { %v5275_v34 = vpop.eup %3173  ;;  %v275_v10 = vmul.f32 %v3955_v31, %v6370_v41  ;;  %3187 = vtanh.f32 %v918_v39  ;;  %v935_v1 = vadd.f32 %v5277_v30, %v5177_v24  ;;  %v937_v54 = vadd.f32 %v5277_v30, %v5180_v7  ;;  %v6371_v39 = vld [vmem:[#allocation85_spill] sm:$0xff] }
 0x107   :  { %v5283_v29 = vpop.eup %3175  ;;  %v934_v5 = vadd.f32 %v5277_v30, %v5196_v2  ;;  %3189 = vtanh.f32 %v920_v57  ;;  %v936_v22 = vadd.f32 %v5277_v30, %v5199_v51  ;;  %v5296_v55 = vadd.f32 %v4770_v42, %v652_v35 }
 0x108   :  { %3191 = vtanh.f32 %v935_v1  ;;  %v283_v24 = vmul.f32 %v3955_v31, %v6371_v39  ;;  %v539_v7 = vmul.f32 %v6306_v19, %v6372_v12  ;;  %v547_v2 = vmul.f32 %v6306_v19, %v6373_v49  ;;  %v5306_v33 = vpop.permute.xlu1 %819 }
 0x109   :  { %v5304_v57 = vpop.eup %3177  ;;  %6374 = vst [vmem:[#allocation63_spill] sm:$0xff] %v5306_v33  ;;  %3193 = vtanh.f32 %v937_v54  ;;  %v277_v51 = vmul.f32 %v3992_v45, %v6370_v41  ;;  %v285_v42 = vmul.f32 %v3992_v45, %v6371_v39  ;;  %v541_v35 = vmul.f32 %v6327_v11, %v6372_v12 }
 0x10a   :  { %v943_v1 = vadd.f32 %v5306_v33, %v719_v63  ;;  %v945_v21 = vadd.f32 %v5306_v33, %v721_v50  ;;  %v942_v20 = vadd.f32 %v5306_v33, %v718_v13  ;;  %3195 = vtanh.f32 %v934_v5  ;;  %v6378_v5 = vld [vmem:[#allocation86_spill] sm:$0xff] }
 0x10b   :  { %v5317_v30 = vpop.eup %3179  ;;  %v944_v54 = vadd.f32 %v5306_v33, %v720_v46  ;;  %3197 = vtanh.f32 %v936_v22  ;;  %v5320_v6 = vadd.f32 %v539_v7, %v275_v10  ;;  %v5322_v41 = vadd.f32 %v547_v2, %v283_v24  ;;  %v6376_v46 = vld [vmem:[#allocation4_spill] sm:$0xff]  ;;  %v6379_v22 = vld [vmem:[#allocation31_spill] sm:$0xff] }
 0x10c   :  { %3199 = vtanh.f32 %v943_v1  ;;  %v549_v63 = vmul.f32 %v6327_v11, %v6373_v49  ;;  %v669_v50 = vadd.f32 %v541_v35, %v277_v51  ;;  %v5332_v13 = vmul.f32 %v3935_v25, %v5158_v61  ;;  %v6380_v1 = vld [vmem:[#allocation70_spill] sm:$0xff]  ;;  %v6381_v51 = vld [vmem:[#allocation15_spill] sm:$0xff]  ;;  %v6382_v35 = vld [vmem:[#allocation20_spill] sm:$0xff] }
 0x10d   :  { %v5328_v12 = vpop.eup %3181  ;;  %v5336_v10 = vmul.f32 %v6376_v46, %v5202_v4  ;;  %3201 = vtanh.f32 %v945_v21  ;;  %v666_v24 = vadd.f32 %v6379_v22, %v6378_v5  ;;  %v5345_v39 = vadd.f32 %v6382_v35, %v6381_v51  ;;  %v6383_v21 = vld [vmem:[#allocation87_spill] sm:$0xff]  ;;  %v6389_v35 = vld [vmem:[#allocation28_spill] sm:$0xff] }
 0x10e   :  { %6375 = vst [vmem:[#allocation69_spill] sm:$0xff] %v5332_v13  ;;  %v3184_v7 = vpop.eup %3183  ;;  %3203 = vtanh.f32 %v942_v20  ;;  %v677_v2 = vadd.f32 %v549_v63, %v285_v42  ;;  %v5341_v49 = vadd.f32 %v6380_v1, %v669_v50  ;;  %v6385_v42 = vld [vmem:[#allocation81_spill] sm:$0xff]  ;;  %v6394_v13 = vld [vmem:[#allocation62_spill] sm:$0xff] }
 0x10f   :  { %6377 = vst [vmem:[#allocation53_spill] sm:$0xff] %v5336_v10  ;;  %v3186_v25 = vpop.eup %3185  ;;  %v1127_v33 = vpack.c.bf16 %v5191_v47, %v3184_v7  ;;  %3205 = vtanh.f32 %v944_v54  ;;  %v5349_v46 = vadd.f32 %v6380_v1, %v666_v24  ;;  %v6384_v10 = vld [vmem:[#allocation35_spill] sm:$0xff]  ;;  %v883_v63 = vadd.f32 %v6385_v42, %v5205_v59  ;;  %v6387_v24 = vld [vmem:[#allocation61_spill] sm:$0xff] }
 0x110   :  { %v668_v5 = vadd.f32 %v6384_v10, %v6383_v21  ;;  %v3188_v22 = vpop.eup %3187  ;;  %v1129_v20 = vpack.c.bf16 %v5232_v14, %v3186_v25  ;;  %3207 = vtanh.f32 %v5097_v18  ;;  %v885_v50 = vadd.f32 %v6385_v42, %v5245_v26  ;;  %v6386_v54 = vld [vmem:[#allocation19_spill] sm:$0xff]  ;;  %v6390_v21 = vld [vmem:[#allocation40_spill] sm:$0xff] }
 0x111   :  { %v3190_v51 = vpop.eup %3189  ;;  %1314 = vmatprep.subr.bf16.mxu0 %v1127_v33  ;;  %v1126_v47 = vpack.c.bf16 %v5239_v52, %v3188_v22  ;;  %3209 = vtanh.f32 %v5115_v32  ;;  %v5363_v10 = vadd.f32 %v6387_v24, %v6386_v54  ;;  %v291_v26 = vmul.f32 %v3955_v31, %v4791_v62  ;;  %v6388_v33 = vld [vmem:[#allocation66_spill] sm:$0xff] }
 0x112   :  { %v5366_v14 = vadd.f32 %v6380_v1, %v668_v5  ;;  %v3192_v18 = vpop.eup %3191  ;;  %1427 = vmatprep.subr.bf16.mxu1 %v1129_v20  ;;  %v1128_v59 = vpack.c.bf16 %v5251_v27, %v3190_v51  ;;  %3211 = vtanh.f32 %v5118_v48  ;;  %v299_v52 = vmul.f32 %v3955_v31, %v6388_v33  ;;  %v6392_v24 = vld [vmem:[#allocation38_spill] sm:$0xff] }
 0x113   :  { %v3194_v32 = vpop.eup %3193  ;;  %1315 = vmatpush1.bf16.msra.mxu0 %v1126_v47  ;;  %3213 = vtanh.f32 %v5121_v0  ;;  %v882_v7 = vadd.f32 %v6385_v42, %v5249_v17  ;;  %v555_v25 = vmul.f32 %v6306_v19, %v6389_v35  ;;  %v563_v27 = vmul.f32 %v6306_v19, %v6390_v21 }
 0x114   :  { %v3196_v48 = vpop.eup %3195  ;;  %1428 = vmatpush1.bf16.msra.mxu1 %v1128_v59  ;;  %3215 = vtanh.f32 %v5131_v58  ;;  %v293_v5 = vmul.f32 %v3992_v45, %v4791_v62  ;;  %v301_v22 = vmul.f32 %v3992_v45, %v6388_v33  ;;  %v557_v0 = vmul.f32 %v6327_v11, %v6389_v35  ;;  %v6391_v62 = vld [vmem:[#allocation10_spill] sm:$0xff]  ;;  %v6393_v33 = vld [vmem:[#allocation16_spill] sm:$0xff] }
 0x115   :  { %v3198_v17 = vpop.eup %3197  ;;  %3217 = vtanh.f32 %v5208_v15  ;;  %v683_v20 = vadd.f32 %v555_v25, %v291_v26  ;;  %v5389_v51 = vadd.f32 %v563_v27, %v299_v52  ;;  %v565_v47 = vmul.f32 %v6327_v11, %v6390_v21  ;;  %v6395_v15 = vld [vmem:[#allocation5_spill] sm:$0xff] }
 0x116   :  { %v3200_v54 = vpop.eup %3199  ;;  %3219 = vtanh.f32 %v883_v63  ;;  %v5393_v58 = vadd.f32 %v557_v0, %v293_v5  ;;  %v5397_v59 = vadd.f32 %v6392_v24, %v6391_v62  ;;  %v5401_v35 = vadd.f32 %v6394_v13, %v6393_v33 }
 0x117   :  { %v3202_v61 = vpop.eup %3201  ;;  %v5405_v26 = vmul.f32 %v6395_v15, %v5202_v4  ;;  %v1135_v52 = vpack.c.bf16 %v3200_v54, %v3192_v18  ;;  %3221 = vtanh.f32 %v5262_v38  ;;  %v884_v63 = vadd.f32 %v6385_v42, %v5273_v56  ;;  %v6396_v18 = vld [vmem:[#allocation12_spill] sm:$0xff]  ;;  %v6404_v15 = vld [vmem:[#allocation33_spill] sm:$0xff] }
 0x118   :  { %v3204_v25 = vpop.eup %3203  ;;  %v1137_v21 = vpack.c.bf16 %v3202_v61, %v3194_v32  ;;  %3223 = vtanh.f32 %v885_v50  ;;  %v891_v27 = vadd.f32 %v6380_v1, %v5320_v6  ;;  %v5412_v5 = vadd.f32 %v565_v47, %v301_v22  ;;  %v5423_v6 = vld [vmem:[%s6111_s3] sm:$0xff]   ;;  %v6398_v42 = vld [vmem:[#allocation36_spill] sm:$0xff]  ;;  %v6399_v50 = vld [vmem:[#allocation29_spill] sm:$0xff] }
 0x119   :  { %v3206_v13 = vpop.eup %3205  ;;  %1316 = vmatprep.subr.bf16.mxu0 %v1135_v52  ;;  %v1134_v0 = vpack.c.bf16 %v3204_v25, %v3196_v48  ;;  %3225 = vtanh.f32 %v5265_v8  ;;  %v899_v54 = vadd.f32 %v6396_v18, %v5322_v41  ;;  %v901_v38 = vadd.f32 %v6396_v18, %v677_v2  ;;  %v6397_v8 = vld [vmem:[#allocation39_spill] sm:$0xff]  ;;  %v6401_v48 = vld [vmem:[#allocation37_spill] sm:$0xff]  ;;  %v6403_v47 = vld [vmem:[#allocation32_spill] sm:$0xff] }
 0x11a   :  { %v5418_v62 = vpop.eup %3207  ;;  %1429 = vmatprep.subr.bf16.mxu1 %v1137_v21  ;;  %v1136_v61 = vpack.c.bf16 %v3206_v13, %v3198_v17  ;;  %3227 = vtanh.f32 %v882_v7  ;;  %v898_v56 = vadd.f32 %v6396_v18, %v5345_v39  ;;  %v5429_v1 = vadd.f32 %v6397_v8, %v5144_v23  ;;  %v6400_v23 = vld [vmem:[#allocation9_spill] sm:$0xff] }
 0x11b   :  { %v5431_v41 = vpop.eup %3209  ;;  %1317 = vmatpush1.bf16.msra.mxu0 %v1134_v0  ;;  %v1101_v2 = vpack.c.bf16 %v5418_v62, %v5328_v12  ;;  %3229 = vtanh.f32 %v5296_v55  ;;  %v5438_v32 = vadd.f32 %v6399_v50, %v6398_v42  ;;  %v307_v7 = vmul.f32 %v3955_v31, %v4960_v9  ;;  %v6405_v52 = vld [vmem:[#allocation13_spill] sm:$0xff] }
 0x11c   :  { %v5442_v39 = vpop.eup %3211  ;;  %1430 = vmatpush1.bf16.msra.mxu1 %v1136_v61  ;;  %v6402_v22 = vpack.c.bf16 %v6400_v23, %v6401_v48  ;;  %3231 = vtanh.f32 %v884_v63  ;;  %v900_v17 = vadd.f32 %v6396_v18, %v5363_v10  ;;  %v315_v55 = vmul.f32 %v3955_v31, %v4999_v16  ;;  %v6407_v13 = vld [vmem:[#allocation45_spill] sm:$0xff] }
 0x11d   :  { %v571_v24 = vmul.f32 %v6306_v19, %v6403_v47  ;;  %v5453_v33 = vpop.eup %3213  ;;  %v6406_v25 = vpack.c.bf16 %v6404_v15, %v6405_v52  ;;  %v1098_v21 = vpack.c.bf16 %v5442_v39, %v5431_v41  ;;  %3233 = vtanh.f32 %v891_v27  ;;  %v6408_v27 = vld [vmem:[#allocation34_spill] sm:$0xff]  ;;  %v5508_v52 = vld [vmem:[%s6111_s3 + $0x8] sm:$0xff]  }
 0x11e   :  { %1528 = vmatprep.subr.bf16.mxu0 %v6402_v22  ;;  %v907_v63 = vadd.f32 %v5089_v37, %v683_v20  ;;  %v579_v10 = vmul.f32 %v6306_v19, %v6407_v13  ;;  %v5463_v0 = vpop.eup %3215  ;;  %1335 = vmatmul.mubr.bf16.vlgmr.msra.gmra.mrb[0].mxu0 %v5423_v6  ;;  %3235 = vtanh.f32 %v899_v54  ;;  %v309_v61 = vmul.f32 %v3992_v45, %v4960_v9  ;;  %v6409_v20 = vld [vmem:[#allocation7_spill] sm:$0xff]  ;;  %v6413_v22 = vld [vmem:[#allocation30_spill] sm:$0xff] }
 0x11f   :  { %1641 = vmatprep.subr.bf16.mxu1 %v6406_v25  ;;  %v699_v18 = vadd.f32 %v571_v24, %v307_v7  ;;  %v317_v8 = vmul.f32 %v3992_v45, %v4999_v16  ;;  %v3218_v42 = vpop.eup %3217  ;;  %1448 = vmatmul.mubr.bf16.vlgmr.msra.gmra.mrb[0].mxu1 %v5423_v6  ;;  %v6410_v50 = vpack.c.bf16 %v6408_v27, %v6409_v20  ;;  %3237 = vtanh.f32 %v5341_v49  ;;  %v6419_v25 = vld [vmem:[#allocation68_spill] sm:$0xff] }
 0x120   :  { %v1100_v23 = vpack.c.bf16 %v5463_v0, %v5453_v33  ;;  %v5477_v54 = vadd.f32 %v579_v10, %v315_v55  ;;  %v573_v9 = vmul.f32 %v6327_v11, %v6403_v47  ;;  %v3220_v7 = vpop.eup %3219  ;;  %v6411_v16 = vpack.c.bf16 %v5112_v36, %v5032_v28  ;;  %v6414_v55 = vld [vmem:[#allocation14_spill] sm:$0xff] }
 0x121   :  { %1529 = vmatpush1.bf16.msra.mxu0 %v6410_v50  ;;  %v6412_v48 = vpack.c.bf16 %v5133_v43, %v5123_v44  ;;  %3239 = vtanh.f32 %v901_v38  ;;  %v915_v24 = vadd.f32 %v6413_v22, %v5389_v51  ;;  %v581_v49 = vmul.f32 %v6327_v11, %v6407_v13  ;;  %v6415_v33 = vld [vmem:[#allocation46_spill] sm:$0xff]  ;;  %v3222_v47 = vpop.eup %3221 }
 0x122   :  { %1642 = vmatpush1.bf16.msra.mxu1 %v6411_v16  ;;  %v5493_v15 = vadd.f32 %v6415_v33, %v6414_v55  ;;  %v6416_v28 = vpack.c.bf16 %v5174_v40, %v5166_v3  ;;  %v6417_v36 = vmov 0   ;;  %v1107_v44 = vpack.c.bf16 %v3220_v7, %v3218_v42  ;;  %v3224_v38 = vpop.eup %3223  ;;  %v6422_v42 = vld [vmem:[#allocation48_spill] sm:$0xff]  ;;  %v6430_v16 = vld [vmem:[#allocation43_spill] sm:$0xff]  ;;  %v6432_v33 = vld [vmem:[#allocation22_spill] sm:$0xff] }
 0x123   :  { %1530 = vmatprep.subr.bf16.mxu0 %v6412_v48  ;;  %1344 = vmatprep.mubr.bf16.mxu0 %v6417_v36  ;;  %3241 = vtanh.f32 %v5349_v46  ;;  %v909_v43 = vadd.f32 %v5089_v37, %v5393_v58  ;;  %v5502_v51 = vadd.f32 %v573_v9, %v309_v61  ;;  %v906_v40 = vadd.f32 %v5089_v37, %v5397_v59  ;;  %v6418_v46 = vld [vmem:[#allocation67_spill] sm:$0xff]  ;;  %v3226_v58 = vpop.eup %3225 }
 0x124   :  { %1643 = vmatprep.subr.bf16.mxu1 %v6416_v28  ;;  %1457 = vmatprep.mubr.bf16.mxu1 %v6417_v36  ;;  %3243 = vtanh.f32 %v898_v56  ;;  %v5512_v3 = vadd.f32 %v581_v49, %v317_v8  ;;  %v5516_v13 = vadd.f32 %v6419_v25, %v6418_v46  ;;  %v6420_v10 = vpack.c.bf16 %v5267_v53, %v5257_v60  ;;  %v6421_v61 = vld [vmem:[#allocation71_spill] sm:$0xff]  ;;  %v3228_v8 = vpop.eup %3227  ;;  %v6435_v25 = vld [vmem:[#allocation69_spill] sm:$0xff] }
 0x125   :  { %v1109_v0 = vpack.c.bf16 %v3224_v38, %v3222_v47  ;;  %3245 = vtanh.f32 %v5366_v14  ;;  %v914_v56 = vadd.f32 %v6413_v22, %v5401_v35  ;;  %v5526_v59 = vadd.f32 %v6422_v42, %v6421_v61  ;;  %v6425_v14 = vld [vmem:[#allocation21_spill] sm:$0xff]  ;;  %v6426_v35 = vld [vmem:[#allocation47_spill] sm:$0xff]  ;;  %v3230_v9 = vpop.eup %3229  ;;  %v6433_v47 = vld [vmem:[#allocation54_spill] sm:$0xff] }
 0x126   :  { %1531 = vmatpush1.bf16.msra.mxu0 %v6420_v10  ;;  %v6423_v27 = vpack.c.bf16 %v5283_v29, %v5275_v34  ;;  %v6424_v20 = vpack.c.bf16 %v5317_v30, %v5304_v57  ;;  %3247 = vtanh.f32 %v900_v17  ;;  %v917_v60 = vadd.f32 %v6413_v22, %v5412_v5  ;;  %v6427_v29 = vld [vmem:[#allocation77_spill] sm:$0xff]  ;;  %v3232_v5 = vpop.eup %3231  ;;  %v6429_v17 = vld [vmem:[#allocation8_spill] sm:$0xff]  ;;  %v6437_v61 = vld [vmem:[#allocation55_spill] sm:$0xff] }
 0x127   :  { %v908_v53 = vadd.f32 %v5089_v37, %v5429_v1  ;;  %v5540_v50 = vadd.f32 %v6426_v35, %v6425_v14  ;;  %v1106_v34 = vpack.c.bf16 %v3228_v8, %v3226_v58  ;;  %3249 = vtanh.f32 %v907_v63  ;;  %1345 = vmatmul.mubr.bf16.gmra.mrb[4].mxu0 %v5508_v52  ;;  %v6428_v37 = vld [vmem:[#allocation52_spill] sm:$0xff]  ;;  %v3234_v62 = vpop.eup %3233  ;;  %1458 = vmatmul.mubr.bf16.gmra.mrb[4].mxu1 %v5508_v52  ;;  %v6436_v58 = vld [vmem:[#allocation53_spill] sm:$0xff] }
 0x128   :  { %1644 = vmatpush1.bf16.msra.mxu1 %v6423_v27  ;;  %1532 = vmatprep.subr.bf16.mxu0 %v6424_v20  ;;  %v916_v30 = vadd.f32 %v6413_v22, %v5438_v32  ;;  %v323_v57 = vmul.f32 %v3955_v31, %v6427_v29  ;;  %3251 = vtanh.f32 %v915_v24  ;;  %v923_v1 = vadd.f32 %v6428_v37, %v699_v18  ;;  %v3236_v18 = vpop.eup %3235  ;;  %v6431_v24 = vld [vmem:[#allocation41_spill] sm:$0xff] }
 0x129   :  { %1645 = vmatprep.subr.bf16.mxu1 %v1101_v2  ;;  %v331_v7 = vmul.f32 %v3955_v31, %v6429_v17  ;;  %v587_v12 = vmul.f32 %v6306_v19, %v6430_v16  ;;  %v1108_v2 = vpack.c.bf16 %v3232_v5, %v3230_v9  ;;  %3253 = vtanh.f32 %v909_v43  ;;  %v3238_v39 = vpop.eup %3237  ;;  %1354 = vmatprep.mubr.bf16.mxu0 %v6417_v36  ;;  %v6438_v42 = vld [vmem:[#allocation57_spill] sm:$0xff] }
 0x12a   :  { %1533 = vmatpush1.bf16.msra.mxu0 %v1098_v21  ;;  %v595_v32 = vmul.f32 %v6306_v19, %v5202_v4  ;;  %v325_v63 = vmul.f32 %v3992_v45, %v6427_v29  ;;  %3255 = vtanh.f32 %v917_v60  ;;  %v333_v48 = vmul.f32 %v3992_v45, %v6429_v17  ;;  %1467 = vmatprep.mubr.bf16.mxu1 %v6417_v36  ;;  %v5574_v45 = vld [vmem:[%s6111_s3 + $0x10] sm:$0xff]   ;;  %v6440_v29 = vld [vmem:[#allocation63_spill] sm:$0xff] }
 0x12b   :  { %1534 = vmatprep.subr.bf16.mxu0 %v1107_v44  ;;  %v715_v31 = vadd.f32 %v587_v12, %v323_v57  ;;  %v589_v41 = vmul.f32 %v6327_v11, %v6430_v16  ;;  %v1115_v21 = vpack.c.bf16 %v3236_v18, %v3234_v62  ;;  %3257 = vtanh.f32 %v906_v40  ;;  %v6434_v40 = vld [vmem:[#allocation6_spill] sm:$0xff]  ;;  %v6439_v9 = vld [vmem:[#allocation17_spill] sm:$0xff] }
 0x12c   :  { %1646 = vmatpush1.bf16.msra.mxu1 %v1100_v23  ;;  %v723_v19 = vadd.f32 %v595_v32, %v331_v7  ;;  %v597_v22 = vmul.f32 %v6327_v11, %v5202_v4  ;;  %v3240_v23 = vpop.eup %3239  ;;  %3259 = vtanh.f32 %v914_v56  ;;  %v931_v49 = vadd.f32 %v6431_v24, %v5477_v54 }
 0x12d   :  { %1647 = vmatprep.subr.bf16.mxu1 %v1109_v0  ;;  %v717_v55 = vadd.f32 %v589_v41, %v325_v63  ;;  %v714_v28 = vadd.f32 %v6433_v47, %v6432_v33  ;;  %v3242_v44 = vpop.eup %3241  ;;  %v1117_v43 = vpack.c.bf16 %v3240_v23, %v3238_v39  ;;  %3261 = vtanh.f32 %v908_v53 }
 0x12e   :  { %1535 = vmatpush1.bf16.msra.mxu0 %v1106_v34  ;;  %v925_v11 = vadd.f32 %v6428_v37, %v5502_v51  ;;  %v725_v4 = vadd.f32 %v597_v22, %v333_v48  ;;  %v3244_v38 = vpop.eup %3243  ;;  %v332_v46 = vmul.f32 %v6434_v40, %v6429_v17  ;;  %3263 = vtanh.f32 %v916_v30 }
 0x12f   :  { %1536 = vmatprep.subr.bf16.mxu0 %v1115_v21  ;;  %v933_v54 = vadd.f32 %v6431_v24, %v5512_v3  ;;  %v722_v10 = vadd.f32 %v6436_v58, %v6435_v25  ;;  %v3246_v0 = vpop.eup %3245  ;;  %v1114_v56 = vpack.c.bf16 %v3244_v38, %v3242_v44  ;;  %3265 = vtanh.f32 %v923_v1  ;;  %1355 = vmatmul.mubr.bf16.gmra.mrb[8].mxu0 %v5574_v45  ;;  %v3030_v38 = vld [vmem:[%s6111_s3 + $0x28] sm:$0xff]  }
 0x130   :  { %1648 = vmatpush1.bf16.msra.mxu1 %v1108_v2  ;;  %v922_v51 = vadd.f32 %v6428_v37, %v5493_v15  ;;  %v716_v8 = vadd.f32 %v6438_v42, %v6437_v61  ;;  %v3248_v27 = vpop.eup %3247  ;;  %3267 = vtanh.f32 %v931_v49  ;;  %v930_v3 = vadd.f32 %v6431_v24, %v5516_v13  ;;  %1364 = vmatprep.mubr.bf16.mxu0 %v6417_v36 }
 0x131   :  { %1649 = vmatprep.subr.bf16.mxu1 %v1117_v43  ;;  %v724_v20 = vadd.f32 %v5405_v26, %v332_v46  ;;  %v3250_v60 = vpop.eup %3249  ;;  %1468 = vmatmul.mubr.bf16.gmra.mrb[8].mxu1 %v5574_v45  ;;  %v1116_v53 = vpack.c.bf16 %v3248_v27, %v3246_v0  ;;  %3269 = vtanh.f32 %v925_v11  ;;  %v924_v15 = vadd.f32 %v6428_v37, %v5526_v59  ;;  %v5607_v59 = vld [vmem:[%s6111_s3 + $0x18] sm:$0xff]  }
 0x132   :  { %1537 = vmatpush1.bf16.msra.mxu0 %v1114_v56  ;;  %v3252_v14 = vpop.eup %3251  ;;  %3271 = vtanh.f32 %v933_v54  ;;  %1477 = vmatprep.mubr.bf16.mxu1 %v6417_v36  ;;  %v932_v13 = vadd.f32 %v6431_v24, %v5540_v50  ;;  %v939_v34 = vadd.f32 %v6439_v9, %v715_v31  ;;  %v947_v57 = vadd.f32 %v6440_v29, %v723_v19  ;;  %v5623_v19 = vld [vmem:[%s6111_s3 + $0x20] sm:$0xff]   ;;  %v3031_v56 = vld [vmem:[%s6111_s3 + $0x30] sm:$0xff]  }
 0x133   :  { %v3254_v35 = vpop.eup %3253  ;;  %v1123_v26 = vpack.c.bf16 %v3252_v14, %v3250_v60  ;;  %3273 = vtanh.f32 %v922_v51  ;;  %v941_v50 = vadd.f32 %v6439_v9, %v717_v55  ;;  %v949_v17 = vadd.f32 %v6440_v29, %v725_v4  ;;  %v3032_v51 = vld [vmem:[%s6111_s3 + $0x38] sm:$0xff]  }
 0x134   :  { %1650 = vmatpush1.bf16.msra.mxu1 %v1116_v53  ;;  %v3256_v30 = vpop.eup %3255  ;;  %3275 = vtanh.f32 %v930_v3  ;;  %v938_v12 = vadd.f32 %v6439_v9, %v714_v28  ;;  %v946_v2 = vadd.f32 %v6440_v29, %v722_v10  ;;  %v940_v18 = vadd.f32 %v6439_v9, %v716_v8 }
 0x135   :  { %v3258_v5 = vpop.eup %3257  ;;  %1538 = vmatprep.subr.bf16.mxu0 %v1123_v26  ;;  %v1125_v37 = vpack.c.bf16 %v3256_v30, %v3254_v35  ;;  %3277 = vtanh.f32 %v924_v15  ;;  %v948_v48 = vadd.f32 %v6440_v29, %v724_v20 }
 0x136   :  { %v3260_v1 = vpop.eup %3259  ;;  %3279 = vtanh.f32 %v932_v13 }
 0x137   :  { %v3262_v7 = vpop.eup %3261  ;;  %1651 = vmatprep.subr.bf16.mxu1 %v1125_v37  ;;  %v1122_v16 = vpack.c.bf16 %v3260_v1, %v3258_v5  ;;  %3281 = vtanh.f32 %v939_v34  ;;  %1365 = vmatmul.mubr.bf16.gmra.mrb[12].mxu0 %v5607_v59 }
 0x138   :  { %v3264_v62 = vpop.eup %3263  ;;  %3283 = vtanh.f32 %v947_v57  ;;  %1374 = vmatprep.mubr.bf16.mxu0 %v6417_v36 }
 0x139   :  { %v3266_v32 = vpop.eup %3265  ;;  %1539 = vmatpush1.bf16.msra.mxu0 %v1122_v16  ;;  %v1124_v63 = vpack.c.bf16 %v3264_v62, %v3262_v7  ;;  %1478 = vmatmul.mubr.bf16.gmra.mrb[12].mxu1 %v5607_v59  ;;  %3285 = vtanh.f32 %v941_v50 }
 0x13a   :  { %v3268_v31 = vpop.eup %3267  ;;  %3287 = vtanh.f32 %v949_v17  ;;  %1487 = vmatprep.mubr.bf16.mxu1 %v6417_v36 }
 0x13b   :  { %v3270_v41 = vpop.eup %3269  ;;  %1652 = vmatpush1.bf16.msra.mxu1 %v1124_v63  ;;  %v1131_v39 = vpack.c.bf16 %v3268_v31, %v3266_v32  ;;  %3289 = vtanh.f32 %v938_v12 }
 0x13c   :  { %v3272_v21 = vpop.eup %3271  ;;  %3291 = vtanh.f32 %v946_v2 }
 0x13d   :  { %v3274_v22 = vpop.eup %3273  ;;  %1540 = vmatprep.subr.bf16.mxu0 %v1131_v39  ;;  %v1133_v23 = vpack.c.bf16 %v3272_v21, %v3270_v41  ;;  %3293 = vtanh.f32 %v940_v18 }
 0x13e   :  { %v3276_v24 = vpop.eup %3275  ;;  %3295 = vtanh.f32 %v948_v48 }
 0x13f   :  { %v3278_v49 = vpop.eup %3277  ;;  %1653 = vmatprep.subr.bf16.mxu1 %v1133_v23  ;;  %v1130_v55 = vpack.c.bf16 %v3276_v24, %v3274_v22  ;;  %1375 = vmatmul.mubr.bf16.gmra.mrb[16].mxu0 %v5623_v19 }
 0x140   :  { %v3280_v33 = vpop.eup %3279  ;;  %1384 = vmatprep.mubr.bf16.mxu0 %v6417_v36 }
 0x141   :  { %v3282_v47 = vpop.eup %3281  ;;  %1541 = vmatpush1.bf16.msra.mxu0 %v1130_v55  ;;  %v1132_v28 = vpack.c.bf16 %v3280_v33, %v3278_v49  ;;  %1488 = vmatmul.mubr.bf16.gmra.mrb[16].mxu1 %v5623_v19 }
 0x142   :  { %v3284_v44 = vpop.eup %3283  ;;  %1497 = vmatprep.mubr.bf16.mxu1 %v6417_v36 }
 0x143   :  { %v3286_v43 = vpop.eup %3285  ;;  %1654 = vmatpush1.bf16.msra.mxu1 %v1132_v28  ;;  %v1139_v11 = vpack.c.bf16 %v3284_v44, %v3282_v47 }
 0x144   :  { %v3288_v4 = vpop.eup %3287 }
 0x145   :  { %v3290_v40 = vpop.eup %3289  ;;  %1542 = vmatprep.subr.bf16.mxu0 %v1139_v11  ;;  %v1141_v46 = vpack.c.bf16 %v3288_v4, %v3286_v43 }
 0x146   :  { %v3292_v54 = vpop.eup %3291 }
 0x147   :  { %v3294_v25 = vpop.eup %3293  ;;  %1655 = vmatprep.subr.bf16.mxu1 %v1141_v46  ;;  %v1138_v58 = vpack.c.bf16 %v3292_v54, %v3290_v40  ;;  %1385 = vmatmul.mubr.bf16.gmra.mrb[20].mxu0 %v3030_v38 }
 0x148   :  { %v3296_v10 = vpop.eup %3295  ;;  %1394 = vmatprep.mubr.bf16.mxu0 %v6417_v36 }
 0x149   :  { %1543 = vmatpush1.bf16.msra.mxu0 %v1138_v58  ;;  %v1140_v0 = vpack.c.bf16 %v3296_v10, %v3294_v25  ;;  %1498 = vmatmul.mubr.bf16.gmra.mrb[20].mxu1 %v3030_v38 }
 0x14a   :  { %1507 = vmatprep.mubr.bf16.mxu1 %v6417_v36 }
 0x14b   :  { %1656 = vmatpush1.bf16.msra.mxu1 %v1140_v0 }
 0x14f   :  { %1395 = vmatmul.mubr.bf16.gmra.mrb[24].mxu0 %v3031_v56 }
 0x150   :  { %1404 = vmatprep.mubr.bf16.mxu0 %v6417_v36 }
 0x151   :  { %1508 = vmatmul.mubr.bf16.gmra.mrb[24].mxu1 %v3031_v56 }
 0x152   :  { %1517 = vmatprep.mubr.bf16.mxu1 %v6417_v36 }
 0x157   :  { %1405 = vmatmul.mubr.bf16.gmra.mrb[28].mxu0 %v3032_v51 }
 0x158   :  { %1560 = vmatprep.mubr.bf16.mxu0 %v6417_v36 }
 0x159   :  { %1518 = vmatmul.mubr.bf16.gmra.mrb[28].mxu1 %v3032_v51 }
 0x15a   :  { %1673 = vmatprep.mubr.bf16.mxu1 %v6417_v36 }
 0x15f   :  { %1561 = vmatmul.mubr.bf16.vlgmr.msra.gmra.mrb[32].mxu0 %v5423_v6 }
 0x160   :  { %1570 = vmatprep.mubr.bf16.mxu0 %v6417_v36 }
 0x161   :  { %1674 = vmatmul.mubr.bf16.vlgmr.msra.gmra.mrb[32].mxu1 %v5423_v6  ;;  %v5670_v6 = vpop.permute.xlu0 %1176 }
 0x162   :  { %1683 = vmatprep.mubr.bf16.mxu1 %v6417_v36 }
 0x165   :  { %v5682_v30 = vpop.permute.xlu0 %1186 }
 0x167   :  { %1571 = vmatmul.mubr.bf16.gmra.mrb[36].mxu0 %v5508_v52 }
 0x168   :  { %1580 = vmatprep.mubr.bf16.mxu0 %v6417_v36 }
 0x169   :  { %1684 = vmatmul.mubr.bf16.gmra.mrb[36].mxu1 %v5508_v52  ;;  %v5672_v52 = vpop.permute.xlu1 %1181  ;;  %v5694_v21 = vpop.permute.xlu0 %1196 }
 0x16a   :  { %1693 = vmatprep.mubr.bf16.mxu1 %v6417_v36 }
 0x16f   :  { %1581 = vmatmul.mubr.bf16.gmra.mrb[40].mxu0 %v5574_v45 }
 0x170   :  { %1590 = vmatprep.mubr.bf16.mxu0 %v6417_v36 }
 0x171   :  { %1694 = vmatmul.mubr.bf16.gmra.mrb[40].mxu1 %v5574_v45 }
 0x172   :  { %1703 = vmatprep.mubr.bf16.mxu1 %v6417_v36 }
 0x177   :  { %1591 = vmatmul.mubr.bf16.gmra.mrb[44].mxu0 %v5607_v59 }
 0x178   :  { %1600 = vmatprep.mubr.bf16.mxu0 %v6417_v36 }
 0x179   :  { %1704 = vmatmul.mubr.bf16.gmra.mrb[44].mxu1 %v5607_v59  ;;  %v5684_v59 = vpop.permute.xlu1 %1191 }
 0x17a   :  { %1713 = vmatprep.mubr.bf16.mxu1 %v6417_v36 }
 0x17d   :  { %v5696_v22 = vpop.permute.xlu1 %1201 }
 0x17f   :  { %1601 = vmatmul.mubr.bf16.gmra.mrb[48].mxu0 %v5623_v19 }
 0x180   :  { %1610 = vmatprep.mubr.bf16.mxu0 %v6417_v36 }
 0x181   :  { %1714 = vmatmul.mubr.bf16.gmra.mrb[48].mxu1 %v5623_v19 }
 0x182   :  { %1723 = vmatprep.mubr.bf16.mxu1 %v6417_v36 }
 0x187   :  { %1611 = vmatmul.mubr.bf16.gmra.mrb[52].mxu0 %v3030_v38 }
 0x188   :  { %1620 = vmatprep.mubr.bf16.mxu0 %v6417_v36 }
 0x189   :  { %1724 = vmatmul.mubr.bf16.gmra.mrb[52].mxu1 %v3030_v38 }
 0x18a   :  { %1733 = vmatprep.mubr.bf16.mxu1 %v6417_v36 }
 0x18f   :  { %1621 = vmatmul.mubr.bf16.gmra.mrb[56].mxu0 %v3031_v56 }
 0x190   :  { %1630 = vmatprep.mubr.bf16.mxu0 %v6417_v36 }
 0x191   :  { %1734 = vmatmul.mubr.bf16.gmra.mrb[56].mxu1 %v3031_v56 }
 0x192   :  { %1743 = vmatprep.mubr.bf16.mxu1 %v6417_v36 }
 0x197   :  { %1631 = vmatmul.mubr.bf16.gmra.mrb[60].mxu0 %v3032_v51 }
 0x198   :  { %2138 = vmatprep.mubr.bf16.mxu0 %v6417_v36 }
 0x199   :  { %1744 = vmatmul.mubr.bf16.gmra.mrb[60].mxu1 %v3032_v51 }
 0x19a   :  { %2251 = vmatprep.mubr.bf16.mxu1 %v6417_v36 }
 0x1f1   :  { %v1336_v45 = vpop.f32.mrb[0].mxu0 }
 0x1f2   :  { %v1337_v61 = vadd.f32 %v1336_v45, %v5670_v6  ;;  %v1449_v42 = vpop.f32.mrb[0].mxu1  ;;  %v1338_v8 = vpop.f32.mrb[1].mxu0 }
 0x1f3   :  { %v1450_v27 = vadd.f32 %v1449_v42, %v5670_v6  ;;  %v1339_v3 = vadd.f32 %v1338_v8, %v5670_v6  ;;  %v1451_v20 = vpop.f32.mrb[1].mxu1  ;;  %v1340_v60 = vpop.f32.mrb[2].mxu0 }
 0x1f4   :  { %3297 = vtanh.f32 %v1337_v61  ;;  %v1452_v53 = vadd.f32 %v1451_v20, %v5670_v6  ;;  %v1341_v15 = vadd.f32 %v1340_v60, %v5672_v52  ;;  %v1453_v14 = vpop.f32.mrb[2].mxu1  ;;  %v1342_v13 = vpop.f32.mrb[3].mxu0 }
 0x1f5   :  { %3299 = vtanh.f32 %v1450_v27  ;;  %v1454_v35 = vadd.f32 %v1453_v14, %v5672_v52  ;;  %v1455_v26 = vpop.f32.mrb[3].mxu1  ;;  %v1343_v9 = vadd.f32 %v1342_v13, %v5672_v52  ;;  %v5706_v20 = vpop.permute.xlu0 %1206 }
 0x1f6   :  { %3301 = vtanh.f32 %v1339_v3  ;;  %v1456_v34 = vadd.f32 %v1455_v26, %v5672_v52 }
 0x1f7   :  { %3303 = vtanh.f32 %v1452_v53  ;;  %v5708_v53 = vpop.permute.xlu1 %1211 }
 0x1f8   :  { %3305 = vtanh.f32 %v1341_v15 }
 0x1f9   :  { %3307 = vtanh.f32 %v1454_v35 }
 0x1fa   :  { %v1346_v29 = vpop.f32.mrb[4].mxu0  ;;  %3309 = vtanh.f32 %v1343_v9  ;;  %v1459_v5 = vpop.f32.mrb[4].mxu1 }
 0x1fb   :  { %v1347_v57 = vadd.f32 %v1346_v29, %v5682_v30  ;;  %v1348_v37 = vpop.f32.mrb[5].mxu0  ;;  %3311 = vtanh.f32 %v1456_v34  ;;  %v1460_v50 = vadd.f32 %v1459_v5, %v5682_v30  ;;  %v1461_v17 = vpop.f32.mrb[5].mxu1 }
 0x1fc   :  { %v1349_v1 = vadd.f32 %v1348_v37, %v5682_v30  ;;  %v1350_v7 = vpop.f32.mrb[6].mxu0  ;;  %v1462_v16 = vadd.f32 %v1461_v17, %v5682_v30  ;;  %v1463_v62 = vpop.f32.mrb[6].mxu1 }
 0x1fd   :  { %3313 = vtanh.f32 %v1347_v57  ;;  %v1351_v12 = vadd.f32 %v1350_v7, %v5684_v59  ;;  %v1352_v2 = vpop.f32.mrb[7].mxu0  ;;  %v1464_v32 = vadd.f32 %v1463_v62, %v5684_v59  ;;  %v1465_v63 = vpop.f32.mrb[7].mxu1 }
 0x1fe   :  { %3315 = vtanh.f32 %v1460_v50  ;;  %v3298_v18 = vpop.eup %3297  ;;  %v1353_v31 = vadd.f32 %v1352_v2, %v5684_v59  ;;  %v1466_v41 = vadd.f32 %v1465_v63, %v5684_v59 }
 0x1ff   :  { %3317 = vtanh.f32 %v1349_v1  ;;  %v3300_v48 = vpop.eup %3299 }
 0x200   :  { %3319 = vtanh.f32 %v1462_v16  ;;  %v3302_v39 = vpop.eup %3301 }
 0x201   :  { %3321 = vtanh.f32 %v1351_v12  ;;  %v3304_v19 = vpop.eup %3303 }
 0x202   :  { %3323 = vtanh.f32 %v1464_v32  ;;  %v1356_v23 = vpop.f32.mrb[8].mxu0  ;;  %v3306_v24 = vpop.eup %3305 }
 0x203   :  { %3325 = vtanh.f32 %v1353_v31  ;;  %v1357_v49 = vadd.f32 %v1356_v23, %v5694_v21  ;;  %v1358_v33 = vpop.f32.mrb[9].mxu0  ;;  %v3308_v47 = vpop.eup %3307  ;;  %v1882_v4 = vpack.c.bf16 %v3306_v24, %v3298_v18 }
 0x204   :  { %v1469_v55 = vpop.f32.mrb[8].mxu1  ;;  %3327 = vtanh.f32 %v1466_v41  ;;  %v1359_v44 = vadd.f32 %v1358_v33, %v5694_v21  ;;  %v1360_v11 = vpop.f32.mrb[10].mxu0  ;;  %v1884_v58 = vpack.c.bf16 %v3308_v47, %v3300_v48 }
 0x205   :  { %v1470_v28 = vadd.f32 %v1469_v55, %v5694_v21  ;;  %v1471_v43 = vpop.f32.mrb[9].mxu1  ;;  %v3310_v38 = vpop.eup %3309  ;;  %3329 = vtanh.f32 %v1357_v49  ;;  %v1361_v46 = vadd.f32 %v1360_v11, %v5696_v22 }
 0x206   :  { %v1472_v40 = vadd.f32 %v1471_v43, %v5694_v21  ;;  %v1473_v54 = vpop.f32.mrb[10].mxu1  ;;  %v1362_v25 = vpop.f32.mrb[11].mxu0  ;;  %v1883_v51 = vpack.c.bf16 %v3310_v38, %v3302_v39 }
 0x207   :  { %v3312_v10 = vpop.eup %3311  ;;  %3331 = vtanh.f32 %v1470_v28  ;;  %v1474_v0 = vadd.f32 %v1473_v54, %v5696_v22  ;;  %v1475_v56 = vpop.f32.mrb[11].mxu1  ;;  %v1363_v61 = vadd.f32 %v1362_v25, %v5696_v22 }
 0x208   :  { %v3314_v45 = vpop.eup %3313  ;;  %3333 = vtanh.f32 %v1359_v44  ;;  %v1885_v42 = vpack.c.bf16 %v3312_v10, %v3304_v19  ;;  %v1476_v27 = vadd.f32 %v1475_v56, %v5696_v22  ;;  %2106 = vmatprep.subr.bf16.mxu0 %v1883_v51  ;;  %v5718_v23 = vpop.permute.xlu0 %1216 }
 0x209   :  { %v3316_v8 = vpop.eup %3315  ;;  %3335 = vtanh.f32 %v1472_v40  ;;  %2107 = vmatpush1.bf16.msra.mxu0 %v1882_v4  ;;  %v5720_v49 = vpop.permute.xlu1 %1221 }
 0x20a   :  { %v3318_v3 = vpop.eup %3317  ;;  %3337 = vtanh.f32 %v1361_v46  ;;  %2219 = vmatprep.subr.bf16.mxu1 %v1885_v42  ;;  %v1366_v15 = vpop.f32.mrb[12].mxu0 }
 0x20b   :  { %v3320_v60 = vpop.eup %3319  ;;  %3339 = vtanh.f32 %v1474_v0  ;;  %2220 = vmatpush1.bf16.msra.mxu1 %v1884_v58  ;;  %v1367_v13 = vadd.f32 %v1366_v15, %v5706_v20  ;;  %v1368_v26 = vpop.f32.mrb[13].mxu0 }
 0x20c   :  { %v3322_v14 = vpop.eup %3321  ;;  %3341 = vtanh.f32 %v1363_v61  ;;  %v1479_v35 = vpop.f32.mrb[12].mxu1  ;;  %v1369_v29 = vadd.f32 %v1368_v26, %v5706_v20 }
 0x20d   :  { %v3324_v9 = vpop.eup %3323  ;;  %3343 = vtanh.f32 %v1476_v27  ;;  %v1480_v34 = vadd.f32 %v1479_v35, %v5706_v20  ;;  %v1481_v57 = vpop.f32.mrb[13].mxu1  ;;  %v1890_v37 = vpack.c.bf16 %v3322_v14, %v3314_v45 }
 0x20e   :  { %v1370_v5 = vpop.f32.mrb[14].mxu0  ;;  %v3326_v50 = vpop.eup %3325  ;;  %3345 = vtanh.f32 %v1367_v13  ;;  %v1482_v1 = vadd.f32 %v1481_v57, %v5706_v20  ;;  %v1892_v12 = vpack.c.bf16 %v3324_v9, %v3316_v8 }
 0x20f   :  { %v1371_v17 = vadd.f32 %v1370_v5, %v5708_v53  ;;  %v1483_v7 = vpop.f32.mrb[14].mxu1  ;;  %v1372_v16 = vpop.f32.mrb[15].mxu0  ;;  %3347 = vtanh.f32 %v1480_v34  ;;  %v1891_v63 = vpack.c.bf16 %v3326_v50, %v3318_v3 }
 0x210   :  { %v3328_v62 = vpop.eup %3327  ;;  %v1484_v2 = vadd.f32 %v1483_v7, %v5708_v53  ;;  %v1485_v32 = vpop.f32.mrb[15].mxu1  ;;  %3349 = vtanh.f32 %v1369_v29  ;;  %v1373_v31 = vadd.f32 %v1372_v16, %v5708_v53 }
 0x211   :  { %v3330_v18 = vpop.eup %3329  ;;  %v1893_v48 = vpack.c.bf16 %v3328_v62, %v3320_v60  ;;  %3351 = vtanh.f32 %v1482_v1  ;;  %v1486_v39 = vadd.f32 %v1485_v32, %v5708_v53  ;;  %2108 = vmatprep.subr.bf16.mxu0 %v1891_v63  ;;  %v5730_v13 = vpop.permute.xlu0 %1226 }
 0x212   :  { %v3332_v41 = vpop.eup %3331  ;;  %3353 = vtanh.f32 %v1371_v17  ;;  %2109 = vmatpush1.bf16.msra.mxu0 %v1890_v37  ;;  %v1376_v55 = vpop.f32.mrb[16].mxu0 }
 0x213   :  { %v3334_v19 = vpop.eup %3333  ;;  %2221 = vmatprep.subr.bf16.mxu1 %v1893_v48  ;;  %3355 = vtanh.f32 %v1484_v2  ;;  %v1377_v47 = vadd.f32 %v1376_v55, %v5718_v23  ;;  %v1378_v44 = vpop.f32.mrb[17].mxu0 }
 0x214   :  { %v3336_v24 = vpop.eup %3335  ;;  %2222 = vmatpush1.bf16.msra.mxu1 %v1892_v12  ;;  %3357 = vtanh.f32 %v1373_v31  ;;  %v1489_v28 = vpop.f32.mrb[16].mxu1  ;;  %v1379_v4 = vadd.f32 %v1378_v44, %v5718_v23 }
 0x215   :  { %v3338_v33 = vpop.eup %3337  ;;  %3359 = vtanh.f32 %v1486_v39  ;;  %v1490_v11 = vadd.f32 %v1489_v28, %v5718_v23  ;;  %v1491_v38 = vpop.f32.mrb[17].mxu1 }
 0x216   :  { %v3340_v43 = vpop.eup %3339  ;;  %v1380_v40 = vpop.f32.mrb[18].mxu0  ;;  %v1898_v46 = vpack.c.bf16 %v3338_v33, %v3330_v18  ;;  %3361 = vtanh.f32 %v1377_v47  ;;  %v1492_v25 = vadd.f32 %v1491_v38, %v5718_v23 }
 0x217   :  { %v3342_v54 = vpop.eup %3341  ;;  %v1381_v58 = vadd.f32 %v1380_v40, %v5720_v49  ;;  %v1493_v10 = vpop.f32.mrb[18].mxu1  ;;  %v1900_v56 = vpack.c.bf16 %v3340_v43, %v3332_v41  ;;  %3363 = vtanh.f32 %v1490_v11 }
 0x218   :  { %v1382_v0 = vpop.f32.mrb[19].mxu0  ;;  %v3344_v51 = vpop.eup %3343  ;;  %v1494_v45 = vadd.f32 %v1493_v10, %v5720_v49  ;;  %v1899_v42 = vpack.c.bf16 %v3342_v54, %v3334_v19  ;;  %3365 = vtanh.f32 %v1379_v4 }
 0x219   :  { %v1495_v61 = vpop.f32.mrb[19].mxu1  ;;  %v3346_v8 = vpop.eup %3345  ;;  %v1383_v27 = vadd.f32 %v1382_v0, %v5720_v49  ;;  %v1901_v3 = vpack.c.bf16 %v3344_v51, %v3336_v24  ;;  %3367 = vtanh.f32 %v1492_v25 }
 0x21a   :  { %v3348_v60 = vpop.eup %3347  ;;  %v1496_v15 = vadd.f32 %v1495_v61, %v5720_v49  ;;  %2110 = vmatprep.subr.bf16.mxu0 %v1899_v42  ;;  %3369 = vtanh.f32 %v1381_v58  ;;  %v5732_v26 = vpop.permute.xlu1 %1231 }
 0x21b   :  { %v3350_v14 = vpop.eup %3349  ;;  %2223 = vmatprep.subr.bf16.mxu1 %v1901_v3  ;;  %2111 = vmatpush1.bf16.msra.mxu0 %v1898_v46  ;;  %3371 = vtanh.f32 %v1494_v45  ;;  %v1386_v9 = vpop.f32.mrb[20].mxu0 }
 0x21c   :  { %v3352_v35 = vpop.eup %3351  ;;  %2224 = vmatpush1.bf16.msra.mxu1 %v1900_v56  ;;  %3373 = vtanh.f32 %v1383_v27  ;;  %v1387_v29 = vadd.f32 %v1386_v9, %v5730_v13  ;;  %v1499_v57 = vpop.f32.mrb[20].mxu1 }
 0x21d   :  { %v3354_v34 = vpop.eup %3353  ;;  %v1388_v5 = vpop.f32.mrb[21].mxu0  ;;  %3375 = vtanh.f32 %v1496_v15  ;;  %v1500_v50 = vadd.f32 %v1499_v57, %v5730_v13 }
 0x21e   :  { %v3356_v37 = vpop.eup %3355  ;;  %v1389_v1 = vadd.f32 %v1388_v5, %v5730_v13  ;;  %v1501_v17 = vpop.f32.mrb[21].mxu1  ;;  %v1906_v16 = vpack.c.bf16 %v3354_v34, %v3346_v8  ;;  %3377 = vtanh.f32 %v1387_v29 }
 0x21f   :  { %v1390_v7 = vpop.f32.mrb[22].mxu0  ;;  %v3358_v12 = vpop.eup %3357  ;;  %v1502_v62 = vadd.f32 %v1501_v17, %v5730_v13  ;;  %v1908_v18 = vpack.c.bf16 %v3356_v37, %v3348_v60  ;;  %3379 = vtanh.f32 %v1500_v50 }
 0x220   :  { %v1391_v2 = vadd.f32 %v1390_v7, %v5732_v26  ;;  %v1503_v32 = vpop.f32.mrb[22].mxu1  ;;  %v1392_v63 = vpop.f32.mrb[23].mxu0  ;;  %v1907_v39 = vpack.c.bf16 %v3358_v12, %v3350_v14  ;;  %3381 = vtanh.f32 %v1389_v1 }
 0x221   :  { %v3360_v31 = vpop.eup %3359  ;;  %v1504_v48 = vadd.f32 %v1503_v32, %v5732_v26  ;;  %v1505_v41 = vpop.f32.mrb[23].mxu1  ;;  %v1393_v24 = vadd.f32 %v1392_v63, %v5732_v26  ;;  %3383 = vtanh.f32 %v1502_v62 }
 0x222   :  { %v3362_v19 = vpop.eup %3361  ;;  %v1909_v55 = vpack.c.bf16 %v3360_v31, %v3352_v35  ;;  %v1506_v47 = vadd.f32 %v1505_v41, %v5732_v26  ;;  %2112 = vmatprep.subr.bf16.mxu0 %v1907_v39  ;;  %v5742_v44 = vpop.permute.xlu0 %1236  ;;  %3385 = vtanh.f32 %v1391_v2 }
 0x223   :  { %v3364_v33 = vpop.eup %3363  ;;  %2113 = vmatpush1.bf16.msra.mxu0 %v1906_v16  ;;  %v5744_v11 = vpop.permute.xlu1 %1241  ;;  %3387 = vtanh.f32 %v1504_v48 }
 0x224   :  { %v3366_v28 = vpop.eup %3365  ;;  %2225 = vmatprep.subr.bf16.mxu1 %v1909_v55  ;;  %v1396_v4 = vpop.f32.mrb[24].mxu0  ;;  %3389 = vtanh.f32 %v1393_v24 }
 0x225   :  { %v3368_v43 = vpop.eup %3367  ;;  %2226 = vmatpush1.bf16.msra.mxu1 %v1908_v18  ;;  %v1397_v40 = vadd.f32 %v1396_v4, %v5742_v44  ;;  %v1509_v46 = vpop.f32.mrb[24].mxu1  ;;  %3391 = vtanh.f32 %v1506_v47 }
 0x226   :  { %v3370_v38 = vpop.eup %3369  ;;  %v1398_v54 = vpop.f32.mrb[25].mxu0  ;;  %v1510_v58 = vadd.f32 %v1509_v46, %v5742_v44 }
 0x227   :  { %v3372_v25 = vpop.eup %3371  ;;  %v1399_v10 = vadd.f32 %v1398_v54, %v5742_v44  ;;  %v1511_v0 = vpop.f32.mrb[25].mxu1  ;;  %v1914_v51 = vpack.c.bf16 %v3370_v38, %v3362_v19  ;;  %3393 = vtanh.f32 %v1397_v40 }
 0x228   :  { %v1400_v56 = vpop.f32.mrb[26].mxu0  ;;  %v3374_v45 = vpop.eup %3373  ;;  %v1512_v61 = vadd.f32 %v1511_v0, %v5742_v44  ;;  %v1916_v3 = vpack.c.bf16 %v3372_v25, %v3364_v33  ;;  %3395 = vtanh.f32 %v1510_v58 }
 0x229   :  { %v1401_v42 = vadd.f32 %v1400_v56, %v5744_v11  ;;  %v1513_v8 = vpop.f32.mrb[26].mxu1  ;;  %v1402_v27 = vpop.f32.mrb[27].mxu0  ;;  %v1915_v35 = vpack.c.bf16 %v3374_v45, %v3366_v28  ;;  %3397 = vtanh.f32 %v1399_v10 }
 0x22a   :  { %v3376_v60 = vpop.eup %3375  ;;  %v1514_v15 = vadd.f32 %v1513_v8, %v5744_v11  ;;  %v1515_v14 = vpop.f32.mrb[27].mxu1  ;;  %v1403_v34 = vadd.f32 %v1402_v27, %v5744_v11  ;;  %3399 = vtanh.f32 %v1512_v61 }
 0x22b   :  { %v3378_v9 = vpop.eup %3377  ;;  %v1917_v29 = vpack.c.bf16 %v3376_v60, %v3368_v43  ;;  %v1516_v5 = vadd.f32 %v1515_v14, %v5744_v11  ;;  %2114 = vmatprep.subr.bf16.mxu0 %v1915_v35  ;;  %v5754_v50 = vpop.permute.xlu0 %1246  ;;  %3401 = vtanh.f32 %v1401_v42 }
 0x22c   :  { %v3380_v57 = vpop.eup %3379  ;;  %2115 = vmatpush1.bf16.msra.mxu0 %v1914_v51  ;;  %v5756_v17 = vpop.permute.xlu1 %1251  ;;  %3403 = vtanh.f32 %v1514_v15 }
 0x22d   :  { %v3382_v37 = vpop.eup %3381  ;;  %2227 = vmatprep.subr.bf16.mxu1 %v1917_v29  ;;  %v1406_v7 = vpop.f32.mrb[28].mxu0  ;;  %3405 = vtanh.f32 %v1403_v34 }
 0x22e   :  { %v3384_v1 = vpop.eup %3383  ;;  %2228 = vmatpush1.bf16.msra.mxu1 %v1916_v3  ;;  %v1407_v12 = vadd.f32 %v1406_v7, %v5754_v50  ;;  %v1519_v62 = vpop.f32.mrb[28].mxu1  ;;  %3407 = vtanh.f32 %v1516_v5 }
 0x22f   :  { %v3386_v16 = vpop.eup %3385  ;;  %v1408_v2 = vpop.f32.mrb[29].mxu0  ;;  %v1520_v63 = vadd.f32 %v1519_v62, %v5754_v50 }
 0x230   :  { %v3388_v32 = vpop.eup %3387  ;;  %v1409_v18 = vadd.f32 %v1408_v2, %v5754_v50  ;;  %v1521_v31 = vpop.f32.mrb[29].mxu1  ;;  %v1922_v41 = vpack.c.bf16 %v3386_v16, %v3378_v9  ;;  %3409 = vtanh.f32 %v1407_v12 }
 0x231   :  { %v1410_v48 = vpop.f32.mrb[30].mxu0  ;;  %v3390_v39 = vpop.eup %3389  ;;  %v1522_v19 = vadd.f32 %v1521_v31, %v5754_v50  ;;  %v1924_v47 = vpack.c.bf16 %v3388_v32, %v3380_v57  ;;  %3411 = vtanh.f32 %v1520_v63 }
 0x232   :  { %v1411_v24 = vadd.f32 %v1410_v48, %v5756_v17  ;;  %v1523_v55 = vpop.f32.mrb[30].mxu1  ;;  %v1412_v33 = vpop.f32.mrb[31].mxu0  ;;  %v1923_v38 = vpack.c.bf16 %v3390_v39, %v3382_v37  ;;  %3413 = vtanh.f32 %v1409_v18 }
 0x233   :  { %v3392_v28 = vpop.eup %3391  ;;  %v1524_v43 = vadd.f32 %v1523_v55, %v5756_v17  ;;  %v1525_v4 = vpop.f32.mrb[31].mxu1  ;;  %v1413_v46 = vadd.f32 %v1412_v33, %v5756_v17  ;;  %3415 = vtanh.f32 %v1522_v19 }
 0x234   :  { %v3394_v40 = vpop.eup %3393  ;;  %v1925_v54 = vpack.c.bf16 %v3392_v28, %v3384_v1  ;;  %v1526_v58 = vadd.f32 %v1525_v4, %v5756_v17  ;;  %2116 = vmatprep.subr.bf16.mxu0 %v1923_v38  ;;  %3417 = vtanh.f32 %v1411_v24  ;;  %v1562_v56 = vpop.f32.mrb[32].mxu0 }
 0x235   :  { %v3396_v25 = vpop.eup %3395  ;;  %2117 = vmatpush1.bf16.msra.mxu0 %v1922_v41  ;;  %3419 = vtanh.f32 %v1524_v43  ;;  %v1563_v45 = vadd.f32 %v1562_v56, %v5670_v6  ;;  %v1675_v61 = vpop.f32.mrb[32].mxu1 }
 0x236   :  { %v3398_v10 = vpop.eup %3397  ;;  %2229 = vmatprep.subr.bf16.mxu1 %v1925_v54  ;;  %3421 = vtanh.f32 %v1413_v46  ;;  %v1564_v42 = vpop.f32.mrb[33].mxu0  ;;  %v1676_v27 = vadd.f32 %v1675_v61, %v5670_v6 }
 0x237   :  { %v3400_v0 = vpop.eup %3399  ;;  %2230 = vmatpush1.bf16.msra.mxu1 %v1924_v47  ;;  %3423 = vtanh.f32 %v1526_v58  ;;  %v1565_v3 = vadd.f32 %v1564_v42, %v5670_v6  ;;  %v1677_v60 = vpop.f32.mrb[33].mxu1  ;;  %v5785_v42 = vld [vmem:[%s6112_s5] sm:$0xff]  }
 0x238   :  { %v3402_v51 = vpop.eup %3401  ;;  %v1566_v15 = vpop.f32.mrb[34].mxu0  ;;  %3425 = vtanh.f32 %v1563_v45  ;;  %v1678_v9 = vadd.f32 %v1677_v60, %v5670_v6 }
 0x239   :  { %v3404_v8 = vpop.eup %3403  ;;  %v1930_v14 = vpack.c.bf16 %v3402_v51, %v3394_v40  ;;  %v1567_v34 = vadd.f32 %v1566_v15, %v5672_v52  ;;  %v1679_v29 = vpop.f32.mrb[34].mxu1  ;;  %3427 = vtanh.f32 %v1676_v27 }
 0x23a   :  { %v3406_v35 = vpop.eup %3405  ;;  %v1568_v57 = vpop.f32.mrb[35].mxu0  ;;  %v1932_v5 = vpack.c.bf16 %v3404_v8, %v3396_v25  ;;  %v1680_v1 = vadd.f32 %v1679_v29, %v5672_v52  ;;  %3429 = vtanh.f32 %v1565_v3 }
 0x23b   :  { %v3408_v37 = vpop.eup %3407  ;;  %v1681_v7 = vpop.f32.mrb[35].mxu1  ;;  %v1931_v16 = vpack.c.bf16 %v3406_v35, %v3398_v10  ;;  %v1569_v62 = vadd.f32 %v1568_v57, %v5672_v52  ;;  %3431 = vtanh.f32 %v1678_v9 }
 0x23c   :  { %v3410_v12 = vpop.eup %3409  ;;  %v1933_v2 = vpack.c.bf16 %v3408_v37, %v3400_v0  ;;  %v1682_v6 = vadd.f32 %v1681_v7, %v5672_v52  ;;  %3433 = vtanh.f32 %v1567_v34  ;;  %v1572_v31 = vpop.f32.mrb[36].mxu0 }
 0x23d   :  { %v3412_v32 = vpop.eup %3411  ;;  %2118 = vmatprep.subr.bf16.mxu0 %v1931_v16  ;;  %3435 = vtanh.f32 %v1680_v1  ;;  %v1573_v41 = vadd.f32 %v1572_v31, %v5682_v30  ;;  %v1685_v39 = vpop.f32.mrb[36].mxu1 }
 0x23e   :  { %v3414_v63 = vpop.eup %3413  ;;  %2231 = vmatprep.subr.bf16.mxu1 %v1933_v2  ;;  %2119 = vmatpush1.bf16.msra.mxu0 %v1930_v14  ;;  %3437 = vtanh.f32 %v1569_v62  ;;  %v1574_v19 = vpop.f32.mrb[37].mxu0  ;;  %v1686_v55 = vadd.f32 %v1685_v39, %v5682_v30  ;;  %v5802_v39 = vld [vmem:[%s6112_s5 + $0x8] sm:$0xff]  }
 0x23f   :  { %v3416_v18 = vpop.eup %3415  ;;  %2232 = vmatpush1.bf16.msra.mxu1 %v1932_v5  ;;  %3439 = vtanh.f32 %v1682_v6  ;;  %v1575_v52 = vadd.f32 %v1574_v19, %v5682_v30  ;;  %v1687_v33 = vpop.f32.mrb[37].mxu1 }
 0x240   :  { %v3418_v48 = vpop.eup %3417  ;;  %v1576_v47 = vpop.f32.mrb[38].mxu0  ;;  %3441 = vtanh.f32 %v1573_v41  ;;  %v1688_v4 = vadd.f32 %v1687_v33, %v5682_v30 }
 0x241   :  { %v3420_v24 = vpop.eup %3419  ;;  %v1938_v28 = vpack.c.bf16 %v3418_v48, %v3410_v12  ;;  %v1577_v38 = vadd.f32 %v1576_v47, %v5684_v59  ;;  %v1689_v40 = vpop.f32.mrb[38].mxu1  ;;  %3443 = vtanh.f32 %v1686_v55 }
 0x242   :  { %v3422_v43 = vpop.eup %3421  ;;  %v1578_v46 = vpop.f32.mrb[39].mxu0  ;;  %v1940_v54 = vpack.c.bf16 %v3420_v24, %v3412_v32  ;;  %v1690_v58 = vadd.f32 %v1689_v40, %v5684_v59  ;;  %3445 = vtanh.f32 %v1575_v52 }
 0x243   :  { %v3424_v25 = vpop.eup %3423  ;;  %v1691_v10 = vpop.f32.mrb[39].mxu1  ;;  %v1939_v0 = vpack.c.bf16 %v3422_v43, %v3414_v63  ;;  %v1579_v51 = vadd.f32 %v1578_v46, %v5684_v59  ;;  %3447 = vtanh.f32 %v1688_v4 }
 0x244   :  { %v3426_v56 = vpop.eup %3425  ;;  %v1941_v45 = vpack.c.bf16 %v3424_v25, %v3416_v18  ;;  %v1692_v30 = vadd.f32 %v1691_v10, %v5684_v59  ;;  %3449 = vtanh.f32 %v1577_v38  ;;  %v1582_v3 = vpop.f32.mrb[40].mxu0 }
 0x245   :  { %v3428_v61 = vpop.eup %3427  ;;  %2120 = vmatprep.subr.bf16.mxu0 %v1939_v0  ;;  %3451 = vtanh.f32 %v1690_v58  ;;  %v1583_v15 = vadd.f32 %v1582_v3, %v5694_v21  ;;  %v1695_v14 = vpop.f32.mrb[40].mxu1 }
 0x246   :  { %v3430_v8 = vpop.eup %3429  ;;  %2233 = vmatprep.subr.bf16.mxu1 %v1941_v45  ;;  %2121 = vmatpush1.bf16.msra.mxu0 %v1938_v28  ;;  %3453 = vtanh.f32 %v1579_v51  ;;  %v1584_v59 = vpop.f32.mrb[41].mxu0  ;;  %v1696_v9 = vadd.f32 %v1695_v14, %v5694_v21 }
 0x247   :  { %v3432_v27 = vpop.eup %3431  ;;  %2234 = vmatpush1.bf16.msra.mxu1 %v1940_v54  ;;  %3455 = vtanh.f32 %v1692_v30  ;;  %v1585_v34 = vadd.f32 %v1584_v59, %v5694_v21  ;;  %v1697_v29 = vpop.f32.mrb[41].mxu1 }
 0x248   :  { %v3434_v60 = vpop.eup %3433  ;;  %v1586_v57 = vpop.f32.mrb[42].mxu0  ;;  %3457 = vtanh.f32 %v1583_v15  ;;  %v1698_v1 = vadd.f32 %v1697_v29, %v5694_v21  ;;  %v5819_v15 = vld [vmem:[%s6112_s5 + $0x10] sm:$0xff]  }
 0x249   :  { %v3436_v35 = vpop.eup %3435  ;;  %2139 = vmatmul.mubr.bf16.vlgmr.msra.gmra.mrb[64].mxu0 %v5785_v42  ;;  %v1886_v5 = vpack.c.bf16 %v3434_v60, %v3426_v56  ;;  %v1587_v7 = vadd.f32 %v1586_v57, %v5696_v22  ;;  %v1699_v16 = vpop.f32.mrb[42].mxu1  ;;  %3459 = vtanh.f32 %v1696_v9 }
 0x24a   :  { %v3438_v37 = vpop.eup %3437  ;;  %2252 = vmatmul.mubr.bf16.vlgmr.msra.gmra.mrb[64].mxu1 %v5785_v42  ;;  %v1588_v12 = vpop.f32.mrb[43].mxu0  ;;  %v1888_v62 = vpack.c.bf16 %v3436_v35, %v3428_v61  ;;  %2148 = vmatprep.mubr.bf16.mxu0 %v6417_v36  ;;  %v1700_v32 = vadd.f32 %v1699_v16, %v5696_v22  ;;  %3461 = vtanh.f32 %v1585_v34 }
 0x24b   :  { %v3440_v2 = vpop.eup %3439  ;;  %v1701_v6 = vpop.f32.mrb[43].mxu1  ;;  %v1887_v63 = vpack.c.bf16 %v3438_v37, %v3430_v8  ;;  %2261 = vmatprep.mubr.bf16.mxu1 %v6417_v36  ;;  %v1589_v31 = vadd.f32 %v1588_v12, %v5696_v22  ;;  %3463 = vtanh.f32 %v1698_v1 }
 0x24c   :  { %v3442_v18 = vpop.eup %3441  ;;  %v1889_v21 = vpack.c.bf16 %v3440_v2, %v3432_v27  ;;  %v1702_v41 = vadd.f32 %v1701_v6, %v5696_v22  ;;  %3465 = vtanh.f32 %v1587_v7  ;;  %v1592_v55 = vpop.f32.mrb[44].mxu0 }
 0x24d   :  { %v3444_v48 = vpop.eup %3443  ;;  %2332 = vmatprep.subr.bf16.mxu0 %v1887_v63  ;;  %3467 = vtanh.f32 %v1700_v32  ;;  %v1593_v33 = vadd.f32 %v1592_v55, %v5706_v20  ;;  %v1705_v47 = vpop.f32.mrb[44].mxu1 }
 0x24e   :  { %v3446_v19 = vpop.eup %3445  ;;  %2445 = vmatprep.subr.bf16.mxu1 %v1889_v21  ;;  %2333 = vmatpush1.bf16.msra.mxu0 %v1886_v5  ;;  %3469 = vtanh.f32 %v1589_v31  ;;  %v1594_v22 = vpop.f32.mrb[45].mxu0  ;;  %v1706_v43 = vadd.f32 %v1705_v47, %v5706_v20 }
 0x24f   :  { %v3448_v24 = vpop.eup %3447  ;;  %2446 = vmatpush1.bf16.msra.mxu1 %v1888_v62  ;;  %3471 = vtanh.f32 %v1702_v41  ;;  %v1595_v4 = vadd.f32 %v1594_v22, %v5706_v20  ;;  %v1707_v38 = vpop.f32.mrb[45].mxu1 }
 0x250   :  { %v3450_v52 = vpop.eup %3449  ;;  %v1596_v40 = vpop.f32.mrb[46].mxu0  ;;  %3473 = vtanh.f32 %v1593_v33  ;;  %v1708_v25 = vadd.f32 %v1707_v38, %v5706_v20 }
 0x251   :  { %v3452_v28 = vpop.eup %3451  ;;  %2149 = vmatmul.mubr.bf16.gmra.mrb[68].mxu0 %v5802_v39  ;;  %v1894_v46 = vpack.c.bf16 %v3450_v52, %v3442_v18  ;;  %v1597_v58 = vadd.f32 %v1596_v40, %v5708_v53  ;;  %v1709_v10 = vpop.f32.mrb[46].mxu1  ;;  %3475 = vtanh.f32 %v1706_v43  ;;  %v5836_v52 = vld [vmem:[%s6112_s5 + $0x18] sm:$0xff]  }
 0x252   :  { %v3454_v54 = vpop.eup %3453  ;;  %2262 = vmatmul.mubr.bf16.gmra.mrb[68].mxu1 %v5802_v39  ;;  %v1598_v0 = vpop.f32.mrb[47].mxu0  ;;  %v1896_v56 = vpack.c.bf16 %v3452_v28, %v3444_v48  ;;  %2158 = vmatprep.mubr.bf16.mxu0 %v6417_v36  ;;  %v1710_v45 = vadd.f32 %v1709_v10, %v5708_v53  ;;  %3477 = vtanh.f32 %v1595_v4 }
 0x253   :  { %v3456_v51 = vpop.eup %3455  ;;  %v1711_v61 = vpop.f32.mrb[47].mxu1  ;;  %v1895_v30 = vpack.c.bf16 %v3454_v54, %v3446_v19  ;;  %2271 = vmatprep.mubr.bf16.mxu1 %v6417_v36  ;;  %v1599_v27 = vadd.f32 %v1598_v0, %v5708_v53  ;;  %3479 = vtanh.f32 %v1708_v25 }
 0x254   :  { %v3458_v8 = vpop.eup %3457  ;;  %v1897_v20 = vpack.c.bf16 %v3456_v51, %v3448_v24  ;;  %v1712_v60 = vadd.f32 %v1711_v61, %v5708_v53  ;;  %3481 = vtanh.f32 %v1597_v58  ;;  %v1602_v35 = vpop.f32.mrb[48].mxu0 }
 0x255   :  { %v3460_v3 = vpop.eup %3459  ;;  %2334 = vmatprep.subr.bf16.mxu0 %v1895_v30  ;;  %3483 = vtanh.f32 %v1710_v45  ;;  %v1603_v34 = vadd.f32 %v1602_v35, %v5718_v23  ;;  %v1715_v29 = vpop.f32.mrb[48].mxu1  ;;  %v5853_v35 = vld [vmem:[%s6112_s5 + $0x20] sm:$0xff]  }
 0x256   :  { %v3462_v14 = vpop.eup %3461  ;;  %2447 = vmatprep.subr.bf16.mxu1 %v1897_v20  ;;  %2335 = vmatpush1.bf16.msra.mxu0 %v1894_v46  ;;  %3485 = vtanh.f32 %v1599_v27  ;;  %v1604_v53 = vpop.f32.mrb[49].mxu0  ;;  %v1716_v5 = vadd.f32 %v1715_v29, %v5718_v23 }
 0x257   :  { %v3464_v59 = vpop.eup %3463  ;;  %2448 = vmatpush1.bf16.msra.mxu1 %v1896_v56  ;;  %3487 = vtanh.f32 %v1712_v60  ;;  %v1605_v37 = vadd.f32 %v1604_v53, %v5718_v23  ;;  %v1717_v1 = vpop.f32.mrb[49].mxu1 }
 0x258   :  { %v3466_v9 = vpop.eup %3465  ;;  %v1606_v7 = vpop.f32.mrb[50].mxu0  ;;  %3489 = vtanh.f32 %v1603_v34  ;;  %v1718_v62 = vadd.f32 %v1717_v1, %v5718_v23 }
 0x259   :  { %v3468_v57 = vpop.eup %3467  ;;  %2159 = vmatmul.mubr.bf16.gmra.mrb[72].mxu0 %v5819_v15  ;;  %v1902_v16 = vpack.c.bf16 %v3466_v9, %v3458_v8  ;;  %v1607_v2 = vadd.f32 %v1606_v7, %v5720_v49  ;;  %v1719_v32 = vpop.f32.mrb[50].mxu1  ;;  %3491 = vtanh.f32 %v1716_v5 }
 0x25a   :  { %v3470_v12 = vpop.eup %3469  ;;  %2272 = vmatmul.mubr.bf16.gmra.mrb[72].mxu1 %v5819_v15  ;;  %v1608_v6 = vpop.f32.mrb[51].mxu0  ;;  %v1904_v63 = vpack.c.bf16 %v3468_v57, %v3460_v3  ;;  %2168 = vmatprep.mubr.bf16.mxu0 %v6417_v36  ;;  %v1720_v31 = vadd.f32 %v1719_v32, %v5720_v49  ;;  %3493 = vtanh.f32 %v1605_v37 }
 0x25b   :  { %v3472_v18 = vpop.eup %3471  ;;  %v1721_v21 = vpop.f32.mrb[51].mxu1  ;;  %v1903_v48 = vpack.c.bf16 %v3470_v12, %v3462_v14  ;;  %2281 = vmatprep.mubr.bf16.mxu1 %v6417_v36  ;;  %v1609_v19 = vadd.f32 %v1608_v6, %v5720_v49  ;;  %3495 = vtanh.f32 %v1718_v62 }
 0x25c   :  { %v3474_v41 = vpop.eup %3473  ;;  %v1905_v23 = vpack.c.bf16 %v3472_v18, %v3464_v59  ;;  %v1722_v55 = vadd.f32 %v1721_v21, %v5720_v49  ;;  %3497 = vtanh.f32 %v1607_v2  ;;  %v1612_v22 = vpop.f32.mrb[52].mxu0 }
 0x25d   :  { %v3476_v24 = vpop.eup %3475  ;;  %2336 = vmatprep.subr.bf16.mxu0 %v1903_v48  ;;  %3499 = vtanh.f32 %v1720_v31  ;;  %v1613_v43 = vadd.f32 %v1612_v22, %v5730_v13  ;;  %v1725_v4 = vpop.f32.mrb[52].mxu1 }
 0x25e   :  { %v3478_v33 = vpop.eup %3477  ;;  %2449 = vmatprep.subr.bf16.mxu1 %v1905_v23  ;;  %2337 = vmatpush1.bf16.msra.mxu0 %v1902_v16  ;;  %3501 = vtanh.f32 %v1609_v19  ;;  %v1614_v49 = vpop.f32.mrb[53].mxu0  ;;  %v1726_v40 = vadd.f32 %v1725_v4, %v5730_v13 }
 0x25f   :  { %v3480_v47 = vpop.eup %3479  ;;  %2450 = vmatpush1.bf16.msra.mxu1 %v1904_v63  ;;  %3503 = vtanh.f32 %v1722_v55  ;;  %v1615_v46 = vadd.f32 %v1614_v49, %v5730_v13  ;;  %v1727_v54 = vpop.f32.mrb[53].mxu1 }
 0x260   :  { %v3482_v28 = vpop.eup %3481  ;;  %v1616_v25 = vpop.f32.mrb[54].mxu0  ;;  %3505 = vtanh.f32 %v1613_v43  ;;  %v1728_v0 = vadd.f32 %v1727_v54, %v5730_v13 }
 0x261   :  { %v3484_v38 = vpop.eup %3483  ;;  %2169 = vmatmul.mubr.bf16.gmra.mrb[76].mxu0 %v5836_v52  ;;  %v1910_v58 = vpack.c.bf16 %v3482_v28, %v3474_v41  ;;  %v1617_v56 = vadd.f32 %v1616_v25, %v5732_v26  ;;  %v1729_v51 = vpop.f32.mrb[54].mxu1  ;;  %3507 = vtanh.f32 %v1726_v40 }
 0x262   :  { %v3486_v10 = vpop.eup %3485  ;;  %2282 = vmatmul.mubr.bf16.gmra.mrb[76].mxu1 %v5836_v52  ;;  %v1618_v45 = vpop.f32.mrb[55].mxu0  ;;  %v1912_v61 = vpack.c.bf16 %v3484_v38, %v3476_v24  ;;  %2178 = vmatprep.mubr.bf16.mxu0 %v6417_v36  ;;  %v1730_v8 = vadd.f32 %v1729_v51, %v5732_v26  ;;  %3509 = vtanh.f32 %v1615_v46 }
 0x263   :  { %v3488_v30 = vpop.eup %3487  ;;  %v1731_v27 = vpop.f32.mrb[55].mxu1  ;;  %v1911_v20 = vpack.c.bf16 %v3486_v10, %v3478_v33  ;;  %2291 = vmatprep.mubr.bf16.mxu1 %v6417_v36  ;;  %v1619_v60 = vadd.f32 %v1618_v45, %v5732_v26  ;;  %3511 = vtanh.f32 %v1728_v0 }
 0x264   :  { %v3490_v3 = vpop.eup %3489  ;;  %v1913_v13 = vpack.c.bf16 %v3488_v30, %v3480_v47  ;;  %v1732_v59 = vadd.f32 %v1731_v27, %v5732_v26  ;;  %3513 = vtanh.f32 %v1617_v56  ;;  %v1622_v29 = vpop.f32.mrb[56].mxu0  ;;  %v5870_v47 = vld [vmem:[%s6112_s5 + $0x28] sm:$0xff]  }
 0x265   :  { %v3492_v14 = vpop.eup %3491  ;;  %2338 = vmatprep.subr.bf16.mxu0 %v1911_v20  ;;  %3515 = vtanh.f32 %v1730_v8  ;;  %v1623_v57 = vadd.f32 %v1622_v29, %v5742_v44  ;;  %v1735_v5 = vpop.f32.mrb[56].mxu1 }
 0x266   :  { %v3494_v9 = vpop.eup %3493  ;;  %2451 = vmatprep.subr.bf16.mxu1 %v1913_v13  ;;  %2339 = vmatpush1.bf16.msra.mxu0 %v1910_v58  ;;  %3517 = vtanh.f32 %v1619_v60  ;;  %v1624_v26 = vpop.f32.mrb[57].mxu0  ;;  %v1736_v1 = vadd.f32 %v1735_v5, %v5742_v44 }
 0x267   :  { %v3496_v34 = vpop.eup %3495  ;;  %2452 = vmatpush1.bf16.msra.mxu1 %v1912_v61  ;;  %3519 = vtanh.f32 %v1732_v59  ;;  %v1625_v7 = vadd.f32 %v1624_v26, %v5742_v44  ;;  %v1737_v16 = vpop.f32.mrb[57].mxu1 }
 0x268   :  { %v3498_v53 = vpop.eup %3497  ;;  %v1626_v12 = vpop.f32.mrb[58].mxu0  ;;  %3521 = vtanh.f32 %v1623_v57  ;;  %v1738_v32 = vadd.f32 %v1737_v16, %v5742_v44 }
 0x269   :  { %v3500_v37 = vpop.eup %3499  ;;  %2179 = vmatmul.mubr.bf16.gmra.mrb[80].mxu0 %v5853_v35  ;;  %v1918_v62 = vpack.c.bf16 %v3498_v53, %v3490_v3  ;;  %v1627_v6 = vadd.f32 %v1626_v12, %v5744_v11  ;;  %v1739_v63 = vpop.f32.mrb[58].mxu1  ;;  %3523 = vtanh.f32 %v1736_v1 }
 0x26a   :  { %v3502_v2 = vpop.eup %3501  ;;  %2292 = vmatmul.mubr.bf16.gmra.mrb[80].mxu1 %v5853_v35  ;;  %v1628_v18 = vpop.f32.mrb[59].mxu0  ;;  %v1920_v31 = vpack.c.bf16 %v3500_v37, %v3492_v14  ;;  %2188 = vmatprep.mubr.bf16.mxu0 %v6417_v36  ;;  %v1740_v48 = vadd.f32 %v1739_v63, %v5744_v11  ;;  %3525 = vtanh.f32 %v1625_v7 }
 0x26b   :  { %v3504_v21 = vpop.eup %3503  ;;  %v1741_v41 = vpop.f32.mrb[59].mxu1  ;;  %v1919_v19 = vpack.c.bf16 %v3502_v2, %v3494_v9  ;;  %2301 = vmatprep.mubr.bf16.mxu1 %v6417_v36  ;;  %v1629_v24 = vadd.f32 %v1628_v18, %v5744_v11  ;;  %3527 = vtanh.f32 %v1738_v32  ;;  %v5887_v9 = vld [vmem:[%s6112_s5 + $0x30] sm:$0xff]  }
 0x26c   :  { %v3506_v23 = vpop.eup %3505  ;;  %v1921_v44 = vpack.c.bf16 %v3504_v21, %v3496_v34  ;;  %v1742_v33 = vadd.f32 %v1741_v41, %v5744_v11  ;;  %3529 = vtanh.f32 %v1627_v6  ;;  %v1632_v43 = vpop.f32.mrb[60].mxu0 }
 0x26d   :  { %v3508_v55 = vpop.eup %3507  ;;  %2340 = vmatprep.subr.bf16.mxu0 %v1919_v19  ;;  %3531 = vtanh.f32 %v1740_v48  ;;  %v1633_v49 = vadd.f32 %v1632_v43, %v5754_v50  ;;  %v1745_v38 = vpop.f32.mrb[60].mxu1 }
 0x26e   :  { %v3510_v22 = vpop.eup %3509  ;;  %2453 = vmatprep.subr.bf16.mxu1 %v1921_v44  ;;  %2341 = vmatpush1.bf16.msra.mxu0 %v1918_v62  ;;  %3533 = vtanh.f32 %v1629_v24  ;;  %v1634_v11 = vpop.f32.mrb[61].mxu0  ;;  %v1746_v46 = vadd.f32 %v1745_v38, %v5754_v50  ;;  %v3040_v62 = vld [vmem:[%s6112_s5 + $0x38] sm:$0xff]  }
 0x26f   :  { %v3512_v28 = vpop.eup %3511  ;;  %2454 = vmatpush1.bf16.msra.mxu1 %v1920_v31  ;;  %3535 = vtanh.f32 %v1742_v33  ;;  %v1635_v54 = vadd.f32 %v1634_v11, %v5754_v50  ;;  %v1747_v25 = vpop.f32.mrb[61].mxu1 }
 0x270   :  { %v3514_v4 = vpop.eup %3513  ;;  %v1636_v58 = vpop.f32.mrb[62].mxu0  ;;  %3537 = vtanh.f32 %v1633_v49  ;;  %v1748_v56 = vadd.f32 %v1747_v25, %v5754_v50 }
 0x271   :  { %v3516_v40 = vpop.eup %3515  ;;  %2189 = vmatmul.mubr.bf16.gmra.mrb[84].mxu0 %v5870_v47  ;;  %v1926_v10 = vpack.c.bf16 %v3514_v4, %v3506_v23  ;;  %v1637_v51 = vadd.f32 %v1636_v58, %v5756_v17  ;;  %v1749_v45 = vpop.f32.mrb[62].mxu1  ;;  %3539 = vtanh.f32 %v1746_v46 }
 0x272   :  { %v3518_v0 = vpop.eup %3517  ;;  %2302 = vmatmul.mubr.bf16.gmra.mrb[84].mxu1 %v5870_v47  ;;  %v1638_v61 = vpop.f32.mrb[63].mxu0  ;;  %v1928_v30 = vpack.c.bf16 %v3516_v40, %v3508_v55  ;;  %2198 = vmatprep.mubr.bf16.mxu0 %v6417_v36  ;;  %v1750_v27 = vadd.f32 %v1749_v45, %v5756_v17  ;;  %3541 = vtanh.f32 %v1635_v54 }
 0x273   :  { %v3520_v8 = vpop.eup %3519  ;;  %v1751_v20 = vpop.f32.mrb[63].mxu1  ;;  %v1927_v3 = vpack.c.bf16 %v3518_v0, %v3510_v22  ;;  %2311 = vmatprep.mubr.bf16.mxu1 %v6417_v36  ;;  %v1639_v13 = vadd.f32 %v1638_v61, %v5756_v17  ;;  %3543 = vtanh.f32 %v1748_v56 }
 0x274   :  { %v3522_v60 = vpop.eup %3521  ;;  %v1929_v50 = vpack.c.bf16 %v3520_v8, %v3512_v28  ;;  %v1752_v59 = vadd.f32 %v1751_v20, %v5756_v17  ;;  %3545 = vtanh.f32 %v1637_v51 }
 0x275   :  { %v3524_v14 = vpop.eup %3523  ;;  %2342 = vmatprep.subr.bf16.mxu0 %v1927_v3  ;;  %3547 = vtanh.f32 %v1750_v27 }
 0x276   :  { %v3526_v34 = vpop.eup %3525  ;;  %2455 = vmatprep.subr.bf16.mxu1 %v1929_v50  ;;  %2343 = vmatpush1.bf16.msra.mxu0 %v1926_v10  ;;  %3549 = vtanh.f32 %v1639_v13 }
 0x277   :  { %v3528_v29 = vpop.eup %3527  ;;  %2456 = vmatpush1.bf16.msra.mxu1 %v1928_v30  ;;  %3551 = vtanh.f32 %v1752_v59 }
 0x278   :  { %v3530_v53 = vpop.eup %3529 }
 0x279   :  { %v3532_v57 = vpop.eup %3531  ;;  %2199 = vmatmul.mubr.bf16.gmra.mrb[88].mxu0 %v5887_v9  ;;  %v1934_v17 = vpack.c.bf16 %v3530_v53, %v3522_v60 }
 0x27a   :  { %v3534_v5 = vpop.eup %3533  ;;  %2312 = vmatmul.mubr.bf16.gmra.mrb[88].mxu1 %v5887_v9  ;;  %v1936_v26 = vpack.c.bf16 %v3532_v57, %v3524_v14  ;;  %2208 = vmatprep.mubr.bf16.mxu0 %v6417_v36 }
 0x27b   :  { %v3536_v37 = vpop.eup %3535  ;;  %v1935_v1 = vpack.c.bf16 %v3534_v5, %v3526_v34  ;;  %2321 = vmatprep.mubr.bf16.mxu1 %v6417_v36 }
 0x27c   :  { %v3538_v7 = vpop.eup %3537  ;;  %v1937_v16 = vpack.c.bf16 %v3536_v37, %v3528_v29 }
 0x27d   :  { %v3540_v12 = vpop.eup %3539  ;;  %2344 = vmatprep.subr.bf16.mxu0 %v1935_v1 }
 0x27e   :  { %v3542_v2 = vpop.eup %3541  ;;  %2457 = vmatprep.subr.bf16.mxu1 %v1937_v16  ;;  %2345 = vmatpush1.bf16.msra.mxu0 %v1934_v17 }
 0x27f   :  { %v3544_v32 = vpop.eup %3543  ;;  %2458 = vmatpush1.bf16.msra.mxu1 %v1936_v26 }
 0x280   :  { %v3546_v6 = vpop.eup %3545 }
 0x281   :  { %v3548_v63 = vpop.eup %3547  ;;  %2209 = vmatmul.mubr.bf16.gmra.mrb[92].mxu0 %v3040_v62  ;;  %v1942_v18 = vpack.c.bf16 %v3546_v6, %v3538_v7 }
 0x282   :  { %v3550_v31 = vpop.eup %3549  ;;  %2322 = vmatmul.mubr.bf16.gmra.mrb[92].mxu1 %v3040_v62  ;;  %v1944_v21 = vpack.c.bf16 %v3548_v63, %v3540_v12  ;;  %2364 = vmatprep.mubr.bf16.mxu0 %v6417_v36 }
 0x283   :  { %v3552_v48 = vpop.eup %3551  ;;  %v1943_v41 = vpack.c.bf16 %v3550_v31, %v3542_v2  ;;  %2477 = vmatprep.mubr.bf16.mxu1 %v6417_v36 }
 0x284   :  { %v1945_v19 = vpack.c.bf16 %v3552_v48, %v3544_v32 }
 0x285   :  { %2346 = vmatprep.subr.bf16.mxu0 %v1943_v41 }
 0x286   :  { %2459 = vmatprep.subr.bf16.mxu1 %v1945_v19  ;;  %2347 = vmatpush1.bf16.msra.mxu0 %v1942_v18 }
 0x287   :  { %2460 = vmatpush1.bf16.msra.mxu1 %v1944_v21 }
 0x289   :  { %2365 = vmatmul.mubr.bf16.vlgmr.msra.gmra.mrb[96].mxu0 %v5785_v42 }
 0x28a   :  { %2478 = vmatmul.mubr.bf16.vlgmr.msra.gmra.mrb[96].mxu1 %v5785_v42  ;;  %2374 = vmatprep.mubr.bf16.mxu0 %v6417_v36  ;;  %v5928_v42 = vpop.permute.xlu0 %1980 }
 0x28b   :  { %2487 = vmatprep.mubr.bf16.mxu1 %v6417_v36 }
 0x28e   :  { %v5940_v40 = vpop.permute.xlu0 %1990 }
 0x291   :  { %2375 = vmatmul.mubr.bf16.gmra.mrb[100].mxu0 %v5802_v39 }
 0x292   :  { %2488 = vmatmul.mubr.bf16.gmra.mrb[100].mxu1 %v5802_v39  ;;  %2384 = vmatprep.mubr.bf16.mxu0 %v6417_v36  ;;  %v5930_v39 = vpop.permute.xlu1 %1985 }
 0x293   :  { %2497 = vmatprep.mubr.bf16.mxu1 %v6417_v36 }
 0x296   :  { %v5942_v46 = vpop.permute.xlu1 %1995 }
 0x299   :  { %2385 = vmatmul.mubr.bf16.gmra.mrb[104].mxu0 %v5819_v15 }
 0x29a   :  { %2498 = vmatmul.mubr.bf16.gmra.mrb[104].mxu1 %v5819_v15  ;;  %2394 = vmatprep.mubr.bf16.mxu0 %v6417_v36  ;;  %v5954_v29 = vpop.permute.xlu1 %2005 }
 0x29b   :  { %2507 = vmatprep.mubr.bf16.mxu1 %v6417_v36 }
 0x2a1   :  { %2395 = vmatmul.mubr.bf16.gmra.mrb[108].mxu0 %v5836_v52 }
 0x2a2   :  { %2508 = vmatmul.mubr.bf16.gmra.mrb[108].mxu1 %v5836_v52  ;;  %2404 = vmatprep.mubr.bf16.mxu0 %v6417_v36 }
 0x2a3   :  { %2517 = vmatprep.mubr.bf16.mxu1 %v6417_v36 }
 0x2a9   :  { %2405 = vmatmul.mubr.bf16.gmra.mrb[112].mxu0 %v5853_v35 }
 0x2aa   :  { %2518 = vmatmul.mubr.bf16.gmra.mrb[112].mxu1 %v5853_v35  ;;  %2414 = vmatprep.mubr.bf16.mxu0 %v6417_v36 }
 0x2ab   :  { %2527 = vmatprep.mubr.bf16.mxu1 %v6417_v36 }
 0x2b1   :  { %2415 = vmatmul.mubr.bf16.gmra.mrb[116].mxu0 %v5870_v47 }
 0x2b2   :  { %2528 = vmatmul.mubr.bf16.gmra.mrb[116].mxu1 %v5870_v47  ;;  %2424 = vmatprep.mubr.bf16.mxu0 %v6417_v36 }
 0x2b3   :  { %2537 = vmatprep.mubr.bf16.mxu1 %v6417_v36 }
 0x2b9   :  { %2425 = vmatmul.mubr.bf16.gmra.mrb[120].mxu0 %v5887_v9 }
 0x2ba   :  { %2538 = vmatmul.mubr.bf16.gmra.mrb[120].mxu1 %v5887_v9  ;;  %2434 = vmatprep.mubr.bf16.mxu0 %v6417_v36  ;;  %v5952_v9 = vpop.permute.xlu0 %2000 }
 0x2bb   :  { %2547 = vmatprep.mubr.bf16.mxu1 %v6417_v36 }
 0x2c1   :  { %2435 = vmatmul.mubr.bf16.gmra.mrb[124].mxu0 %v3040_v62 }
 0x2c2   :  { %2548 = vmatmul.mubr.bf16.gmra.mrb[124].mxu1 %v3040_v62  ;;  %2783 = vmatprep.mubr.bf16.mxu0 %v6417_v36 }
 0x2c3   :  { %2824 = vmatprep.mubr.bf16.mxu1 %v6417_v36 }
 0x31c   :  { %v2140_v15 = vpop.f32.mrb[64].mxu0 }
 0x31d   :  { %v2141_v52 = vadd.f32 %v2140_v15, %v5928_v42  ;;  %v2253_v35 = vpop.f32.mrb[64].mxu1  ;;  %v2142_v23 = vpop.f32.mrb[65].mxu0 }
 0x31e   :  { %v2254_v24 = vadd.f32 %v2253_v35, %v5928_v42  ;;  %v2143_v44 = vadd.f32 %v2142_v23, %v5928_v42  ;;  %v2255_v55 = vpop.f32.mrb[65].mxu1  ;;  %v2144_v33 = vpop.f32.mrb[66].mxu0 }
 0x31f   :  { %3553 = vtanh.f32 %v2141_v52  ;;  %v2256_v47 = vadd.f32 %v2255_v55, %v5928_v42  ;;  %v2145_v22 = vadd.f32 %v2144_v33, %v5930_v39  ;;  %v2257_v28 = vpop.f32.mrb[66].mxu1  ;;  %v2146_v43 = vpop.f32.mrb[67].mxu0 }
 0x320   :  { %3555 = vtanh.f32 %v2254_v24  ;;  %v2258_v4 = vadd.f32 %v2257_v28, %v5930_v39  ;;  %v2259_v49 = vpop.f32.mrb[67].mxu1  ;;  %v2147_v38 = vadd.f32 %v2146_v43, %v5930_v39  ;;  %v5964_v55 = vpop.permute.xlu0 %2010 }
 0x321   :  { %3557 = vtanh.f32 %v2143_v44  ;;  %v2260_v11 = vadd.f32 %v2259_v49, %v5930_v39 }
 0x322   :  { %3559 = vtanh.f32 %v2256_v47  ;;  %v5966_v47 = vpop.permute.xlu1 %2015 }
 0x323   :  { %3561 = vtanh.f32 %v2145_v22 }
 0x324   :  { %3563 = vtanh.f32 %v2258_v4  ;;  %v2150_v54 = vpop.f32.mrb[68].mxu0 }
 0x325   :  { %3565 = vtanh.f32 %v2147_v38  ;;  %v2151_v25 = vadd.f32 %v2150_v54, %v5940_v40  ;;  %v2263_v58 = vpop.f32.mrb[68].mxu1  ;;  %v2152_v10 = vpop.f32.mrb[69].mxu0 }
 0x326   :  { %3567 = vtanh.f32 %v2260_v11  ;;  %v2264_v0 = vadd.f32 %v2263_v58, %v5940_v40  ;;  %v2153_v56 = vadd.f32 %v2152_v10, %v5940_v40  ;;  %v2265_v51 = vpop.f32.mrb[69].mxu1  ;;  %v2154_v45 = vpop.f32.mrb[70].mxu0 }
 0x327   :  { %3569 = vtanh.f32 %v2151_v25  ;;  %v2266_v61 = vadd.f32 %v2265_v51, %v5940_v40  ;;  %v2155_v30 = vadd.f32 %v2154_v45, %v5942_v46  ;;  %v2267_v8 = vpop.f32.mrb[70].mxu1  ;;  %v2156_v27 = vpop.f32.mrb[71].mxu0 }
 0x328   :  { %3571 = vtanh.f32 %v2264_v0  ;;  %v2268_v20 = vadd.f32 %v2267_v8, %v5942_v46  ;;  %v2269_v3 = vpop.f32.mrb[71].mxu1  ;;  %v2157_v13 = vadd.f32 %v2156_v27, %v5942_v46 }
 0x329   :  { %v3554_v60 = vpop.eup %3553  ;;  %3573 = vtanh.f32 %v2153_v56  ;;  %v2270_v14 = vadd.f32 %v2269_v3, %v5942_v46 }
 0x32a   :  { %v3556_v50 = vpop.eup %3555  ;;  %3575 = vtanh.f32 %v2266_v61 }
 0x32b   :  { %v3558_v59 = vpop.eup %3557  ;;  %3577 = vtanh.f32 %v2155_v30 }
 0x32c   :  { %v3560_v34 = vpop.eup %3559  ;;  %3579 = vtanh.f32 %v2268_v20  ;;  %v2160_v53 = vpop.f32.mrb[72].mxu0 }
 0x32d   :  { %v3562_v57 = vpop.eup %3561  ;;  %3581 = vtanh.f32 %v2157_v13  ;;  %v2161_v17 = vadd.f32 %v2160_v53, %v5952_v9  ;;  %v2273_v5 = vpop.f32.mrb[72].mxu1 }
 0x32e   :  { %v2162_v26 = vpop.f32.mrb[73].mxu0  ;;  %v3564_v37 = vpop.eup %3563  ;;  %3583 = vtanh.f32 %v2270_v14  ;;  %v2274_v1 = vadd.f32 %v2273_v5, %v5952_v9  ;;  %v2686_v62 = vpack.c.bf16 %v3562_v57, %v3554_v60 }
 0x32f   :  { %v2163_v7 = vadd.f32 %v2162_v26, %v5952_v9  ;;  %v2275_v16 = vpop.f32.mrb[73].mxu1  ;;  %v2164_v12 = vpop.f32.mrb[74].mxu0  ;;  %3585 = vtanh.f32 %v2161_v17  ;;  %v2688_v31 = vpack.c.bf16 %v3564_v37, %v3556_v50 }
 0x330   :  { %v3566_v2 = vpop.eup %3565  ;;  %v2276_v32 = vadd.f32 %v2275_v16, %v5952_v9  ;;  %v2165_v6 = vadd.f32 %v2164_v12, %v5954_v29  ;;  %v2277_v63 = vpop.f32.mrb[74].mxu1  ;;  %3587 = vtanh.f32 %v2274_v1 }
 0x331   :  { %v2166_v18 = vpop.f32.mrb[75].mxu0  ;;  %v3568_v21 = vpop.eup %3567  ;;  %v2278_v48 = vadd.f32 %v2277_v63, %v5954_v29  ;;  %v2687_v19 = vpack.c.bf16 %v3566_v2, %v3558_v59  ;;  %3589 = vtanh.f32 %v2163_v7 }
 0x332   :  { %v2279_v41 = vpop.f32.mrb[75].mxu1  ;;  %v3570_v15 = vpop.eup %3569  ;;  %v2167_v52 = vadd.f32 %v2166_v18, %v5954_v29  ;;  %v2689_v35 = vpack.c.bf16 %v3568_v21, %v3560_v34  ;;  %3591 = vtanh.f32 %v2276_v32 }
 0x333   :  { %v3572_v23 = vpop.eup %3571  ;;  %v2280_v24 = vadd.f32 %v2279_v41, %v5954_v29  ;;  %2751 = vmatprep.subr.bf16.mxu0 %v2687_v19  ;;  %3593 = vtanh.f32 %v2165_v6  ;;  %v5976_v53 = vpop.permute.xlu0 %2020 }
 0x334   :  { %v3574_v44 = vpop.eup %3573  ;;  %2792 = vmatprep.subr.bf16.mxu1 %v2689_v35  ;;  %2752 = vmatpush1.bf16.msra.mxu0 %v2686_v62  ;;  %3595 = vtanh.f32 %v2278_v48  ;;  %v2170_v22 = vpop.f32.mrb[76].mxu0 }
 0x335   :  { %v3576_v33 = vpop.eup %3575  ;;  %2793 = vmatpush1.bf16.msra.mxu1 %v2688_v31  ;;  %3597 = vtanh.f32 %v2167_v52  ;;  %v2171_v43 = vadd.f32 %v2170_v22, %v5964_v55  ;;  %v2283_v4 = vpop.f32.mrb[76].mxu1 }
 0x336   :  { %v3578_v28 = vpop.eup %3577  ;;  %v2172_v49 = vpop.f32.mrb[77].mxu0  ;;  %3599 = vtanh.f32 %v2280_v24  ;;  %v2284_v11 = vadd.f32 %v2283_v4, %v5964_v55 }
 0x337   :  { %v3580_v38 = vpop.eup %3579  ;;  %v2173_v54 = vadd.f32 %v2172_v49, %v5964_v55  ;;  %v2285_v25 = vpop.f32.mrb[77].mxu1  ;;  %v2694_v10 = vpack.c.bf16 %v3578_v28, %v3570_v15  ;;  %3601 = vtanh.f32 %v2171_v43 }
 0x338   :  { %v2174_v58 = vpop.f32.mrb[78].mxu0  ;;  %v3582_v0 = vpop.eup %3581  ;;  %v2286_v56 = vadd.f32 %v2285_v25, %v5964_v55  ;;  %v2696_v30 = vpack.c.bf16 %v3580_v38, %v3572_v23  ;;  %3603 = vtanh.f32 %v2284_v11 }
 0x339   :  { %v2175_v51 = vadd.f32 %v2174_v58, %v5966_v47  ;;  %v2287_v45 = vpop.f32.mrb[78].mxu1  ;;  %v2176_v61 = vpop.f32.mrb[79].mxu0  ;;  %v2695_v3 = vpack.c.bf16 %v3582_v0, %v3574_v44  ;;  %3605 = vtanh.f32 %v2173_v54 }
 0x33a   :  { %v3584_v8 = vpop.eup %3583  ;;  %v2288_v27 = vadd.f32 %v2287_v45, %v5966_v47  ;;  %v2289_v20 = vpop.f32.mrb[79].mxu1  ;;  %v2177_v13 = vadd.f32 %v2176_v61, %v5966_v47  ;;  %3607 = vtanh.f32 %v2286_v56 }
 0x33b   :  { %v3586_v60 = vpop.eup %3585  ;;  %v2697_v50 = vpack.c.bf16 %v3584_v8, %v3576_v33  ;;  %v2290_v59 = vadd.f32 %v2289_v20, %v5966_v47  ;;  %2753 = vmatprep.subr.bf16.mxu0 %v2695_v3  ;;  %3609 = vtanh.f32 %v2175_v51  ;;  %v5978_v17 = vpop.permute.xlu1 %2025 }
 0x33c   :  { %v3588_v14 = vpop.eup %3587  ;;  %2754 = vmatpush1.bf16.msra.mxu0 %v2694_v10  ;;  %3611 = vtanh.f32 %v2288_v27  ;;  %v2180_v5 = vpop.f32.mrb[80].mxu0 }
 0x33d   :  { %v3590_v34 = vpop.eup %3589  ;;  %2794 = vmatprep.subr.bf16.mxu1 %v2697_v50  ;;  %3613 = vtanh.f32 %v2177_v13  ;;  %v2181_v37 = vadd.f32 %v2180_v5, %v5976_v53  ;;  %v2293_v1 = vpop.f32.mrb[80].mxu1 }
 0x33e   :  { %v3592_v57 = vpop.eup %3591  ;;  %2795 = vmatpush1.bf16.msra.mxu1 %v2696_v30  ;;  %v2182_v7 = vpop.f32.mrb[81].mxu0  ;;  %3615 = vtanh.f32 %v2290_v59  ;;  %v2294_v12 = vadd.f32 %v2293_v1, %v5976_v53 }
 0x33f   :  { %v3594_v26 = vpop.eup %3593  ;;  %v2183_v62 = vadd.f32 %v2182_v7, %v5976_v53  ;;  %v2295_v2 = vpop.f32.mrb[81].mxu1  ;;  %3617 = vtanh.f32 %v2181_v37 }
 0x340   :  { %v3596_v16 = vpop.eup %3595  ;;  %v2184_v32 = vpop.f32.mrb[82].mxu0  ;;  %v2702_v6 = vpack.c.bf16 %v3594_v26, %v3586_v60  ;;  %v2296_v18 = vadd.f32 %v2295_v2, %v5976_v53  ;;  %3619 = vtanh.f32 %v2294_v12 }
 0x341   :  { %v3598_v63 = vpop.eup %3597  ;;  %v2185_v31 = vadd.f32 %v2184_v32, %v5978_v17  ;;  %v2297_v21 = vpop.f32.mrb[82].mxu1  ;;  %v2704_v41 = vpack.c.bf16 %v3596_v16, %v3588_v14  ;;  %3621 = vtanh.f32 %v2183_v62 }
 0x342   :  { %v2186_v48 = vpop.f32.mrb[83].mxu0  ;;  %v3600_v19 = vpop.eup %3599  ;;  %v2298_v15 = vadd.f32 %v2297_v21, %v5978_v17  ;;  %v2703_v35 = vpack.c.bf16 %v3598_v63, %v3590_v34  ;;  %3623 = vtanh.f32 %v2296_v18 }
 0x343   :  { %v2299_v52 = vpop.f32.mrb[83].mxu1  ;;  %v3602_v23 = vpop.eup %3601  ;;  %v2187_v24 = vadd.f32 %v2186_v48, %v5978_v17  ;;  %v2705_v44 = vpack.c.bf16 %v3600_v19, %v3592_v57  ;;  %3625 = vtanh.f32 %v2185_v31 }
 0x344   :  { %v3604_v33 = vpop.eup %3603  ;;  %v2300_v22 = vadd.f32 %v2299_v52, %v5978_v17  ;;  %2755 = vmatprep.subr.bf16.mxu0 %v2703_v35  ;;  %v5988_v43 = vpop.permute.xlu0 %2030  ;;  %3627 = vtanh.f32 %v2298_v15 }
 0x345   :  { %v3606_v28 = vpop.eup %3605  ;;  %2796 = vmatprep.subr.bf16.mxu1 %v2705_v44  ;;  %2756 = vmatpush1.bf16.msra.mxu0 %v2702_v6  ;;  %v5990_v49 = vpop.permute.xlu1 %2035  ;;  %3629 = vtanh.f32 %v2187_v24 }
 0x346   :  { %v3608_v4 = vpop.eup %3607  ;;  %2797 = vmatpush1.bf16.msra.mxu1 %v2704_v41  ;;  %v2190_v38 = vpop.f32.mrb[84].mxu0  ;;  %3631 = vtanh.f32 %v2300_v22 }
 0x347   :  { %v3610_v11 = vpop.eup %3609  ;;  %v2191_v54 = vadd.f32 %v2190_v38, %v5988_v43  ;;  %v2303_v25 = vpop.f32.mrb[84].mxu1 }
 0x348   :  { %v2192_v58 = vpop.f32.mrb[85].mxu0  ;;  %v3612_v10 = vpop.eup %3611  ;;  %v2304_v0 = vadd.f32 %v2303_v25, %v5988_v43  ;;  %v2710_v61 = vpack.c.bf16 %v3610_v11, %v3602_v23 }
 0x349   :  { %v2193_v56 = vadd.f32 %v2192_v58, %v5988_v43  ;;  %v2305_v51 = vpop.f32.mrb[85].mxu1  ;;  %v2194_v45 = vpop.f32.mrb[86].mxu0  ;;  %3633 = vtanh.f32 %v2191_v54  ;;  %v2712_v60 = vpack.c.bf16 %v3612_v10, %v3604_v33 }
 0x34a   :  { %v3614_v30 = vpop.eup %3613  ;;  %v2306_v8 = vadd.f32 %v2305_v51, %v5988_v43  ;;  %v2195_v27 = vadd.f32 %v2194_v45, %v5990_v49  ;;  %v2307_v20 = vpop.f32.mrb[86].mxu1  ;;  %3635 = vtanh.f32 %v2304_v0 }
 0x34b   :  { %v2196_v3 = vpop.f32.mrb[87].mxu0  ;;  %v3616_v13 = vpop.eup %3615  ;;  %v2308_v50 = vadd.f32 %v2307_v20, %v5990_v49  ;;  %v2711_v59 = vpack.c.bf16 %v3614_v30, %v3606_v28  ;;  %3637 = vtanh.f32 %v2193_v56 }
 0x34c   :  { %v2309_v14 = vpop.f32.mrb[87].mxu1  ;;  %v3618_v34 = vpop.eup %3617  ;;  %v2197_v57 = vadd.f32 %v2196_v3, %v5990_v49  ;;  %v2713_v5 = vpack.c.bf16 %v3616_v13, %v3608_v4  ;;  %3639 = vtanh.f32 %v2306_v8 }
 0x34d   :  { %v3620_v26 = vpop.eup %3619  ;;  %v2310_v37 = vadd.f32 %v2309_v14, %v5990_v49  ;;  %2757 = vmatprep.subr.bf16.mxu0 %v2711_v59  ;;  %v6000_v7 = vpop.permute.xlu0 %2040  ;;  %3641 = vtanh.f32 %v2195_v27 }
 0x34e   :  { %v3622_v1 = vpop.eup %3621  ;;  %2798 = vmatprep.subr.bf16.mxu1 %v2713_v5  ;;  %2758 = vmatpush1.bf16.msra.mxu0 %v2710_v61  ;;  %v6002_v12 = vpop.permute.xlu1 %2045  ;;  %3643 = vtanh.f32 %v2308_v50 }
 0x34f   :  { %v3624_v16 = vpop.eup %3623  ;;  %2799 = vmatpush1.bf16.msra.mxu1 %v2712_v60  ;;  %v2200_v62 = vpop.f32.mrb[88].mxu0  ;;  %3645 = vtanh.f32 %v2197_v57 }
 0x350   :  { %v3626_v2 = vpop.eup %3625  ;;  %v2201_v32 = vadd.f32 %v2200_v62, %v6000_v7  ;;  %v2313_v6 = vpop.f32.mrb[88].mxu1  ;;  %3647 = vtanh.f32 %v2310_v37 }
 0x351   :  { %v2202_v63 = vpop.f32.mrb[89].mxu0  ;;  %v3628_v18 = vpop.eup %3627  ;;  %v2314_v31 = vadd.f32 %v2313_v6, %v6000_v7  ;;  %v2718_v19 = vpack.c.bf16 %v3626_v2, %v3618_v34 }
 0x352   :  { %v2203_v21 = vadd.f32 %v2202_v63, %v6000_v7  ;;  %v2315_v48 = vpop.f32.mrb[89].mxu1  ;;  %v2204_v41 = vpop.f32.mrb[90].mxu0  ;;  %3649 = vtanh.f32 %v2201_v32  ;;  %v2720_v44 = vpack.c.bf16 %v3628_v18, %v3620_v26 }
 0x353   :  { %v3630_v15 = vpop.eup %3629  ;;  %v2316_v52 = vadd.f32 %v2315_v48, %v6000_v7  ;;  %v2205_v35 = vadd.f32 %v2204_v41, %v6002_v12  ;;  %v2317_v23 = vpop.f32.mrb[90].mxu1  ;;  %3651 = vtanh.f32 %v2314_v31 }
 0x354   :  { %v2206_v24 = vpop.f32.mrb[91].mxu0  ;;  %v3632_v33 = vpop.eup %3631  ;;  %v2318_v22 = vadd.f32 %v2317_v23, %v6002_v12  ;;  %v2719_v4 = vpack.c.bf16 %v3630_v15, %v3622_v1  ;;  %3653 = vtanh.f32 %v2203_v21 }
 0x355   :  { %v2319_v28 = vpop.f32.mrb[91].mxu1  ;;  %v3634_v38 = vpop.eup %3633  ;;  %v2207_v11 = vadd.f32 %v2206_v24, %v6002_v12  ;;  %v2721_v54 = vpack.c.bf16 %v3632_v33, %v3624_v16  ;;  %3655 = vtanh.f32 %v2316_v52 }
 0x356   :  { %v3636_v25 = vpop.eup %3635  ;;  %v2320_v58 = vadd.f32 %v2319_v28, %v6002_v12  ;;  %2759 = vmatprep.subr.bf16.mxu0 %v2719_v4  ;;  %v6012_v0 = vpop.permute.xlu0 %2050  ;;  %3657 = vtanh.f32 %v2205_v35 }
 0x357   :  { %v3638_v10 = vpop.eup %3637  ;;  %2800 = vmatprep.subr.bf16.mxu1 %v2721_v54  ;;  %2760 = vmatpush1.bf16.msra.mxu0 %v2718_v19  ;;  %v6014_v51 = vpop.permute.xlu1 %2055  ;;  %3659 = vtanh.f32 %v2318_v22 }
 0x358   :  { %v3640_v56 = vpop.eup %3639  ;;  %2801 = vmatpush1.bf16.msra.mxu1 %v2720_v44  ;;  %v2210_v45 = vpop.f32.mrb[92].mxu0  ;;  %3661 = vtanh.f32 %v2207_v11 }
 0x359   :  { %v3642_v61 = vpop.eup %3641  ;;  %v2211_v30 = vadd.f32 %v2210_v45, %v6012_v0  ;;  %v2323_v8 = vpop.f32.mrb[92].mxu1  ;;  %3663 = vtanh.f32 %v2320_v58 }
 0x35a   :  { %v2212_v27 = vpop.f32.mrb[93].mxu0  ;;  %v3644_v20 = vpop.eup %3643  ;;  %v2324_v3 = vadd.f32 %v2323_v8, %v6012_v0  ;;  %v2726_v14 = vpack.c.bf16 %v3642_v61, %v3634_v38 }
 0x35b   :  { %v2213_v60 = vadd.f32 %v2212_v27, %v6012_v0  ;;  %v2325_v13 = vpop.f32.mrb[93].mxu1  ;;  %v2214_v50 = vpop.f32.mrb[94].mxu0  ;;  %3665 = vtanh.f32 %v2211_v30  ;;  %v2728_v37 = vpack.c.bf16 %v3644_v20, %v3636_v25 }
 0x35c   :  { %v3646_v59 = vpop.eup %3645  ;;  %v2326_v34 = vadd.f32 %v2325_v13, %v6012_v0  ;;  %v2215_v57 = vadd.f32 %v2214_v50, %v6014_v51  ;;  %v2327_v5 = vpop.f32.mrb[94].mxu1  ;;  %3667 = vtanh.f32 %v2324_v3 }
 0x35d   :  { %v2216_v26 = vpop.f32.mrb[95].mxu0  ;;  %v3648_v1 = vpop.eup %3647  ;;  %v2328_v16 = vadd.f32 %v2327_v5, %v6014_v51  ;;  %v2727_v2 = vpack.c.bf16 %v3646_v59, %v3638_v10  ;;  %3669 = vtanh.f32 %v2213_v60 }
 0x35e   :  { %v2329_v62 = vpop.f32.mrb[95].mxu1  ;;  %v3650_v32 = vpop.eup %3649  ;;  %v2217_v6 = vadd.f32 %v2216_v26, %v6014_v51  ;;  %v2729_v63 = vpack.c.bf16 %v3648_v1, %v3640_v56  ;;  %3671 = vtanh.f32 %v2326_v34 }
 0x35f   :  { %v3652_v18 = vpop.eup %3651  ;;  %v2330_v31 = vadd.f32 %v2329_v62, %v6014_v51  ;;  %2761 = vmatprep.subr.bf16.mxu0 %v2727_v2  ;;  %3673 = vtanh.f32 %v2215_v57  ;;  %v2366_v41 = vpop.f32.mrb[96].mxu0 }
 0x360   :  { %v3654_v21 = vpop.eup %3653  ;;  %2802 = vmatprep.subr.bf16.mxu1 %v2729_v63  ;;  %2762 = vmatpush1.bf16.msra.mxu0 %v2726_v14  ;;  %3675 = vtanh.f32 %v2328_v16  ;;  %v2367_v15 = vadd.f32 %v2366_v41, %v5928_v42  ;;  %v2479_v52 = vpop.f32.mrb[96].mxu1 }
 0x361   :  { %v3656_v48 = vpop.eup %3655  ;;  %2803 = vmatpush1.bf16.msra.mxu1 %v2728_v37  ;;  %3677 = vtanh.f32 %v2217_v6  ;;  %v2368_v35 = vpop.f32.mrb[97].mxu0  ;;  %v2480_v24 = vadd.f32 %v2479_v52, %v5928_v42 }
 0x362   :  { %v3658_v19 = vpop.eup %3657  ;;  %3679 = vtanh.f32 %v2330_v31  ;;  %v2369_v44 = vadd.f32 %v2368_v35, %v5928_v42  ;;  %v2481_v33 = vpop.f32.mrb[97].mxu1 }
 0x363   :  { %v3660_v23 = vpop.eup %3659  ;;  %v2370_v22 = vpop.f32.mrb[98].mxu0  ;;  %v2734_v28 = vpack.c.bf16 %v3658_v19, %v3650_v32  ;;  %3681 = vtanh.f32 %v2367_v15  ;;  %v2482_v38 = vadd.f32 %v2481_v33, %v5928_v42 }
 0x364   :  { %v3662_v4 = vpop.eup %3661  ;;  %v2371_v11 = vadd.f32 %v2370_v22, %v5930_v39  ;;  %v2483_v54 = vpop.f32.mrb[98].mxu1  ;;  %v2736_v58 = vpack.c.bf16 %v3660_v23, %v3652_v18  ;;  %3683 = vtanh.f32 %v2480_v24  ;;  %v6043_v23 = vld [vmem:[%s6113_s7] sm:$0xf] }
 0x365   :  { %v2372_v25 = vpop.f32.mrb[99].mxu0  ;;  %v3664_v10 = vpop.eup %3663  ;;  %v2484_v56 = vadd.f32 %v2483_v54, %v5930_v39  ;;  %v2735_v61 = vpack.c.bf16 %v3662_v4, %v3654_v21  ;;  %3685 = vtanh.f32 %v2369_v44 }
 0x366   :  { %v2485_v45 = vpop.f32.mrb[99].mxu1  ;;  %v3666_v30 = vpop.eup %3665  ;;  %v2373_v8 = vadd.f32 %v2372_v25, %v5930_v39  ;;  %v2737_v27 = vpack.c.bf16 %v3664_v10, %v3656_v48  ;;  %3687 = vtanh.f32 %v2482_v38 }
 0x367   :  { %v3668_v20 = vpop.eup %3667  ;;  %v2486_v42 = vadd.f32 %v2485_v45, %v5930_v39  ;;  %2763 = vmatprep.subr.bf16.mxu0 %v2735_v61  ;;  %3689 = vtanh.f32 %v2371_v11  ;;  %v2376_v13 = vpop.f32.mrb[100].mxu0 }
 0x368   :  { %v3670_v3 = vpop.eup %3669  ;;  %2804 = vmatprep.subr.bf16.mxu1 %v2737_v27  ;;  %2764 = vmatpush1.bf16.msra.mxu0 %v2734_v28  ;;  %3691 = vtanh.f32 %v2484_v56  ;;  %v2377_v14 = vadd.f32 %v2376_v13, %v5940_v40  ;;  %v2489_v59 = vpop.f32.mrb[100].mxu1 }
 0x369   :  { %v3672_v60 = vpop.eup %3671  ;;  %2805 = vmatpush1.bf16.msra.mxu1 %v2736_v58  ;;  %3693 = vtanh.f32 %v2373_v8  ;;  %v2378_v34 = vpop.f32.mrb[101].mxu0  ;;  %v2490_v5 = vadd.f32 %v2489_v59, %v5940_v40 }
 0x36a   :  { %v3674_v50 = vpop.eup %3673  ;;  %3695 = vtanh.f32 %v2486_v42  ;;  %v2379_v39 = vadd.f32 %v2378_v34, %v5940_v40  ;;  %v2491_v26 = vpop.f32.mrb[101].mxu1 }
 0x36b   :  { %v3676_v57 = vpop.eup %3675  ;;  %v2380_v37 = vpop.f32.mrb[102].mxu0  ;;  %v2742_v1 = vpack.c.bf16 %v3674_v50, %v3666_v30  ;;  %3697 = vtanh.f32 %v2377_v14  ;;  %v2492_v62 = vadd.f32 %v2491_v26, %v5940_v40 }
 0x36c   :  { %v3678_v16 = vpop.eup %3677  ;;  %v2381_v2 = vadd.f32 %v2380_v37, %v5942_v46  ;;  %v2493_v32 = vpop.f32.mrb[102].mxu1  ;;  %v2744_v63 = vpack.c.bf16 %v3676_v57, %v3668_v20  ;;  %3699 = vtanh.f32 %v2490_v5 }
 0x36d   :  { %v2382_v6 = vpop.f32.mrb[103].mxu0  ;;  %v3680_v18 = vpop.eup %3679  ;;  %v2494_v31 = vadd.f32 %v2493_v32, %v5942_v46  ;;  %v2743_v48 = vpack.c.bf16 %v3678_v16, %v3670_v3  ;;  %3701 = vtanh.f32 %v2379_v39 }
 0x36e   :  { %v2495_v21 = vpop.f32.mrb[103].mxu1  ;;  %v3682_v41 = vpop.eup %3681  ;;  %v2383_v19 = vadd.f32 %v2382_v6, %v5942_v46  ;;  %v2745_v15 = vpack.c.bf16 %v3680_v18, %v3672_v60  ;;  %3703 = vtanh.f32 %v2492_v62 }
 0x36f   :  { %v3684_v52 = vpop.eup %3683  ;;  %v2496_v40 = vadd.f32 %v2495_v21, %v5942_v46  ;;  %2765 = vmatprep.subr.bf16.mxu0 %v2743_v48  ;;  %3705 = vtanh.f32 %v2381_v2  ;;  %v2386_v44 = vpop.f32.mrb[104].mxu0 }
 0x370   :  { %v3686_v35 = vpop.eup %3685  ;;  %2806 = vmatprep.subr.bf16.mxu1 %v2745_v15  ;;  %2766 = vmatpush1.bf16.msra.mxu0 %v2742_v1  ;;  %3707 = vtanh.f32 %v2494_v31  ;;  %v2387_v22 = vadd.f32 %v2386_v44, %v5952_v9  ;;  %v2499_v28 = vpop.f32.mrb[104].mxu1 }
 0x371   :  { %v3688_v24 = vpop.eup %3687  ;;  %2807 = vmatpush1.bf16.msra.mxu1 %v2744_v63  ;;  %3709 = vtanh.f32 %v2383_v19  ;;  %v2388_v46 = vpop.f32.mrb[105].mxu0  ;;  %v2500_v38 = vadd.f32 %v2499_v28, %v5952_v9 }
 0x372   :  { %v3690_v33 = vpop.eup %3689  ;;  %3711 = vtanh.f32 %v2496_v40  ;;  %v2389_v11 = vadd.f32 %v2388_v46, %v5952_v9  ;;  %v2501_v54 = vpop.f32.mrb[105].mxu1 }
 0x373   :  { %v3692_v4 = vpop.eup %3691  ;;  %v2390_v25 = vpop.f32.mrb[106].mxu0  ;;  %2784 = vmatmul.mubr.bf16.vlgmr.msra.gmra.mrb[128].mxu0 %v6043_v23  ;;  %v2690_v58 = vpack.c.bf16 %v3690_v33, %v3682_v41  ;;  %3713 = vtanh.f32 %v2387_v22  ;;  %v2502_v56 = vadd.f32 %v2501_v54, %v5952_v9 }
 0x374   :  { %v3694_v10 = vpop.eup %3693  ;;  %v2391_v45 = vadd.f32 %v2390_v25, %v5954_v29  ;;  %v2503_v61 = vpop.f32.mrb[106].mxu1  ;;  %2825 = vmatmul.mubr.bf16.vlgmr.msra.gmra.mrb[128].mxu1 %v6043_v23  ;;  %v2692_v8 = vpack.c.bf16 %v3692_v4, %v3684_v52  ;;  %2865 = vmatprep.mubr.bf16.mxu0 %v6417_v36  ;;  %3715 = vtanh.f32 %v2500_v38 }
 0x375   :  { %v2392_v30 = vpop.f32.mrb[107].mxu0  ;;  %v3696_v27 = vpop.eup %3695  ;;  %v2504_v20 = vadd.f32 %v2503_v61, %v5954_v29  ;;  %v2691_v3 = vpack.c.bf16 %v3694_v10, %v3686_v35  ;;  %2906 = vmatprep.mubr.bf16.mxu1 %v6417_v36  ;;  %3717 = vtanh.f32 %v2389_v11 }
 0x376   :  { %v2505_v42 = vpop.f32.mrb[107].mxu1  ;;  %v3698_v60 = vpop.eup %3697  ;;  %v2393_v9 = vadd.f32 %v2392_v30, %v5954_v29  ;;  %v2693_v13 = vpack.c.bf16 %v3696_v27, %v3688_v24  ;;  %3719 = vtanh.f32 %v2502_v56 }
 0x377   :  { %v3700_v50 = vpop.eup %3699  ;;  %v2506_v14 = vadd.f32 %v2505_v42, %v5954_v29  ;;  %2833 = vmatprep.subr.bf16.mxu0 %v2691_v3  ;;  %3721 = vtanh.f32 %v2391_v45  ;;  %v2396_v57 = vpop.f32.mrb[108].mxu0 }
 0x378   :  { %v3702_v59 = vpop.eup %3701  ;;  %2874 = vmatprep.subr.bf16.mxu1 %v2693_v13  ;;  %2834 = vmatpush1.bf16.msra.mxu0 %v2690_v58  ;;  %3723 = vtanh.f32 %v2504_v20  ;;  %v2397_v36 = vadd.f32 %v2396_v57, %v5964_v55  ;;  %v2509_v39 = vpop.f32.mrb[108].mxu1 }
 0x379   :  { %v3704_v34 = vpop.eup %3703  ;;  %2875 = vmatpush1.bf16.msra.mxu1 %v2692_v8  ;;  %3725 = vtanh.f32 %v2393_v9  ;;  %v2398_v26 = vpop.f32.mrb[109].mxu0  ;;  %v2510_v1 = vadd.f32 %v2509_v39, %v5964_v55 }
 0x37a   :  { %v3706_v5 = vpop.eup %3705  ;;  %3727 = vtanh.f32 %v2506_v14  ;;  %v2399_v29 = vadd.f32 %v2398_v26, %v5964_v55  ;;  %v2511_v16 = vpop.f32.mrb[109].mxu1 }
 0x37b   :  { %v3708_v37 = vpop.eup %3707  ;;  %v2400_v62 = vpop.f32.mrb[110].mxu0  ;;  %v2698_v2 = vpack.c.bf16 %v3706_v5, %v3698_v60  ;;  %3729 = vtanh.f32 %v2397_v36  ;;  %v2512_v6 = vadd.f32 %v2511_v16, %v5964_v55 }
 0x37c   :  { %v3710_v32 = vpop.eup %3709  ;;  %v2401_v63 = vadd.f32 %v2400_v62, %v5966_v47  ;;  %v2513_v18 = vpop.f32.mrb[110].mxu1  ;;  %v2700_v21 = vpack.c.bf16 %v3708_v37, %v3700_v50  ;;  %3731 = vtanh.f32 %v2510_v1 }
 0x37d   :  { %v2402_v31 = vpop.f32.mrb[111].mxu0  ;;  %v3712_v48 = vpop.eup %3711  ;;  %v2514_v41 = vadd.f32 %v2513_v18, %v5966_v47  ;;  %v2699_v15 = vpack.c.bf16 %v3710_v32, %v3702_v59  ;;  %3733 = vtanh.f32 %v2399_v29 }
 0x37e   :  { %v2515_v19 = vpop.f32.mrb[111].mxu1  ;;  %v3714_v52 = vpop.eup %3713  ;;  %v2403_v40 = vadd.f32 %v2402_v31, %v5966_v47  ;;  %v2701_v35 = vpack.c.bf16 %v3712_v48, %v3704_v34  ;;  %3735 = vtanh.f32 %v2512_v6 }
 0x37f   :  { %v3716_v24 = vpop.eup %3715  ;;  %v2516_v55 = vadd.f32 %v2515_v19, %v5966_v47  ;;  %2835 = vmatprep.subr.bf16.mxu0 %v2699_v15  ;;  %3737 = vtanh.f32 %v2401_v63  ;;  %v2406_v22 = vpop.f32.mrb[112].mxu0 }
 0x380   :  { %v3718_v44 = vpop.eup %3717  ;;  %2876 = vmatprep.subr.bf16.mxu1 %v2701_v35  ;;  %2836 = vmatpush1.bf16.msra.mxu0 %v2698_v2  ;;  %3739 = vtanh.f32 %v2514_v41  ;;  %v2407_v46 = vadd.f32 %v2406_v22, %v5976_v53  ;;  %v2519_v4 = vpop.f32.mrb[112].mxu1 }
 0x381   :  { %v3720_v33 = vpop.eup %3719  ;;  %2877 = vmatpush1.bf16.msra.mxu1 %v2700_v21  ;;  %3741 = vtanh.f32 %v2403_v40  ;;  %v2408_v38 = vpop.f32.mrb[113].mxu0  ;;  %v2520_v54 = vadd.f32 %v2519_v4, %v5976_v53 }
 0x382   :  { %v3722_v28 = vpop.eup %3721  ;;  %3743 = vtanh.f32 %v2516_v55  ;;  %v2409_v47 = vadd.f32 %v2408_v38, %v5976_v53  ;;  %v2521_v25 = vpop.f32.mrb[113].mxu1 }
 0x383   :  { %v3724_v11 = vpop.eup %3723  ;;  %v2410_v58 = vpop.f32.mrb[114].mxu0  ;;  %v2706_v10 = vpack.c.bf16 %v3722_v28, %v3714_v52  ;;  %3745 = vtanh.f32 %v2407_v46  ;;  %v2522_v45 = vadd.f32 %v2521_v25, %v5976_v53 }
 0x384   :  { %v3726_v56 = vpop.eup %3725  ;;  %v2411_v61 = vadd.f32 %v2410_v58, %v5978_v17  ;;  %v2523_v30 = vpop.f32.mrb[114].mxu1  ;;  %v2708_v27 = vpack.c.bf16 %v3724_v11, %v3716_v24  ;;  %3747 = vtanh.f32 %v2520_v54 }
 0x385   :  { %v2412_v8 = vpop.f32.mrb[115].mxu0  ;;  %v3728_v20 = vpop.eup %3727  ;;  %v2524_v42 = vadd.f32 %v2523_v30, %v5978_v17  ;;  %v2707_v60 = vpack.c.bf16 %v3726_v56, %v3718_v44  ;;  %3749 = vtanh.f32 %v2409_v47 }
 0x386   :  { %v2525_v3 = vpop.f32.mrb[115].mxu1  ;;  %v3730_v9 = vpop.eup %3729  ;;  %v2413_v13 = vadd.f32 %v2412_v8, %v5978_v17  ;;  %v2709_v50 = vpack.c.bf16 %v3728_v20, %v3720_v33  ;;  %3751 = vtanh.f32 %v2522_v45 }
 0x387   :  { %v3732_v14 = vpop.eup %3731  ;;  %v2526_v53 = vadd.f32 %v2525_v3, %v5978_v17  ;;  %2837 = vmatprep.subr.bf16.mxu0 %v2707_v60  ;;  %3753 = vtanh.f32 %v2411_v61  ;;  %v2416_v57 = vpop.f32.mrb[116].mxu0 }
 0x388   :  { %v3734_v59 = vpop.eup %3733  ;;  %2878 = vmatprep.subr.bf16.mxu1 %v2709_v50  ;;  %2838 = vmatpush1.bf16.msra.mxu0 %v2706_v10  ;;  %3755 = vtanh.f32 %v2524_v42  ;;  %v2417_v36 = vadd.f32 %v2416_v57, %v5988_v43  ;;  %v2529_v39 = vpop.f32.mrb[116].mxu1 }
 0x389   :  { %v3736_v34 = vpop.eup %3735  ;;  %2879 = vmatpush1.bf16.msra.mxu1 %v2708_v27  ;;  %3757 = vtanh.f32 %v2413_v13  ;;  %v2418_v26 = vpop.f32.mrb[117].mxu0  ;;  %v2530_v1 = vadd.f32 %v2529_v39, %v5988_v43 }
 0x38a   :  { %v3738_v5 = vpop.eup %3737  ;;  %3759 = vtanh.f32 %v2526_v53  ;;  %v2419_v17 = vadd.f32 %v2418_v26, %v5988_v43  ;;  %v2531_v29 = vpop.f32.mrb[117].mxu1 }
 0x38b   :  { %v3740_v37 = vpop.eup %3739  ;;  %v2420_v16 = vpop.f32.mrb[118].mxu0  ;;  %v2714_v62 = vpack.c.bf16 %v3738_v5, %v3730_v9  ;;  %3761 = vtanh.f32 %v2417_v36  ;;  %v2532_v32 = vadd.f32 %v2531_v29, %v5988_v43 }
 0x38c   :  { %v3742_v2 = vpop.eup %3741  ;;  %v2421_v6 = vadd.f32 %v2420_v16, %v5990_v49  ;;  %v2533_v63 = vpop.f32.mrb[118].mxu1  ;;  %v2716_v31 = vpack.c.bf16 %v3740_v37, %v3732_v14  ;;  %3763 = vtanh.f32 %v2530_v1 }
 0x38d   :  { %v2422_v18 = vpop.f32.mrb[119].mxu0  ;;  %v3744_v21 = vpop.eup %3743  ;;  %v2534_v48 = vadd.f32 %v2533_v63, %v5990_v49  ;;  %v2715_v19 = vpack.c.bf16 %v3742_v2, %v3734_v59  ;;  %3765 = vtanh.f32 %v2419_v17 }
 0x38e   :  { %v2535_v41 = vpop.f32.mrb[119].mxu1  ;;  %v3746_v15 = vpop.eup %3745  ;;  %v2423_v52 = vadd.f32 %v2422_v18, %v5990_v49  ;;  %v2717_v40 = vpack.c.bf16 %v3744_v21, %v3736_v34  ;;  %3767 = vtanh.f32 %v2532_v32 }
 0x38f   :  { %v3748_v35 = vpop.eup %3747  ;;  %v2536_v43 = vadd.f32 %v2535_v41, %v5990_v49  ;;  %2839 = vmatprep.subr.bf16.mxu0 %v2715_v19  ;;  %3769 = vtanh.f32 %v2421_v6  ;;  %v2426_v44 = vpop.f32.mrb[120].mxu0 }
 0x390   :  { %v3750_v24 = vpop.eup %3749  ;;  %2880 = vmatprep.subr.bf16.mxu1 %v2717_v40  ;;  %2840 = vmatpush1.bf16.msra.mxu0 %v2714_v62  ;;  %3771 = vtanh.f32 %v2534_v48  ;;  %v2427_v22 = vadd.f32 %v2426_v44, %v6000_v7  ;;  %v2539_v28 = vpop.f32.mrb[120].mxu1 }
 0x391   :  { %v3752_v55 = vpop.eup %3751  ;;  %2881 = vmatpush1.bf16.msra.mxu1 %v2716_v31  ;;  %3773 = vtanh.f32 %v2423_v52  ;;  %v2428_v46 = vpop.f32.mrb[121].mxu0  ;;  %v2540_v38 = vadd.f32 %v2539_v28, %v6000_v7 }
 0x392   :  { %v3754_v33 = vpop.eup %3753  ;;  %3775 = vtanh.f32 %v2536_v43  ;;  %v2429_v49 = vadd.f32 %v2428_v46, %v6000_v7  ;;  %v2541_v11 = vpop.f32.mrb[121].mxu1 }
 0x393   :  { %v3756_v4 = vpop.eup %3755  ;;  %v2430_v54 = vpop.f32.mrb[122].mxu0  ;;  %v2722_v47 = vpack.c.bf16 %v3754_v33, %v3746_v15  ;;  %3777 = vtanh.f32 %v2427_v22  ;;  %v2542_v58 = vadd.f32 %v2541_v11, %v6000_v7 }
 0x394   :  { %v3758_v25 = vpop.eup %3757  ;;  %v2431_v10 = vadd.f32 %v2430_v54, %v6002_v12  ;;  %v2543_v56 = vpop.f32.mrb[122].mxu1  ;;  %v2724_v61 = vpack.c.bf16 %v3756_v4, %v3748_v35  ;;  %3779 = vtanh.f32 %v2540_v38 }
 0x395   :  { %v2432_v45 = vpop.f32.mrb[123].mxu0  ;;  %v3760_v30 = vpop.eup %3759  ;;  %v2544_v8 = vadd.f32 %v2543_v56, %v6002_v12  ;;  %v2723_v20 = vpack.c.bf16 %v3758_v25, %v3750_v24  ;;  %3781 = vtanh.f32 %v2429_v49 }
 0x396   :  { %v2545_v27 = vpop.f32.mrb[123].mxu1  ;;  %v3762_v42 = vpop.eup %3761  ;;  %v2433_v3 = vadd.f32 %v2432_v45, %v6002_v12  ;;  %v2725_v60 = vpack.c.bf16 %v3760_v30, %v3752_v55  ;;  %3783 = vtanh.f32 %v2542_v58  ;;  %v2916_v45 = vstv %s6114_s8 }
 0x397   :  { %v3764_v9 = vpop.eup %3763  ;;  %v2546_v7 = vadd.f32 %v2545_v27, %v6002_v12  ;;  %2841 = vmatprep.subr.bf16.mxu0 %v2723_v20  ;;  %3785 = vtanh.f32 %v2431_v10  ;;  %v2436_v14 = vpop.f32.mrb[124].mxu0  ;;  %v3811_v10 = vmov 1966171168  }
 0x398   :  { %v3766_v13 = vpop.eup %3765  ;;  %2882 = vmatprep.subr.bf16.mxu1 %v2725_v60  ;;  %2842 = vmatpush1.bf16.msra.mxu0 %v2722_v47  ;;  %3787 = vtanh.f32 %v2544_v8  ;;  %v2437_v59 = vadd.f32 %v2436_v14, %v6012_v0  ;;  %v2549_v34 = vpop.f32.mrb[124].mxu1  ;;  %v2938_v56 = vunpack.c.l.s4 %v3811_v10  ;;  %v6441_v60 = vld [vmem:[#allocation3_spill] sm:$0xff] }
 0x399   :  { %v3768_v50 = vpop.eup %3767  ;;  %2883 = vmatpush1.bf16.msra.mxu1 %v2724_v61  ;;  %3789 = vtanh.f32 %v2433_v3  ;;  %v2438_v57 = vpop.f32.mrb[125].mxu0  ;;  %v2550_v36 = vadd.f32 %v2549_v34, %v6012_v0 }
 0x39a   :  { %v3770_v53 = vpop.eup %3769  ;;  %3791 = vtanh.f32 %v2546_v7  ;;  %v2439_v12 = vadd.f32 %v2438_v57, %v6012_v0  ;;  %v2551_v39 = vpop.f32.mrb[125].mxu1  ;;  %v2939_v61 = vunpack.c.0.s8 %v2938_v56 }
 0x39b   :  { %v3772_v5 = vpop.eup %3771  ;;  %v2440_v26 = vpop.f32.mrb[126].mxu0  ;;  %v2730_v37 = vpack.c.bf16 %v3770_v53, %v3762_v42  ;;  %3793 = vtanh.f32 %v2437_v59  ;;  %v2552_v17 = vadd.f32 %v2551_v39, %v6012_v0 }
 0x39c   :  { %v3774_v1 = vpop.eup %3773  ;;  %v2441_v29 = vadd.f32 %v2440_v26, %v6014_v51  ;;  %v2553_v16 = vpop.f32.mrb[126].mxu1  ;;  %v2732_v2 = vpack.c.bf16 %v3772_v5, %v3764_v9  ;;  %3795 = vtanh.f32 %v2550_v36  ;;  %v2942_v9 = vsub.s32 %v2939_v61, %v6441_v60 }
 0x39d   :  { %v2442_v62 = vpop.f32.mrb[127].mxu0  ;;  %v3776_v32 = vpop.eup %3775  ;;  %v2554_v6 = vadd.f32 %v2553_v16, %v6014_v51  ;;  %v2731_v18 = vpack.c.bf16 %v3774_v1, %v3766_v13  ;;  %3797 = vtanh.f32 %v2439_v12 }
 0x39e   :  { %v2555_v63 = vpop.f32.mrb[127].mxu1  ;;  %v3778_v31 = vpop.eup %3777  ;;  %v2443_v21 = vadd.f32 %v2442_v62, %v6014_v51  ;;  %v2733_v48 = vpack.c.bf16 %v3776_v32, %v3768_v50  ;;  %3799 = vtanh.f32 %v2552_v17 }
 0x39f   :  { %v3780_v41 = vpop.eup %3779  ;;  %v2556_v0 = vadd.f32 %v2555_v63, %v6014_v51  ;;  %2843 = vmatprep.subr.bf16.mxu0 %v2731_v18  ;;  %3801 = vtanh.f32 %v2441_v29 }
 0x3a0   :  { %v3782_v19 = vpop.eup %3781  ;;  %2884 = vmatprep.subr.bf16.mxu1 %v2733_v48  ;;  %2844 = vmatpush1.bf16.msra.mxu0 %v2730_v37  ;;  %3803 = vtanh.f32 %v2554_v6 }
 0x3a1   :  { %v3784_v15 = vpop.eup %3783  ;;  %2885 = vmatpush1.bf16.msra.mxu1 %v2732_v2  ;;  %3805 = vtanh.f32 %v2443_v21 }
 0x3a2   :  { %v3786_v52 = vpop.eup %3785  ;;  %3807 = vtanh.f32 %v2556_v0 }
 0x3a3   :  { %v3788_v40 = vpop.eup %3787  ;;  %v2738_v35 = vpack.c.bf16 %v3786_v52, %v3778_v31 }
 0x3a4   :  { %v3790_v43 = vpop.eup %3789  ;;  %v2740_v24 = vpack.c.bf16 %v3788_v40, %v3780_v41 }
 0x3a5   :  { %v3792_v55 = vpop.eup %3791  ;;  %v2739_v44 = vpack.c.bf16 %v3790_v43, %v3782_v19 }
 0x3a6   :  { %v3794_v33 = vpop.eup %3793  ;;  %v2741_v22 = vpack.c.bf16 %v3792_v55, %v3784_v15 }
 0x3a7   :  { %v3796_v51 = vpop.eup %3795  ;;  %2845 = vmatprep.subr.bf16.mxu0 %v2739_v44 }
 0x3a8   :  { %v3798_v28 = vpop.eup %3797  ;;  %2886 = vmatprep.subr.bf16.mxu1 %v2741_v22  ;;  %2846 = vmatpush1.bf16.msra.mxu0 %v2738_v35 }
 0x3a9   :  { %v3800_v46 = vpop.eup %3799  ;;  %2887 = vmatpush1.bf16.msra.mxu1 %v2740_v24 }
 0x3aa   :  { %v3802_v4 = vpop.eup %3801 }
 0x3ab   :  { %v3804_v38 = vpop.eup %3803  ;;  %v2746_v49 = vpack.c.bf16 %v3802_v4, %v3794_v33 }
 0x3ac   :  { %v3806_v11 = vpop.eup %3805  ;;  %v2748_v54 = vpack.c.bf16 %v3804_v38, %v3796_v51 }
 0x3ad   :  { %v3808_v47 = vpop.eup %3807  ;;  %v2747_v25 = vpack.c.bf16 %v3806_v11, %v3798_v28 }
 0x3ae   :  { %v2749_v58 = vpack.c.bf16 %v3808_v47, %v3800_v46 }
 0x3af   :  { %2847 = vmatprep.subr.bf16.mxu0 %v2747_v25 }
 0x3b0   :  { %2888 = vmatprep.subr.bf16.mxu1 %v2749_v58  ;;  %2848 = vmatpush1.bf16.msra.mxu0 %v2746_v49 }
 0x3b1   :  { %2889 = vmatpush1.bf16.msra.mxu1 %v2748_v54 }
 0x3b3   :  { %2866 = vmatmul.mubr.bf16.vlgmr.msra.gmra.mrb[132].mxu0 %v6043_v23 }
 0x3b4   :  { %2907 = vmatmul.mubr.bf16.vlgmr.msra.gmra.mrb[132].mxu1 %v6043_v23 }
 0x446   :  { %v2785_v30 = vpop.f32.mrb[128].mxu0 }
 0x447   :  { %v2917_v8 = vadd.f32 %v2916_v45, %v2785_v30  ;;  %v2826_v27 = vpop.f32.mrb[128].mxu1  ;;  %v2787_v20 = vpop.f32.mrb[129].mxu0 }
 0x448   :  { %v2919_v42 = vadd.f32 %v2916_v45, %v2826_v27  ;;  %v2918_v3 = vadd.f32 %v2916_v45, %v2787_v20  ;;  %v2828_v7 = vpop.f32.mrb[129].mxu1  ;;  %v2789_v13 = vpop.f32.mrb[130].mxu0 }
 0x449   :  { %v2920_v50 = vadd.f32 %v2916_v45, %v2828_v7  ;;  %v2830_v14 = vpop.f32.mrb[130].mxu1  ;;  %v2790_v23 = vpop.f32.mrb[131].mxu0 }
 0x44a   :  { %v2933_v53 = vcombine.low %v2917_v8, %v2918_v3  ;;  %v2831_v59 = vpop.f32.mrb[131].mxu1 }
 0x44b   :  { %v2934_v34 = vcombine.low %v2919_v42, %v2920_v50 }
 0x44c   :  { %v2943_v57 = vrot.slane %v2933_v53, %v2942_v9 }
 0x44d   :  { %v2950_v5 = vrot.slane %v2934_v34, %v2942_v9 }
 0x44f   :  { %v2965_v36 = vcombine.low %v2943_v57, %v2950_v5 }
 0x451   :  { %v2973_v41 = vrot.slane %v2965_v36, %v2942_v9 }
 0x486   :  { %v2867_v12 = vpop.f32.mrb[132].mxu0 }
 0x487   :  { %v2921_v39 = vadd.f32 %v2916_v45, %v2867_v12  ;;  %v2908_v26 = vpop.f32.mrb[132].mxu1  ;;  %v2869_v37 = vpop.f32.mrb[133].mxu0 }
 0x488   :  { %v2923_v1 = vadd.f32 %v2916_v45, %v2908_v26  ;;  %v2922_v17 = vadd.f32 %v2916_v45, %v2869_v37  ;;  %v2910_v29 = vpop.f32.mrb[133].mxu1  ;;  %v2871_v16 = vpop.f32.mrb[134].mxu0 }
 0x489   :  { %v2924_v62 = vadd.f32 %v2916_v45, %v2910_v29  ;;  %v2912_v2 = vpop.f32.mrb[134].mxu1  ;;  %v2872_v32 = vpop.f32.mrb[135].mxu0 }
 0x48a   :  { %v2935_v6 = vcombine.low %v2921_v39, %v2922_v17  ;;  %v2913_v63 = vpop.f32.mrb[135].mxu1 }
 0x48b   :  { %v2936_v18 = vcombine.low %v2923_v1, %v2924_v62 }
 0x48c   :  { %v2957_v31 = vrot.slane %v2935_v6, %v2942_v9 }
 0x48d   :  { %v2964_v21 = vrot.slane %v2936_v18, %v2942_v9 }
 0x48f   :  { %v2966_v48 = vcombine.low %v2957_v31, %v2964_v21 }
 0x491   :  { %v2980_v0 = vrot.slane %v2966_v48, %v2942_v9 }
 0x493   :  { %v2981_v19 = vcombine.low %v2973_v41, %v2980_v0 }
 0x495   :  { %2983 = vst [vmem:[%s6115_s9] sm:$0xff] %v2981_v19 }

</bundles_post_ra>
